<compile_context>
chip_gen: v7x
topology: tpu7x:2x2x1
jax: 0.10.0
libtpu: 0.0.40
codegen_flags: <defaults>
</compile_context>

<pallas_src>
import jax
import jax.numpy as jnp
from jax.experimental import pallas as pl
from jax.experimental.pallas import tpu as pltpu

_GRANULE = 1024  # batch-tile granule; keeps every block (8,128)-aligned for any packing


def _round_up(n, m):
    return ((n + m - 1) // m) * m


def _round_down(n, m):
    return (n // m) * m


def _packing_factor(d):
    """How many batch rows to pack into one lane-dense VMEM row."""
    if d % 128 == 0:
        return 1                      # already lane-aligned
    if 128 % d == 0:
        return min(1024 // d, 128)    # pack to 1024-lane rows
    return 1                          # odd widths: fall back to (TB, D) blocks


def lin_reg_kernel(w_ref, b_ref, x_ref, o_ref):
    # w_ref: (P*D, P)       block-diagonal folded weight, VMEM-resident across the grid
    # b_ref: (1, 1)         folded bias, SMEM scalar
    # x_ref: (TB_rows, P*D) lane-packed batch tile (P batch rows per VMEM row)
    # o_ref: (TB_rows, P)   outputs; row-major flat order == original batch order
    y = jnp.dot(x_ref[...], w_ref[...],
                preferred_element_type=jnp.float32,
                precision=jax.lax.Precision.HIGHEST)
    o_ref[...] = (y + b_ref[0, 0]).astype(o_ref.dtype)


def fold_lin_reg_params(params):
    """Collapse the 4 stacked affine layers into one (exact in real arithmetic)."""
    hp = jax.lax.Precision.HIGHEST
    w = params["w1"]
    b = params["b1"]
    for i in (2, 3, 4):
        w = jnp.dot(w, params[f"w{i}"], precision=hp)
        b = jnp.dot(b, params[f"w{i}"], precision=hp) + params[f"b{i}"]
    return w, b                      # (D, 1), (1, 1)


def lin_reg_apply(x, w_eff, b_eff, tb=None):
    """x: (B, D) float32.  w_eff: (D, 1), b_eff: (1, 1) folded affine map."""
    B, D = x.shape
    P = _packing_factor(D)
    C = P * D

    # Block-diagonal weight: one MXU dot does the per-packed-row multiply + reduce.
    w_blk = jnp.kron(jnp.eye(P, dtype=w_eff.dtype), w_eff)        # (C, P)

    # Batch tile (in batch elements): ~8 MiB of x per pipeline buffer.
    if tb is None:
        tb = (8 * 1024 * 1024) // (D * 4)
    TB = max(_GRANULE, _round_down(tb, _GRANULE))
    B_ceil = _round_up(B, _GRANULE)
    TB = min(TB, B_ceil)
    # v7x has 2 TensorCores: keep >=2 grid steps when the batch allows it.
    if B_ceil >= 2 * _GRANULE and TB > B_ceil // 2:
        TB = max(_GRANULE, _round_down(B_ceil // 2, _GRANULE))
    B_pad = _round_up(B, TB)

    if B_pad != B:
        x = jnp.pad(x, ((0, B_pad - B), (0, 0)))
    # Free row-major reshape: P consecutive batch rows share one lane-dense row.
    x_packed = x.reshape(B_pad // P, C)
    tb_rows = TB // P
    grid = (B_pad // TB,)

    out = pl.pallas_call(
        lin_reg_kernel,
        out_shape=jax.ShapeDtypeStruct((B_pad // P, P), x.dtype),
        grid_spec=pltpu.PrefetchScalarGridSpec(
            num_scalar_prefetch=0,
            grid=grid,
            in_specs=[
                pl.BlockSpec((C, P), lambda i: (0, 0)),             # folded weight (resident)
                pl.BlockSpec(memory_space=pltpu.MemorySpace.SMEM),  # folded bias (scalar)
                pl.BlockSpec((tb_rows, C), lambda i: (i, 0)),       # lane-packed x tile
            ],
            out_specs=pl.BlockSpec((tb_rows, P), lambda i: (i, 0)),
        ),
        compiler_params=pltpu.CompilerParams(
            dimension_semantics=("parallel",),        # shard tiles across TCs on v7x
            vmem_limit_bytes=32 * 1024 * 1024,        # safe on v5e / v6e / v7x
        ),
    )(w_blk, b_eff, x_packed)

    # Row-major flat order of `out` is the original batch order.
    return out.reshape(-1)[:B].reshape(B, 1)


def lin_reg_forward(x, params, tb=None):
    w_eff, b_eff = fold_lin_reg_params(params)
    return lin_reg_apply(x, w_eff, b_eff, tb=tb)


def init_params(key, input_size, n_hidden):
    """Deterministic init mimicking nn.Linear's U(-1/sqrt(fan_in), 1/sqrt(fan_in)).
    Weights stored as (in_features, out_features), biases as (1, out_features)."""
    dims = [(input_size, n_hidden), (n_hidden, n_hidden),
            (n_hidden, n_hidden), (n_hidden, 1)]
    params = {}
    keys = jax.random.split(key, 2 * len(dims))
    for i, (fan_in, fan_out) in enumerate(dims):
        bound = 1.0 / (fan_in ** 0.5)
        params[f"w{i + 1}"] = jax.random.uniform(
            keys[2 * i], (fan_in, fan_out), minval=-bound, maxval=bound,
            dtype=jnp.float32)
        params[f"b{i + 1}"] = jax.random.uniform(
            keys[2 * i + 1], (1, fan_out), minval=-bound, maxval=bound,
            dtype=jnp.float32)
    return params


if __name__ == "__main__":
    key = jax.random.PRNGKey(0)
    k_x, k_p = jax.random.split(key)

    batch, input_size, n_hidden = 16, 32, 32
    x = jax.random.normal(k_x, (batch, input_size), dtype=jnp.float32)
    params = init_params(k_p, input_size, n_hidden)

    # jit so the tiny param fold is compiled/hoisted alongside the kernel call.
    fwd = jax.jit(lin_reg_forward)
    out = fwd(x, params)
    jax.block_until_ready(out)

    # Reference: the original four chained linear layers in plain JAX (f32).
    ref = x
    for i in range(1, 5):
        ref = jnp.dot(ref, params[f"w{i}"],
                      precision=jax.lax.Precision.HIGHEST) + params[f"b{i}"]
    assert out.shape == (batch, 1)
    assert jnp.allclose(out, ref, atol=1e-4, rtol=1e-4), \
        float(jnp.max(jnp.abs(out - ref)))

    print("KERNEL_OK")
</pallas_src>

<mosaic_0001>
module attributes {stable_mosaic.version = 11 : i64} {
  func.func @lin_reg_kernel(%arg0: i32, %arg1: memref<1024x32xf32, #tpu.memory_space<vmem>>, %arg2: memref<1x1xf32, #tpu.memory_space<smem>>, %arg3: memref<32x1024xf32, #tpu.memory_space<vmem>>, %arg4: memref<32x32xf32, #tpu.memory_space<vmem>>) attributes {dimension_semantics = [#tpu.dimension_semantics<parallel>], iteration_bounds = array<i64: 1>, scalar_prefetch = 0 : i64, scratch_operands = 0 : i64, tpu.core_type = #tpu.core_type<tc>, window_params = [{pipeline_mode = #tpu.pipeline_mode<synchronous>, transform_indices = @transform_0, window_bounds = array<i64: 1024, 32>}, {transform_indices = @transform_1, window_bounds = array<i64: 1, 1>}, {transform_indices = @transform_2, window_bounds = array<i64: 32, 1024>}, {transform_indices = @transform_3, window_bounds = array<i64: 32, 32>}]} {
    %c0 = arith.constant 0 : index
    %c0_0 = arith.constant 0 : index
    %0 = vector.load %arg3[%c0, %c0_0] : memref<32x1024xf32, #tpu.memory_space<vmem>>, vector<32x1024xf32>
    %c0_1 = arith.constant 0 : index
    %c0_2 = arith.constant 0 : index
    %1 = vector.load %arg1[%c0_1, %c0_2] : memref<1024x32xf32, #tpu.memory_space<vmem>>, vector<1024x32xf32>
    %cst = arith.constant dense<0.000000e+00> : vector<32x32xf32>
    %2 = tpu.matmul %0, %1, %cst {dimension_numbers = #tpu.dot_dimension_numbers<[1], [0], [0], [1], [0, 0, 1, 1], [], []>, precision = #tpu.contract_precision<fp32>} : vector<32x1024xf32>, vector<1024x32xf32>, vector<32x32xf32> -> vector<32x32xf32>
    %c0_3 = arith.constant 0 : index
    %c0_4 = arith.constant 0 : index
    %3 = memref.load %arg2[%c0_3, %c0_4] : memref<1x1xf32, #tpu.memory_space<smem>>
    %4 = vector.broadcast %3 : f32 to vector<32x32xf32>
    %5 = arith.addf %2, %4 : vector<32x32xf32>
    %c0_5 = arith.constant 0 : index
    %c0_6 = arith.constant 0 : index
    %6 = vector.load %arg4[%c0_5, %c0_6] : memref<32x32xf32, #tpu.memory_space<vmem>>, vector<32x32xf32>
    tpu.vector_store %arg4[%c0_5, %c0_6], %5 {strides = array<i32>} : memref<32x32xf32, #tpu.memory_space<vmem>>, vector<32x32xf32>,
    return
  }
  func.func @transform_0(%arg0: i32) -> (i32, i32) {
    %c0_i32 = arith.constant 0 : i32
    %c0_i32_0 = arith.constant 0 : i32
    %c0_i32_1 = arith.constant 0 : i32
    return %c0_i32, %c0_i32_0 : i32, i32
  }
  func.func @transform_1(%arg0: i32) -> (i32, i32) {
    %c0_i32 = arith.constant 0 : i32
    %c0_i32_0 = arith.constant 0 : i32
    %c0_i32_1 = arith.constant 0 : i32
    return %c0_i32, %c0_i32_0 : i32, i32
  }
  func.func @transform_2(%arg0: i32) -> (i32, i32) {
    %c0_i32 = arith.constant 0 : i32
    %c0_i32_0 = arith.constant 0 : i32
    return %arg0, %c0_i32 : i32, i32
  }
  func.func @transform_3(%arg0: i32) -> (i32, i32) {
    %c0_i32 = arith.constant 0 : i32
    %c0_i32_0 = arith.constant 0 : i32
    return %arg0, %c0_i32 : i32, i32
  }
}

</mosaic_0001>

<bundles_post_ra>
// kernel: lin_reg_forward.1
= control target key start
LH: loop header
LB: loop body
LE: loop exit
PB: predicated region body
PF: predicated region fallthrough
CT: control target
= control target key end

     0   :  { %vm4297_vm0 = vcmask 261120   ;;  %s8884_s0 = inlined_call_operand.vmem [shape: f32[1024,32], index: 0, kind: input, shape index: {}]   ;;  %s8885_s2 = inlined_call_operand.vmem [shape: f32[32,1024], index: 2, kind: input, shape index: {}]   ;;  %s8886_s1 = inlined_call_operand.<no memory space> [shape: f32[1,1], index: 1, kind: input, shape index: {}]   ;;  %s8887_s3 = inlined_call_operand.vmem [shape: f32[32,32], index: 3, kind: output, shape index: {}]  }
   0x1   :  { %v63_v0 = vld [vmem:[%s8884_s0 + $0x80] sm:$0xff]  ;;  %v64_v1 = vld [vmem:[%s8884_s0 + $0x88] sm:$0xff]  ;;  %v65_v7 = vld [vmem:[%s8884_s0 + $0x90] sm:$0xff] }
   0x2   :  { %v47_v2 = vld [vmem:[%s8884_s0] sm:$0xff]  ;;  %v226_v3 = vand.u32 4294901760, %v63_v0  ;;  %v229_v4 = vand.u32 4294901760, %v64_v1  ;;  %v48_v5 = vld [vmem:[%s8884_s0 + $0x8] sm:$0xff]  ;;  %v66_v8 = vld [vmem:[%s8884_s0 + $0x98] sm:$0xff]  ;;  %v232_v10 = vand.u32 4294901760, %v65_v7 }
   0x3   :  { %v178_v6 = vand.u32 4294901760, %v47_v2  ;;  %v181_v9 = vand.u32 4294901760, %v48_v5  ;;  %v235_v11 = vand.u32 4294901760, %v66_v8  ;;  %v49_v12 = vld [vmem:[%s8884_s0 + $0x10] sm:$0xff]  ;;  %v50_v13 = vld [vmem:[%s8884_s0 + $0x18] sm:$0xff]  ;;  %v67_v18 = vld [vmem:[%s8884_s0 + $0xa0] sm:$0xff] }
   0x4   :  { %v6174_v14 = vpack.c.bf16 %v229_v4, %v226_v3  ;;  %v184_v16 = vand.u32 4294901760, %v49_v12  ;;  %v187_v17 = vand.u32 4294901760, %v50_v13  ;;  %v68_v19 = vld [vmem:[%s8884_s0 + $0xa8] sm:$0xff]  ;;  %v51_v23 = vld [vmem:[%s8884_s0 + $0x20] sm:$0xff]  ;;  %v6197_v25 = vsub.f32 %v65_v7, %v232_v10  ;;  %v69_v37 = vld [vmem:[%s8884_s0 + $0xb0] sm:$0xff] }
   0x5   :  { %v6176_v15 = vsub.f32 %v47_v2, %v178_v6  ;;  %v6184_v20 = vpack.c.bf16 %v181_v9, %v178_v6  ;;  %v6186_v21 = vsub.f32 %v48_v5, %v181_v9  ;;  %v6188_v22 = vpack.c.bf16 %v235_v11, %v232_v10  ;;  %v52_v24 = vld [vmem:[%s8884_s0 + $0x28] sm:$0xff]  ;;  %v70_v42 = vld [vmem:[%s8884_s0 + $0xb8] sm:$0xff]  ;;  %v53_v55 = vld [vmem:[%s8884_s0 + $0x30] sm:$0xff] }
   0x6   :  { %9234 = vst [vmem:[#allocation3_spill] sm:$0xff] %v6174_v14  ;;  %5363 = vmatprep.subr.bf16.mxu0 %v6174_v14  ;;  %v6199_v26 = vsub.f32 %v66_v8, %v235_v11  ;;  %v6201_v27 = vpack.c.bf16 %v187_v17, %v184_v16  ;;  %v6203_v28 = vsub.f32 %v49_v12, %v184_v16  ;;  %v238_v29 = vand.u32 4294901760, %v67_v18  ;;  %v54_v56 = vld [vmem:[%s8884_s0 + $0x38] sm:$0xff]  ;;  %v71_v5 = vld [vmem:[%s8884_s0 + $0xc0] sm:$0xff]  ;;  %v72_v6 = vld [vmem:[%s8884_s0 + $0xc8] sm:$0xff] }
   0x7   :  { %5365 = vmatpush3.bf16.msra.mxu0 %v6184_v20  ;;  %v241_v30 = vand.u32 4294901760, %v68_v19  ;;  %v6206_v31 = vsub.f32 %v63_v0, %v226_v3  ;;  %v6208_v32 = vsub.f32 %v64_v1, %v229_v4  ;;  %v190_v33 = vand.u32 4294901760, %v51_v23  ;;  %v55_v11 = vld [vmem:[%s8884_s0 + $0x40] sm:$0xff] }
   0x8   :  { %5367 = vmatprep.subr.bf16.mxu0 %v6188_v22  ;;  %v193_v34 = vand.u32 4294901760, %v52_v24  ;;  %v8904_v35 = vand.u32 4294901760, %v6176_v15  ;;  %v8903_v36 = vand.u32 4294901760, %v6186_v21  ;;  %v6216_v38 = vsub.f32 %v50_v13, %v187_v17 }
   0x9   :  { %v6218_v39 = vpack.c.bf16 %v241_v30, %v238_v29  ;;  %v6220_v40 = vsub.f32 %v67_v18, %v238_v29  ;;  %v8909_v41 = vand.u32 4294901760, %v6206_v31  ;;  %v6226_v43 = vsub.f32 %v68_v19, %v241_v30  ;;  %v56_v29 = vld [vmem:[%s8884_s0 + $0x48] sm:$0xff] }
   0xa   :  { %v8906_v44 = vand.u32 4294901760, %v6208_v32  ;;  %v6229_v45 = vpack.c.bf16 %v193_v34, %v190_v33  ;;  %v6231_v46 = vsub.f32 %v51_v23, %v190_v33  ;;  %v338_v48 = vsub.f32 %v6176_v15, %v8904_v35 }
   0xb   :  { %5369 = vmatpush3.bf16.msra.mxu0 %v6201_v27  ;;  %v450_v47 = vsub.f32 %v6206_v31, %v8909_v41  ;;  %v345_v49 = vsub.f32 %v6186_v21, %v8903_v36  ;;  %v244_v50 = vand.u32 4294901760, %v69_v37  ;;  %v247_v52 = vand.u32 4294901760, %v70_v42 }
   0xc   :  { %5371 = vmatprep.subr.bf16.mxu0 %v6218_v39  ;;  %v457_v51 = vsub.f32 %v6208_v32, %v8906_v44  ;;  %v8901_v53 = vand.u32 4294901760, %v6197_v25  ;;  %v8900_v54 = vand.u32 4294901760, %v6199_v26  ;;  %v6255_v58 = vsub.f32 %v52_v24, %v193_v34 }
   0xd   :  { %v451_v57 = vand.u32 4294901760, %v450_v47  ;;  %v339_v59 = vand.u32 4294901760, %v338_v48  ;;  %v346_v60 = vand.u32 4294901760, %v345_v49  ;;  %v6257_v62 = vpack.c.bf16 %v247_v52, %v244_v50 }
   0xe   :  { %v458_v61 = vand.u32 4294901760, %v457_v51  ;;  %v6259_v63 = vsub.f32 %v69_v37, %v244_v50  ;;  %v464_v0 = vsub.f32 %v6197_v25, %v8901_v53  ;;  %v471_v2 = vsub.f32 %v6199_v26, %v8900_v54 }
   0xf   :  { %5373 = vmatpush3.bf16.msra.mxu0 %v6229_v45  ;;  %v5396_v1 = vpack.c.bf16 %v346_v60, %v339_v59  ;;  %v196_v3 = vand.u32 4294901760, %v53_v55  ;;  %v199_v4 = vand.u32 4294901760, %v54_v56  ;;  %v8899_v9 = vand.u32 4294901760, %v6203_v28 }
  0x10   :  { %v5394_v7 = vpack.c.bf16 %v458_v61, %v451_v57  ;;  %5375 = vmatprep.subr.bf16.mxu0 %v6257_v62  ;;  %v465_v8 = vand.u32 4294901760, %v464_v0  ;;  %v8896_v10 = vand.u32 4294901760, %v6216_v38  ;;  %v6280_v12 = vsub.f32 %v70_v42, %v247_v52  ;;  %v74_v57 = vld [vmem:[%s8884_s0 + $0xd8] sm:$0xff] }
  0x11   :  { %v472_v13 = vand.u32 4294901760, %v471_v2  ;;  %v6282_v16 = vpack.c.bf16 %v199_v4, %v196_v3  ;;  %v6284_v17 = vsub.f32 %v53_v55, %v196_v3  ;;  %v352_v18 = vsub.f32 %v6203_v28, %v8899_v9 }
  0x12   :  { %5395 = vmatprep.subr.bf16.mxu1 %v5394_v7  ;;  %v359_v19 = vsub.f32 %v6216_v38, %v8896_v10  ;;  %v250_v23 = vand.u32 4294901760, %v71_v5  ;;  %v253_v24 = vand.u32 4294901760, %v72_v6  ;;  %v8894_v33 = vand.u32 4294901760, %v6220_v40 }
  0x13   :  { %5397 = vmatpush3.bf16.msra.mxu1 %v5396_v1  ;;  %v5398_v30 = vpack.c.bf16 %v472_v13, %v465_v8  ;;  %5377 = vmatpush3.bf16.msra.mxu0 %v6282_v16  ;;  %v8893_v34 = vand.u32 4294901760, %v6226_v43  ;;  %v202_v37 = vand.u32 4294901760, %v55_v11  ;;  %v6298_v42 = vsub.f32 %v54_v56, %v199_v4  ;;  %v73_v56 = vld [vmem:[%s8884_s0 + $0xd0] sm:$0xff] }
  0x14   :  { %v353_v47 = vand.u32 4294901760, %v352_v18  ;;  %v360_v48 = vand.u32 4294901760, %v359_v19  ;;  %v6300_v49 = vpack.c.bf16 %v253_v24, %v250_v23  ;;  %v6302_v50 = vsub.f32 %v71_v5, %v250_v23  ;;  %v57_v1 = vld [vmem:[%s8884_s0 + $0x50] sm:$0xff]  ;;  %v58_v18 = vld [vmem:[%s8884_s0 + $0x58] sm:$0xff] }
  0x15   :  { %5399 = vmatprep.subr.bf16.mxu1 %v5398_v30  ;;  %v478_v51 = vsub.f32 %v6220_v40, %v8894_v33  ;;  %v485_v52 = vsub.f32 %v6226_v43, %v8893_v34  ;;  %v205_v55 = vand.u32 4294901760, %v56_v29  ;;  %v6317_v60 = vsub.f32 %v72_v6, %v253_v24 }
  0x16   :  { %9235 = vst [vmem:[#allocation4_spill] sm:$0xff] %v6300_v49  ;;  %v5400_v59 = vpack.c.bf16 %v360_v48, %v353_v47  ;;  %5379 = vmatprep.subr.bf16.mxu0 %v6300_v49  ;;  %v8891_v61 = vand.u32 4294901760, %v6231_v46  ;;  %v8890_v0 = vand.u32 4294901760, %v6255_v58  ;;  %v6326_v5 = vsub.f32 %v55_v11, %v202_v37 }
  0x17   :  { %v479_v2 = vand.u32 4294901760, %v478_v51  ;;  %v486_v3 = vand.u32 4294901760, %v485_v52  ;;  %v6324_v4 = vpack.c.bf16 %v205_v55, %v202_v37  ;;  %v256_v8 = vand.u32 4294901760, %v73_v56 }
  0x18   :  { %5401 = vmatpush3.bf16.msra.mxu1 %v5400_v59  ;;  %v366_v6 = vsub.f32 %v6231_v46, %v8891_v61  ;;  %v373_v7 = vsub.f32 %v6255_v58, %v8890_v0  ;;  %v259_v13 = vand.u32 4294901760, %v74_v57  ;;  %v8889_v11 = vand.u32 4294901760, %v6259_v63 }
  0x19   :  { %9236 = vst [vmem:[#allocation5_spill] sm:$0xff] %v6324_v4  ;;  %v5402_v19 = vpack.c.bf16 %v486_v3, %v479_v2  ;;  %5381 = vmatpush3.bf16.msra.mxu0 %v6324_v4  ;;  %v8888_v23 = vand.u32 4294901760, %v6280_v12  ;;  %v208_v24 = vand.u32 4294901760, %v57_v1  ;;  %v6340_v30 = vsub.f32 %v56_v29, %v205_v55  ;;  %v75_v29 = vld [vmem:[%s8884_s0 + $0xe0] sm:$0xff]  ;;  %v76_v55 = vld [vmem:[%s8884_s0 + $0xe8] sm:$0xff] }
  0x1a   :  { %v367_v37 = vand.u32 4294901760, %v366_v6  ;;  %v374_v47 = vand.u32 4294901760, %v373_v7  ;;  %v6342_v48 = vpack.c.bf16 %v259_v13, %v256_v8  ;;  %v6344_v51 = vsub.f32 %v73_v56, %v256_v8  ;;  %v59_v8 = vld [vmem:[%s8884_s0 + $0x60] sm:$0xff] }
  0x1b   :  { %5403 = vmatprep.subr.bf16.mxu1 %v5402_v19  ;;  %v492_v52 = vsub.f32 %v6259_v63, %v8889_v11  ;;  %v499_v59 = vsub.f32 %v6280_v12, %v8888_v23  ;;  %v211_v2 = vand.u32 4294901760, %v58_v18  ;;  %v6359_v56 = vsub.f32 %v74_v57, %v259_v13 }
  0x1c   :  { %9237 = vst [vmem:[#allocation6_spill] sm:$0xff] %v6342_v48  ;;  %v5404_v3 = vpack.c.bf16 %v374_v47, %v367_v37  ;;  %5383 = vmatprep.subr.bf16.mxu0 %v6342_v48  ;;  %v8892_v6 = vand.u32 4294901760, %v6284_v17  ;;  %v8895_v7 = vand.u32 4294901760, %v6298_v42  ;;  %v6368_v0 = vsub.f32 %v57_v1, %v208_v24 }
  0x1d   :  { %v493_v19 = vand.u32 4294901760, %v492_v52  ;;  %v500_v23 = vand.u32 4294901760, %v499_v59  ;;  %v6366_v11 = vpack.c.bf16 %v211_v2, %v208_v24  ;;  %v262_v37 = vand.u32 4294901760, %v75_v29  ;;  %v60_v52 = vld [vmem:[%s8884_s0 + $0x68] sm:$0xff] }
  0x1e   :  { %5405 = vmatpush3.bf16.msra.mxu1 %v5404_v3  ;;  %v380_v57 = vsub.f32 %v6284_v17, %v8892_v6  ;;  %v387_v13 = vsub.f32 %v6298_v42, %v8895_v7  ;;  %v265_v47 = vand.u32 4294901760, %v76_v55  ;;  %v8898_v1 = vand.u32 4294901760, %v6302_v50 }
  0x1f   :  { %9238 = vst [vmem:[#allocation7_spill] sm:$0xff] %v6366_v11  ;;  %v5406_v59 = vpack.c.bf16 %v500_v23, %v493_v19  ;;  %5385 = vmatpush3.bf16.msra.mxu0 %v6366_v11  ;;  %v8897_v24 = vand.u32 4294901760, %v6317_v60  ;;  %v214_v3 = vand.u32 4294901760, %v59_v8  ;;  %v6382_v61 = vsub.f32 %v58_v18, %v211_v2  ;;  %v77_v18 = vld [vmem:[%s8884_s0 + $0xf0] sm:$0xff]  ;;  %v78_v2 = vld [vmem:[%s8884_s0 + $0xf8] sm:$0xff]  ;;  %v40_v11 = vld [vmem:[%s8885_s2 + $0xc8] sm:$0xff] }
  0x20   :  { %v381_v6 = vand.u32 4294901760, %v380_v57  ;;  %v388_v34 = vand.u32 4294901760, %v387_v13  ;;  %v6384_v33 = vpack.c.bf16 %v265_v47, %v262_v37  ;;  %v6386_v7 = vsub.f32 %v75_v29, %v262_v37 }
  0x21   :  { %5407 = vmatprep.subr.bf16.mxu1 %v5406_v59  ;;  %v506_v23 = vsub.f32 %v6302_v50, %v8898_v1  ;;  %v513_v19 = vsub.f32 %v6317_v60, %v8897_v24  ;;  %v217_v10 = vand.u32 4294901760, %v60_v52  ;;  %v6401_v29 = vsub.f32 %v76_v55, %v265_v47  ;;  %v61_v59 = vld [vmem:[%s8884_s0 + $0x70] sm:$0xff] }
  0x22   :  { %9239 = vst [vmem:[#allocation8_spill] sm:$0xff] %v6384_v33  ;;  %v5408_v57 = vpack.c.bf16 %v388_v34, %v381_v6  ;;  %5387 = vmatprep.subr.bf16.mxu0 %v6384_v33  ;;  %v8902_v13 = vand.u32 4294901760, %v6326_v5  ;;  %v8905_v37 = vand.u32 4294901760, %v6340_v30  ;;  %v6410_v54 = vsub.f32 %v59_v8, %v214_v3 }
  0x23   :  { %v507_v24 = vand.u32 4294901760, %v506_v23  ;;  %v514_v1 = vand.u32 4294901760, %v513_v19  ;;  %v6408_v9 = vpack.c.bf16 %v217_v10, %v214_v3  ;;  %v268_v6 = vand.u32 4294901760, %v77_v18  ;;  %v62_v23 = vld [vmem:[%s8884_s0 + $0x78] sm:$0xff] }
  0x24   :  { %5409 = vmatpush3.bf16.msra.mxu1 %v5408_v57  ;;  %v394_v34 = vsub.f32 %v6326_v5, %v8902_v13  ;;  %v401_v55 = vsub.f32 %v6340_v30, %v8905_v37  ;;  %v271_v47 = vand.u32 4294901760, %v78_v2  ;;  %v8908_v8 = vand.u32 4294901760, %v6344_v51 }
  0x25   :  { %9240 = vst [vmem:[#allocation9_spill] sm:$0xff] %v6408_v9  ;;  %v5410_v19 = vpack.c.bf16 %v514_v1, %v507_v24  ;;  %5389 = vmatpush3.bf16.msra.mxu0 %v6408_v9  ;;  %v8907_v3 = vand.u32 4294901760, %v6359_v56  ;;  %v220_v57 = vand.u32 4294901760, %v61_v59  ;;  %v6424_v53 = vsub.f32 %v60_v52, %v217_v10  ;;  %v16_v10 = vld [vmem:[%s8885_s2 + $0x8] sm:$0xff] }
  0x26   :  { %v395_v13 = vand.u32 4294901760, %v394_v34  ;;  %v402_v36 = vand.u32 4294901760, %v401_v55  ;;  %v6426_v35 = vpack.c.bf16 %v271_v47, %v268_v6  ;;  %v6428_v37 = vsub.f32 %v77_v18, %v268_v6  ;;  %v15_v6 = vld [vmem:[%s8885_s2] sm:$0xff] }
  0x27   :  { %5411 = vmatprep.subr.bf16.mxu1 %v5410_v19  ;;  %v520_v1 = vsub.f32 %v6344_v51, %v8908_v8  ;;  %v527_v24 = vsub.f32 %v6359_v56, %v8907_v3  ;;  %v223_v44 = vand.u32 4294901760, %v62_v23  ;;  %v6440_v34 = vsub.f32 %v78_v2, %v271_v47 }
  0x28   :  { %9241 = vst [vmem:[#allocation10_spill] sm:$0xff] %v6426_v35  ;;  %v5412_v52 = vpack.c.bf16 %v402_v36, %v395_v13  ;;  %5391 = vmatprep.subr.bf16.mxu0 %v6426_v35  ;;  %v8912_v18 = vand.u32 4294901760, %v6368_v0  ;;  %v8913_v55 = vand.u32 4294901760, %v6382_v61  ;;  %v6449_v41 = vsub.f32 %v61_v59, %v220_v57 }
  0x29   :  { %9242 = vst [vmem:[#allocation11_spill] sm:$0xff] %v6440_v34  ;;  %v521_v19 = vand.u32 4294901760, %v520_v1  ;;  %v528_v3 = vand.u32 4294901760, %v527_v24  ;;  %v6447_v8 = vpack.c.bf16 %v223_v44, %v220_v57  ;;  %v6457_v13 = vand.u32 4294901760, %v16_v10 }
  0x2a   :  { %9244 = vst [vmem:[#allocation13_spill] sm:$0xff] %v6449_v41  ;;  %5413 = vmatpush3.bf16.msra.mxu1 %v5412_v52  ;;  %v408_v36 = vsub.f32 %v6368_v0, %v8912_v18  ;;  %v415_v2 = vsub.f32 %v6382_v61, %v8913_v55  ;;  %v8916_v47 = vand.u32 4294901760, %v6386_v7  ;;  %v8922_v1 = vand.u32 4294901760, %v6401_v29 }
  0x2b   :  { %9243 = vst [vmem:[#allocation12_spill] sm:$0xff] %v6447_v8  ;;  %9245 = vst [vmem:[#allocation14_spill] sm:$0xff] %v6457_v13  ;;  %v5414_v35 = vpack.c.bf16 %v528_v3, %v521_v19  ;;  %5393 = vmatpush3.bf16.msra.mxu0 %v6447_v8  ;;  %v5426_v59 = vpack.c.bf16 %v6208_v32, %v6206_v31  ;;  %v6464_v57 = vand.u32 4294901760, %v15_v6  ;;  %559 = vmatprep.mubr.f32.mxu1 %v6457_v13 }
  0x2c   :  { %v409_v24 = vand.u32 4294901760, %v408_v36  ;;  %v416_v52 = vand.u32 4294901760, %v415_v2  ;;  %v6467_v18 = vsub.f32 %v16_v10, %v6457_v13  ;;  %v534_v55 = vsub.f32 %v6386_v7, %v8916_v47 }
  0x2d   :  { %9246 = vst [vmem:[#allocation15_spill] sm:$0xff] %v6464_v57  ;;  %5415 = vmatprep.subr.bf16.mxu1 %v5414_v35  ;;  %v541_v3 = vsub.f32 %v6401_v29, %v8922_v1  ;;  %5427 = vmatprep.subr.bf16.mxu0 %v5426_v59  ;;  %v6477_v19 = vsub.f32 %v15_v6, %v6464_v57  ;;  %v8921_v36 = vand.u32 4294901760, %v6410_v54  ;;  %v8923_v10 = vand.u32 4294901760, %v6424_v53 }
  0x2e   :  { %v6481_v2 = vsub.f32 %v62_v23, %v223_v44  ;;  %v5416_v8 = vpack.c.bf16 %v416_v52, %v409_v24  ;;  %v8924_v47 = vand.u32 4294901760, %v6467_v18  ;;  %v535_v9 = vand.u32 4294901760, %v534_v55 }
  0x2f   :  { %9247 = vst [vmem:[#allocation16_spill] sm:$0xff] %v6477_v19  ;;  %v542_v13 = vand.u32 4294901760, %v541_v3  ;;  %v8927_v35 = vand.u32 4294901760, %v6477_v19  ;;  %v422_v59 = vsub.f32 %v6410_v54, %v8921_v36  ;;  %v429_v6 = vsub.f32 %v6424_v53, %v8923_v10 }
  0x30   :  { %9248 = vst [vmem:[#allocation17_spill] sm:$0xff] %v6481_v2  ;;  %5417 = vmatpush3.bf16.msra.mxu1 %v5416_v8  ;;  %v276_v44 = vsub.f32 %v6467_v18, %v8924_v47  ;;  %v5428_v23 = vpack.c.bf16 %v6186_v21, %v6176_v15  ;;  %v8928_v55 = vand.u32 4294901760, %v6428_v37  ;;  %v8929_v24 = vand.u32 4294901760, %v6440_v34 }
  0x31   :  { %v5418_v52 = vpack.c.bf16 %v542_v13, %v535_v9  ;;  %v282_v3 = vsub.f32 %v6477_v19, %v8927_v35  ;;  %v423_v36 = vand.u32 4294901760, %v422_v59  ;;  %v430_v1 = vand.u32 4294901760, %v429_v6  ;;  %v24_v9 = vld [vmem:[%s8885_s2 + $0x48] sm:$0xff]  ;;  %v23_v19 = vld [vmem:[%s8885_s2 + $0x40] sm:$0xff] }
  0x32   :  { %v277_v10 = vand.u32 4294901760, %v276_v44  ;;  %v548_v8 = vsub.f32 %v6428_v37, %v8928_v55  ;;  %v555_v47 = vsub.f32 %v6440_v34, %v8929_v24  ;;  %v8933_v33 = vand.u32 4294901760, %v6449_v41 }
  0x33   :  { %5419 = vmatprep.subr.bf16.mxu1 %v5418_v52  ;;  %v283_v13 = vand.u32 4294901760, %v282_v3  ;;  %v5420_v35 = vpack.c.bf16 %v430_v1, %v423_v36  ;;  %v5430_v59 = vpack.c.bf16 %v6199_v26, %v6197_v25  ;;  %v8932_v6 = vand.u32 4294901760, %v6481_v2 }
  0x34   :  { %278 = vmatprep.mubr.f32.mxu0 %v277_v10  ;;  %v549_v44 = vand.u32 4294901760, %v548_v8  ;;  %v556_v55 = vand.u32 4294901760, %v555_v47  ;;  %v436_v24 = vsub.f32 %v6449_v41, %v8933_v33  ;;  %v6523_v36 = vand.u32 4294901760, %v24_v9  ;;  %v32_v47 = vld [vmem:[%s8885_s2 + $0x88] sm:$0xff]  ;;  %v31_v10 = vld [vmem:[%s8885_s2 + $0x80] sm:$0xff] }
  0x35   :  { %284 = vmatmul.mubr.f32.vlgmr.msra.gmra.mrb[0].mxu0 %v283_v13  ;;  %5421 = vmatpush3.bf16.msra.mxu1 %v5420_v35  ;;  %v443_v1 = vsub.f32 %v6481_v2, %v8932_v6  ;;  %v5432_v35 = vpack.c.bf16 %v6216_v38, %v6203_v28  ;;  %v5434_v13 = vpack.c.bf16 %v6226_v43, %v6220_v40  ;;  %v6538_v33 = vand.u32 4294901760, %v23_v19 }
  0x36   :  { %5429 = vmatpush3.bf16.msra.mxu0 %v5428_v23  ;;  %v5422_v52 = vpack.c.bf16 %v556_v55, %v549_v44  ;;  %v437_v3 = vand.u32 4294901760, %v436_v24  ;;  %v6536_v6 = vsub.f32 %v24_v9, %v6523_v36  ;;  %v6543_v23 = vand.u32 4294901760, %v32_v47  ;;  %v39_v24 = vld [vmem:[%s8885_s2 + $0xc0] sm:$0xff] }
  0x37   :  { %5431 = vmatprep.subr.bf16.mxu0 %v5430_v59  ;;  %v444_v8 = vand.u32 4294901760, %v443_v1  ;;  %v6545_v55 = vand.u32 4294901760, %v31_v10  ;;  %v5436_v9 = vpack.c.bf16 %v6255_v58, %v6231_v46  ;;  %v6554_v1 = vsub.f32 %v23_v19, %v6538_v33 }
  0x38   :  { %9249 = vst [vmem:[#allocation18_spill] sm:$0xff] %v6536_v6  ;;  %5423 = vmatprep.subr.bf16.mxu1 %v5422_v52  ;;  %v8944_v44 = vand.u32 4294901760, %v6536_v6  ;;  %v5438_v52 = vpack.c.bf16 %v6280_v12, %v6259_v63  ;;  %v6559_v48 = vsub.f32 %v32_v47, %v6543_v23  ;;  %v6564_v2 = vand.u32 4294901760, %v40_v11 }
  0x39   :  { %9250 = vst [vmem:[#allocation19_spill] sm:$0xff] %v6545_v55  ;;  %v5424_v59 = vpack.c.bf16 %v444_v8, %v437_v3  ;;  %v6562_v4 = vsub.f32 %v31_v10, %v6545_v55  ;;  %v5440_v3 = vpack.c.bf16 %v6298_v42, %v6284_v17  ;;  %v6572_v8 = vand.u32 4294901760, %v39_v24 }
  0x3a   :  { %5433 = vmatpush3.bf16.msra.mxu0 %v5432_v35  ;;  %9251 = vst [vmem:[#allocation20_spill] sm:$0xff] %v6564_v2  ;;  %v291_v19 = vsub.f32 %v6536_v6, %v8944_v44  ;;  %v8952_v35 = vand.u32 4294901760, %v6554_v1  ;;  %v5442_v47 = vpack.c.bf16 %v6317_v60, %v6302_v50  ;;  %v8953_v10 = vand.u32 4294901760, %v6559_v48 }
  0x3b   :  { %5425 = vmatpush3.bf16.msra.mxu1 %v5424_v59  ;;  %5435 = vmatprep.subr.bf16.mxu0 %v5434_v13  ;;  %9252 = vst [vmem:[#allocation21_spill] sm:$0xff] %v6572_v8  ;;  %v8956_v13 = vand.u32 4294901760, %v6562_v4  ;;  %v6580_v59 = vsub.f32 %v40_v11, %v6564_v2  ;;  %v6586_v6 = vsub.f32 %v39_v24, %v6572_v8  ;;  %v9254_v49 = vand.u32 4294901760, %v6208_v32 }
  0x3c   :  { %5459 = vmatprep.subr.bf16.mxu1 %v6174_v14  ;;  %v292_v41 = vand.u32 4294901760, %v291_v19  ;;  %v297_v44 = vsub.f32 %v6554_v1, %v8952_v35  ;;  %v9253_v14 = vand.u32 4294901760, %v6206_v31  ;;  %v306_v11 = vsub.f32 %v6559_v48, %v8953_v10 }
  0x3d   :  { %v312_v19 = vsub.f32 %v6562_v4, %v8956_v13  ;;  %v9255_v35 = vand.u32 4294901760, %v6176_v15  ;;  %v9256_v31 = vand.u32 4294901760, %v6186_v21  ;;  %v9258_v10 = vand.u32 4294901760, %v6199_v26 }
  0x3e   :  { %v6592_v34 = vpack.c.bf16 %v9254_v49, %v9253_v14  ;;  %561 = vmatmul.mubr.f32.vlgmr.msra.gmra.mrb[0].mxu1 %v6464_v57  ;;  %5437 = vmatpush3.bf16.msra.mxu0 %v5436_v9  ;;  %v298_v14 = vand.u32 4294901760, %v297_v44  ;;  %v8957_v49 = vand.u32 4294901760, %v6586_v6  ;;  %v9257_v9 = vand.u32 4294901760, %v6197_v25 }
  0x3f   :  { %v6606_v32 = vpack.c.bf16 %v9256_v31, %v9255_v35  ;;  %5461 = vmatpush3.bf16.msra.mxu1 %v6184_v20  ;;  %5439 = vmatprep.subr.bf16.mxu0 %v5438_v52  ;;  %v9259_v13 = vand.u32 4294901760, %v6203_v28  ;;  %v9260_v15 = vand.u32 4294901760, %v6216_v38  ;;  %v5444_v21 = vpack.c.bf16 %v6340_v30, %v6326_v5 }
  0x40   :  { %v6614_v57 = vpack.c.bf16 %v9258_v10, %v9257_v9  ;;  %5463 = vmatprep.subr.bf16.mxu1 %v6188_v22  ;;  %293 = vmatprep.mubr.f32.mxu0 %v292_v41  ;;  %v307_v44 = vand.u32 4294901760, %v306_v11  ;;  %v9261_v52 = vand.u32 4294901760, %v6580_v59  ;;  %v9262_v26 = vand.u32 4294901760, %v6220_v40 }
  0x41   :  { %v6620_v24 = vpack.c.bf16 %v9260_v15, %v9259_v13  ;;  %v9263_v35 = vand.u32 4294901760, %v6226_v43  ;;  %299 = vmatmul.mubr.f32.gmra.mrb[2].mxu0 %v298_v14  ;;  %v313_v38 = vand.u32 4294901760, %v312_v19  ;;  %566 = vmatprep.mubr.f32.mxu1 %v6523_v36  ;;  %v327_v10 = vsub.f32 %v6586_v6, %v8957_v49 }
  0x42   :  { %v321_v25 = vsub.f32 %v6580_v59, %v9261_v52  ;;  %v9264_v41 = vand.u32 4294901760, %v6231_v46  ;;  %v9265_v13 = vand.u32 4294901760, %v6255_v58  ;;  %v9266_v40 = vand.u32 4294901760, %v6259_v63  ;;  %5441 = vmatpush3.bf16.msra.mxu0 %v5440_v3  ;;  %308 = vmatprep.mubr.f32.mxu0 %v307_v44 }
  0x43   :  { %v6632_v28 = vpack.c.bf16 %v9263_v35, %v9262_v26  ;;  %v9267_v43 = vand.u32 4294901760, %v6280_v12  ;;  %v9268_v14 = vand.u32 4294901760, %v6284_v17  ;;  %v9269_v9 = vand.u32 4294901760, %v6298_v42  ;;  %5465 = vmatpush3.bf16.msra.mxu1 %v6201_v27  ;;  %5443 = vmatprep.subr.bf16.mxu0 %v5442_v47  ;;  %v9280_v35 = vld [vmem:[#allocation17_spill] sm:$0xff] }
  0x44   :  { %v6642_v11 = vpack.c.bf16 %v9265_v13, %v9264_v41  ;;  %v322_v19 = vand.u32 4294901760, %v321_v25  ;;  %v9270_v46 = vand.u32 4294901760, %v6302_v50  ;;  %v9271_v58 = vand.u32 4294901760, %v6317_v60  ;;  %5467 = vmatprep.subr.bf16.mxu1 %v6218_v39  ;;  %568 = vmatmul.mubr.f32.gmra.mrb[2].mxu1 %v6538_v33  ;;  %v9279_v25 = vld [vmem:[#allocation13_spill] sm:$0xff]  ;;  %v9282_v41 = vld [vmem:[#allocation6_spill] sm:$0xff]  ;;  %v95_v13 = vld [vmem:[%s8884_s0 + $0x180] sm:$0xff] }
  0x45   :  { %v6648_v31 = vpack.c.bf16 %v9267_v43, %v9266_v40  ;;  %v6654_v15 = vpack.c.bf16 %v9269_v9, %v9268_v14  ;;  %v9272_v63 = vand.u32 4294901760, %v6326_v5  ;;  %v9273_v12 = vand.u32 4294901760, %v6340_v30  ;;  %314 = vmatmul.mubr.f32.gmra.mrb[4].mxu0 %v313_v38  ;;  %573 = vmatprep.mubr.f32.mxu1 %v6543_v23  ;;  %v96_v40 = vld [vmem:[%s8884_s0 + $0x188] sm:$0xff] }
  0x46   :  { %v6660_v52 = vpack.c.bf16 %v9271_v58, %v9270_v46  ;;  %v5446_v17 = vpack.c.bf16 %v6359_v56, %v6344_v51  ;;  %v9274_v42 = vand.u32 4294901760, %v6344_v51  ;;  %v9275_v50 = vand.u32 4294901760, %v6359_v56  ;;  %5445 = vmatpush3.bf16.msra.mxu0 %v5444_v21  ;;  %323 = vmatprep.mubr.f32.mxu0 %v322_v19  ;;  %v9276_v56 = vld [vmem:[#allocation11_spill] sm:$0xff]  ;;  %v9277_v21 = vld [vmem:[#allocation4_spill] sm:$0xff] }
  0x47   :  { %v6666_v26 = vpack.c.bf16 %v9273_v12, %v9272_v63  ;;  %v328_v60 = vand.u32 4294901760, %v327_v10  ;;  %v5448_v5 = vpack.c.bf16 %v6382_v61, %v6368_v0  ;;  %5469 = vmatpush3.bf16.msra.mxu1 %v6229_v45  ;;  %v5450_v30 = vpack.c.bf16 %v6401_v29, %v6386_v7  ;;  %v9281_v10 = vld [vmem:[#allocation5_spill] sm:$0xff]  ;;  %v9284_v43 = vld [vmem:[#allocation8_spill] sm:$0xff]  ;;  %v79_v19 = vld [vmem:[%s8884_s0 + $0x100] sm:$0xff] }
  0x48   :  { %v6675_v3 = vpack.c.bf16 %v9275_v50, %v9274_v42  ;;  %5447 = vmatprep.subr.bf16.mxu0 %v5446_v17  ;;  %5471 = vmatprep.subr.bf16.mxu1 %v6257_v62  ;;  %v5452_v51 = vpack.c.bf16 %v6424_v53, %v6410_v54  ;;  %v5454_v47 = vpack.c.bf16 %v9276_v56, %v6428_v37  ;;  %v9278_v44 = vand.u32 4294901760, %v6467_v18  ;;  %v9285_v14 = vld [vmem:[#allocation16_spill] sm:$0xff]  ;;  %v9286_v63 = vld [vmem:[#allocation18_spill] sm:$0xff]  ;;  %v9287_v17 = vld [vmem:[#allocation9_spill] sm:$0xff] }
  0x49   :  { %575 = vmatmul.mubr.f32.gmra.mrb[4].mxu1 %v6545_v55  ;;  %329 = vmatmul.mubr.f32.gmra.mrb[6].mxu0 %v328_v60  ;;  %v5456_v38 = vpack.c.bf16 %v9280_v35, %v9279_v25  ;;  %v1256_v9 = vand.u32 4294901760, %v95_v13  ;;  %v1259_v46 = vand.u32 4294901760, %v96_v40  ;;  %v80_v58 = vld [vmem:[%s8884_s0 + $0x108] sm:$0xff]  ;;  %v98_v12 = vld [vmem:[%s8884_s0 + $0x198] sm:$0xff]  ;;  %v1208_v42 = vand.u32 4294901760, %v79_v19  ;;  %v99_v55 = vld [vmem:[%s8884_s0 + $0x1a0] sm:$0xff] }
  0x4a   :  { %580 = vmatprep.mubr.f32.mxu1 %v6564_v2  ;;  %5449 = vmatpush3.bf16.msra.mxu0 %v5448_v5  ;;  %v9288_v50 = vld [vmem:[#allocation10_spill] sm:$0xff]  ;;  %v1211_v60 = vand.u32 4294901760, %v80_v58 }
  0x4b   :  { %717 = vmatprep.mubr.f32.mxu0 %v6467_v18  ;;  %5473 = vmatpush3.bf16.msra.mxu1 %v6282_v16  ;;  %v9283_v18 = vld [vmem:[#allocation7_spill] sm:$0xff]  ;;  %v6732_v5 = vsub.f32 %v96_v40, %v1259_v46  ;;  %v9292_v40 = vand.u32 4294901760, %v6382_v61  ;;  %v100_v61 = vld [vmem:[%s8884_s0 + $0x1a8] sm:$0xff] }
  0x4c   :  { %5451 = vmatprep.subr.bf16.mxu0 %v5450_v30  ;;  %5475 = vmatprep.subr.bf16.mxu1 %v9277_v21  ;;  %v6759_v2 = vsub.f32 %v80_v58, %v1211_v60  ;;  %v9295_v58 = vand.u32 4294901760, %v9285_v14 }
  0x4d   :  { %582 = vmatmul.mubr.f32.gmra.mrb[6].mxu1 %v6572_v8 }
  0x4e   :  { %851 = vmatprep.mubr.f32.mxu1 %v9278_v44  ;;  %5453 = vmatpush3.bf16.msra.mxu0 %v5452_v51  ;;  %v1265_v51 = vand.u32 4294901760, %v98_v12  ;;  %v81_v44 = vld [vmem:[%s8884_s0 + $0x110] sm:$0xff] }
  0x4f   :  { %5477 = vmatpush3.bf16.msra.mxu1 %v9281_v10  ;;  %5455 = vmatprep.subr.bf16.mxu0 %v5454_v47  ;;  %v9289_v47 = vld [vmem:[#allocation12_spill] sm:$0xff] }
  0x50   :  { %5479 = vmatprep.subr.bf16.mxu1 %v9282_v41 }
  0x52   :  { %5457 = vmatpush3.bf16.msra.mxu0 %v5456_v38  ;;  %v82_v38 = vld [vmem:[%s8884_s0 + $0x118] sm:$0xff] }
  0x53   :  { %5481 = vmatpush3.bf16.msra.mxu1 %v9283_v18  ;;  %5491 = vmatprep.subr.bf16.mxu0 %v6592_v34  ;;  %v97_v34 = vld [vmem:[%s8884_s0 + $0x190] sm:$0xff] }
  0x54   :  { %5483 = vmatprep.subr.bf16.mxu1 %v9284_v43  ;;  %v1262_v30 = vand.u32 4294901760, %v97_v34 }
  0x55   :  { %720 = vmatmul.mubr.f32.vlgmr.msra.gmra.mrb[8].mxu0 %v9285_v14 }
  0x56   :  { %5493 = vmatpush3.bf16.msra.mxu0 %v6606_v32  ;;  %726 = vmatprep.mubr.f32.mxu0 %v9286_v63  ;;  %v6730_v32 = vsub.f32 %v95_v13, %v1256_v9  ;;  %v9290_v13 = vld [vmem:[#allocation3_spill] sm:$0xff] }
  0x57   :  { %5485 = vmatpush3.bf16.msra.mxu1 %v9287_v17  ;;  %5495 = vmatprep.subr.bf16.mxu0 %v6614_v57  ;;  %v6738_v57 = vsub.f32 %v79_v19, %v1208_v42  ;;  %v9294_v19 = vand.u32 4294901760, %v6401_v29  ;;  %v8974_v29 = vand.u32 4294901760, %v6732_v5 }
  0x58   :  { %5487 = vmatprep.subr.bf16.mxu1 %v9288_v50 }
  0x59   :  { %729 = vmatmul.mubr.f32.gmra.mrb[10].mxu0 %v6554_v1 }
  0x5a   :  { %5497 = vmatpush3.bf16.msra.mxu0 %v6620_v24  ;;  %735 = vmatprep.mubr.f32.mxu0 %v6559_v48  ;;  %v9291_v24 = vand.u32 4294901760, %v6368_v0  ;;  %v6767_v0 = vsub.f32 %v98_v12, %v1265_v51  ;;  %v9298_v12 = vand.u32 4294901760, %v6428_v37  ;;  %v83_v37 = vld [vmem:[%s8884_s0 + $0x120] sm:$0xff] }
  0x5b   :  { %5489 = vmatpush3.bf16.msra.mxu1 %v9289_v47  ;;  %5499 = vmatprep.subr.bf16.mxu0 %v6632_v28  ;;  %v9293_v28 = vand.u32 4294901760, %v6386_v7  ;;  %v1214_v7 = vand.u32 4294901760, %v81_v44  ;;  %v1217_v47 = vand.u32 4294901760, %v82_v38 }
  0x5c   :  { %5523 = vmatprep.subr.bf16.mxu1 %v9290_v13  ;;  %v6751_v49 = vpack.c.bf16 %v9292_v40, %v9291_v24  ;;  %v6765_v13 = vsub.f32 %v97_v34, %v1262_v30  ;;  %v9296_v24 = vand.u32 4294901760, %v6410_v54  ;;  %v9297_v34 = vand.u32 4294901760, %v6424_v53 }
  0x5d   :  { %v6757_v8 = vpack.c.bf16 %v9294_v19, %v9293_v28  ;;  %738 = vmatmul.mubr.f32.gmra.mrb[12].mxu0 %v6562_v4  ;;  %v9299_v28 = vand.u32 4294901760, %v9276_v56  ;;  %v9301_v54 = vand.u32 4294901760, %v9280_v35  ;;  %v6797_v53 = vpack.c.bf16 %v1259_v46, %v1256_v9  ;;  %v84_v9 = vld [vmem:[%s8884_s0 + $0x128] sm:$0xff] }
  0x5e   :  { %855 = vmatmul.mubr.f32.vlgmr.msra.gmra.mrb[8].mxu1 %v9295_v58  ;;  %5501 = vmatpush3.bf16.msra.mxu0 %v6642_v11  ;;  %v6781_v40 = vpack.c.bf16 %v9297_v34, %v9296_v24  ;;  %v9300_v11 = vand.u32 4294901760, %v9279_v25  ;;  %v1268_v58 = vand.u32 4294901760, %v99_v55  ;;  %v8967_v56 = vand.u32 4294901760, %v6738_v57  ;;  %v101_v34 = vld [vmem:[%s8884_s0 + $0x1b0] sm:$0xff] }
  0x5f   :  { %v6787_v19 = vpack.c.bf16 %v9299_v28, %v9298_v12  ;;  %5525 = vmatpush3.bf16.msra.mxu1 %v6184_v20  ;;  %744 = vmatprep.mubr.f32.mxu0 %v6580_v59  ;;  %9302 = vst [vmem:[#allocation11_spill] sm:$0xff] %v6797_v53  ;;  %v9303_v24 = vand.u32 4294901760, %v9286_v63  ;;  %v6806_v20 = vpack.c.bf16 %v1211_v60, %v1208_v42  ;;  %v1271_v35 = vand.u32 4294901760, %v100_v61 }
  0x60   :  { %v6795_v14 = vpack.c.bf16 %v9301_v54, %v9300_v11  ;;  %5503 = vmatprep.subr.bf16.mxu0 %v6648_v31  ;;  %v6808_v25 = vpack.c.bf16 %v1265_v51, %v1262_v30  ;;  %v8966_v46 = vand.u32 4294901760, %v6759_v2  ;;  %5527 = vmatprep.subr.bf16.mxu1 %v6188_v22  ;;  %v9306_v31 = vand.u32 4294901760, %v6730_v32 }
  0x61   :  { %862 = vmatprep.mubr.f32.mxu1 %v9303_v24  ;;  %9304 = vst [vmem:[#allocation4_spill] sm:$0xff] %v6806_v20  ;;  %747 = vmatmul.mubr.f32.gmra.mrb[14].mxu0 %v6586_v6  ;;  %v1487_v42 = vsub.f32 %v6732_v5, %v8974_v29  ;;  %v8965_v60 = vand.u32 4294901760, %v6765_v13  ;;  %v8964_v30 = vand.u32 4294901760, %v6767_v0  ;;  %v9307_v51 = vand.u32 4294901760, %v6554_v1 }
  0x62   :  { %9305 = vst [vmem:[#allocation13_spill] sm:$0xff] %v6808_v25  ;;  %v1480_v63 = vsub.f32 %v6730_v32, %v9306_v31  ;;  %5505 = vmatpush3.bf16.msra.mxu0 %v6654_v15  ;;  %v6830_v12 = vpack.c.bf16 %v1217_v47, %v1214_v7  ;;  %v6832_v22 = vsub.f32 %v81_v44, %v1214_v7  ;;  %v1220_v11 = vand.u32 4294901760, %v83_v37  ;;  %v102_v15 = vld [vmem:[%s8884_s0 + $0x1b8] sm:$0xff] }
  0x63   :  { %866 = vmatmul.mubr.f32.gmra.mrb[10].mxu1 %v9307_v51  ;;  %v6834_v28 = vsub.f32 %v82_v38, %v1217_v47  ;;  %v9309_v54 = vand.u32 4294901760, %v6559_v48  ;;  %v6839_v24 = vsub.f32 %v99_v55, %v1268_v58  ;;  %v1223_v31 = vand.u32 4294901760, %v84_v9  ;;  %5507 = vmatprep.subr.bf16.mxu0 %v6660_v52  ;;  %v9311_v47 = vld [vmem:[#allocation14_spill] sm:$0xff]  ;;  %v85_v52 = vld [vmem:[%s8884_s0 + $0x130] sm:$0xff] }
  0x64   :  { %9308 = vst [vmem:[#allocation17_spill] sm:$0xff] %v6830_v12  ;;  %5529 = vmatpush3.bf16.msra.mxu1 %v6201_v27  ;;  %v1368_v1 = vsub.f32 %v6738_v57, %v8967_v56  ;;  %v1274_v44 = vand.u32 4294901760, %v101_v34  ;;  %v6849_v27 = vpack.c.bf16 %v1271_v35, %v1268_v58  ;;  %v6851_v48 = vsub.f32 %v100_v61, %v1271_v35  ;;  %v86_v61 = vld [vmem:[%s8884_s0 + $0x138] sm:$0xff] }
  0x65   :  { %873 = vmatprep.mubr.f32.mxu1 %v9309_v54  ;;  %5531 = vmatprep.subr.bf16.mxu1 %v6218_v39  ;;  %v1375_v55 = vsub.f32 %v6759_v2, %v8966_v46  ;;  %v1481_v38 = vand.u32 4294901760, %v1480_v63  ;;  %v1488_v7 = vand.u32 4294901760, %v1487_v42  ;;  %v1494_v51 = vsub.f32 %v6765_v13, %v8965_v60 }
  0x66   :  { %9310 = vst [vmem:[#allocation5_spill] sm:$0xff] %v6849_v27  ;;  %1054 = vmatprep.mubr.f32.mxu0 %v9311_v47  ;;  %v1501_v39 = vsub.f32 %v6767_v0, %v8964_v30  ;;  %v9312_v58 = vand.u32 4294901760, %v6562_v4  ;;  %5509 = vmatpush3.bf16.msra.mxu0 %v6666_v26  ;;  %v6872_v35 = vsub.f32 %v83_v37, %v1220_v11  ;;  %v1277_v63 = vand.u32 4294901760, %v102_v15 }
  0x67   :  { %v8969_v42 = vand.u32 4294901760, %v6832_v22  ;;  %v8968_v54 = vand.u32 4294901760, %v6834_v28  ;;  %v9313_v30 = vand.u32 4294901760, %v6580_v59  ;;  %v6879_v60 = vpack.c.bf16 %v1223_v31, %v1220_v11  ;;  %5511 = vmatprep.subr.bf16.mxu0 %v6675_v3 }
  0x68   :  { %877 = vmatmul.mubr.f32.gmra.mrb[12].mxu1 %v9312_v58  ;;  %v6881_v46 = vsub.f32 %v84_v9, %v1223_v31  ;;  %v1369_v4 = vand.u32 4294901760, %v1368_v1  ;;  %v6883_v58 = vsub.f32 %v101_v34, %v1274_v44  ;;  %v1376_v26 = vand.u32 4294901760, %v1375_v55  ;;  %v104_v34 = vld [vmem:[%s8884_s0 + $0x1c8] sm:$0xff] }
  0x69   :  { %5533 = vmatpush3.bf16.msra.mxu1 %v6229_v45  ;;  %884 = vmatprep.mubr.f32.mxu1 %v9313_v30  ;;  %9314 = vst [vmem:[#allocation6_spill] sm:$0xff] %v6879_v60  ;;  %v1226_v37 = vand.u32 4294901760, %v85_v52  ;;  %v1229_v56 = vand.u32 4294901760, %v86_v61  ;;  %v103_v45 = vld [vmem:[%s8884_s0 + $0x1c0] sm:$0xff]  ;;  %v8970_v59 = vand.u32 4294901760, %v6839_v24  ;;  %v6891_v30 = vpack.c.bf16 %v1488_v7, %v1481_v38 }
  0x6a   :  { %9315 = vst [vmem:[#allocation7_spill] sm:$0xff] %v6883_v58  ;;  %5535 = vmatprep.subr.bf16.mxu1 %v6257_v62  ;;  %v1495_v9 = vand.u32 4294901760, %v1494_v51  ;;  %v1502_v11 = vand.u32 4294901760, %v1501_v39  ;;  %v8973_v3 = vand.u32 4294901760, %v6851_v48  ;;  %v9316_v62 = vand.u32 4294901760, %v6586_v6  ;;  %5513 = vmatpush3.bf16.msra.mxu0 %v6751_v49  ;;  %v87_v49 = vld [vmem:[%s8884_s0 + $0x140] sm:$0xff] }
  0x6b   :  { %v6900_v31 = vpack.c.bf16 %v1277_v63, %v1274_v44  ;;  %v1382_v1 = vsub.f32 %v6832_v22, %v8969_v42  ;;  %v1389_v55 = vsub.f32 %v6834_v28, %v8968_v54  ;;  %5515 = vmatprep.subr.bf16.mxu0 %v6757_v8  ;;  %v6910_v38 = vsub.f32 %v102_v15, %v1277_v63  ;;  %v88_v44 = vld [vmem:[%s8884_s0 + $0x148] sm:$0xff] }
  0x6c   :  { %888 = vmatmul.mubr.f32.gmra.mrb[14].mxu1 %v9316_v62  ;;  %v1280_v6 = vand.u32 4294901760, %v103_v45  ;;  %v8972_v7 = vand.u32 4294901760, %v6872_v35  ;;  %v8971_v51 = vand.u32 4294901760, %v6881_v46  ;;  %v6924_v8 = vpack.c.bf16 %v1229_v56, %v1226_v37 }
  0x6d   :  { %5537 = vmatpush3.bf16.msra.mxu1 %v6282_v16  ;;  %9317 = vst [vmem:[#allocation8_spill] sm:$0xff] %v6910_v38  ;;  %1179 = vmatprep.mubr.f32.mxu1 %v9311_v47  ;;  %v6922_v16 = vpack.c.bf16 %v1376_v26, %v1369_v4  ;;  %v1283_v15 = vand.u32 4294901760, %v104_v34  ;;  %v1508_v39 = vsub.f32 %v6839_v24, %v8970_v59  ;;  %v1383_v47 = vand.u32 4294901760, %v1382_v1  ;;  %v18_v59 = vld [vmem:[%s8885_s2 + $0x18] sm:$0xff] }
  0x6e   :  { %5539 = vmatprep.subr.bf16.mxu1 %v9277_v21  ;;  %v6929_v63 = vpack.c.bf16 %v1502_v11, %v1495_v9  ;;  %v6931_v62 = vsub.f32 %v85_v52, %v1226_v37  ;;  %v6933_v54 = vsub.f32 %v86_v61, %v1229_v56  ;;  %v1515_v21 = vsub.f32 %v6851_v48, %v8973_v3  ;;  %v105_v61 = vld [vmem:[%s8884_s0 + $0x1d0] sm:$0xff] }
  0x6f   :  { %5517 = vmatpush3.bf16.msra.mxu0 %v6781_v40  ;;  %v1390_v4 = vand.u32 4294901760, %v1389_v55  ;;  %v1232_v26 = vand.u32 4294901760, %v87_v49  ;;  %v1235_v42 = vand.u32 4294901760, %v88_v44  ;;  %v6944_v56 = vsub.f32 %v103_v45, %v1280_v6  ;;  %v89_v55 = vld [vmem:[%s8884_s0 + $0x150] sm:$0xff] }
  0x70   :  { %9318 = vst [vmem:[#allocation16_spill] sm:$0xff] %v6931_v62  ;;  %9319 = vst [vmem:[#allocation18_spill] sm:$0xff] %v6933_v54  ;;  %5519 = vmatprep.subr.bf16.mxu0 %v6787_v19  ;;  %v1396_v52 = vsub.f32 %v6872_v35, %v8972_v7  ;;  %v1403_v40 = vsub.f32 %v6881_v46, %v8971_v51  ;;  %v8976_v19 = vand.u32 4294901760, %v6883_v58  ;;  %v1509_v9 = vand.u32 4294901760, %v1508_v39  ;;  %v90_v51 = vld [vmem:[%s8884_s0 + $0x158] sm:$0xff] }
  0x71   :  { %5541 = vmatpush3.bf16.msra.mxu1 %v9281_v10  ;;  %9320 = vst [vmem:[#allocation9_spill] sm:$0xff] %v6944_v56  ;;  %v106_v10 = vld [vmem:[%s8884_s0 + $0x1d8] sm:$0xff]  ;;  %v6960_v37 = vpack.c.bf16 %v1283_v15, %v1280_v6  ;;  %v6962_v45 = vsub.f32 %v104_v34, %v1283_v15  ;;  %v8975_v11 = vand.u32 4294901760, %v6910_v38  ;;  %v1516_v1 = vand.u32 4294901760, %v1515_v21 }
  0x72   :  { %5543 = vmatprep.subr.bf16.mxu1 %v9282_v41  ;;  %v6973_v6 = vand.u32 4294901760, %v18_v59  ;;  %v6976_v34 = vpack.c.bf16 %v1390_v4, %v1383_v47  ;;  %v6978_v15 = vpack.c.bf16 %v1235_v42, %v1232_v26  ;;  %v1286_v39 = vand.u32 4294901760, %v105_v61 }
  0x73   :  { %9321 = vst [vmem:[#allocation10_spill] sm:$0xff] %v6962_v45  ;;  %5521 = vmatpush3.bf16.msra.mxu0 %v6795_v14  ;;  %v1289_v21 = vand.u32 4294901760, %v106_v10  ;;  %v6982_v3 = vsub.f32 %v87_v49, %v1232_v26  ;;  %v1397_v29 = vand.u32 4294901760, %v1396_v52  ;;  %v1404_v7 = vand.u32 4294901760, %v1403_v40  ;;  %v107_v49 = vld [vmem:[%s8884_s0 + $0x1e0] sm:$0xff] }
  0x74   :  { %9322 = vst [vmem:[#allocation3_spill] sm:$0xff] %v6973_v6  ;;  %5555 = vmatprep.subr.bf16.mxu0 %v6797_v53  ;;  %v1522_v41 = vsub.f32 %v6883_v58, %v8976_v19  ;;  %v6988_v14 = vsub.f32 %v88_v44, %v1235_v42  ;;  %v1529_v47 = vsub.f32 %v6910_v38, %v8975_v11  ;;  %v1238_v4 = vand.u32 4294901760, %v89_v55  ;;  %v9325_v26 = vld [vmem:[#allocation15_spill] sm:$0xff] }
  0x75   :  { %5545 = vmatpush3.bf16.msra.mxu1 %v9283_v18  ;;  %9323 = vst [vmem:[#allocation14_spill] sm:$0xff] %v6982_v3  ;;  %v1241_v18 = vand.u32 4294901760, %v90_v51  ;;  %v6997_v52 = vpack.c.bf16 %v1516_v1, %v1509_v9  ;;  %v9326_v40 = vand.u32 4294901760, %v6931_v62  ;;  %v9327_v42 = vand.u32 4294901760, %v6933_v54  ;;  %v108_v9 = vld [vmem:[%s8884_s0 + $0x1e8] sm:$0xff] }
  0x76   :  { %5547 = vmatprep.subr.bf16.mxu1 %v9284_v43  ;;  %9324 = vst [vmem:[#allocation22_spill] sm:$0xff] %v6988_v14  ;;  %1056 = vmatmul.mubr.f32.vlgmr.msra.gmra.mrb[16].mxu0 %v9325_v26  ;;  %v7006_v11 = vsub.f32 %v18_v59, %v6973_v6  ;;  %v7010_v19 = vpack.c.bf16 %v1289_v21, %v1286_v39 }
  0x77   :  { %v1410_v43 = vsub.f32 %v6931_v62, %v9326_v40  ;;  %v1417_v44 = vsub.f32 %v6933_v54, %v9327_v42  ;;  %5557 = vmatpush3.bf16.msra.mxu0 %v6806_v20  ;;  %1061 = vmatprep.mubr.f32.mxu0 %v6523_v36  ;;  %v7012_v38 = vsub.f32 %v105_v61, %v1286_v39  ;;  %v1523_v20 = vand.u32 4294901760, %v1522_v41  ;;  %v91_v61 = vld [vmem:[%s8884_s0 + $0x160] sm:$0xff]  ;;  %v7031_v39 = vld [vmem:[%s8884_s0 + $0x168] sm:$0xff] }
  0x78   :  { %9328 = vst [vmem:[#allocation15_spill] sm:$0xff] %v7006_v11  ;;  %9329 = vst [vmem:[#allocation23_spill] sm:$0xff] %v7010_v19  ;;  %5559 = vmatprep.subr.bf16.mxu0 %v6808_v25  ;;  %v7021_v59 = vpack.c.bf16 %v1404_v7, %v1397_v29  ;;  %v7023_v42 = vsub.f32 %v106_v10, %v1289_v21  ;;  %v1292_v54 = vand.u32 4294901760, %v107_v49  ;;  %v1295_v21 = vand.u32 4294901760, %v108_v9 }
  0x79   :  { %9330 = vst [vmem:[#allocation24_spill] sm:$0xff] %v7012_v38  ;;  %5549 = vmatpush3.bf16.msra.mxu1 %v9287_v17  ;;  %v1530_v17 = vand.u32 4294901760, %v1529_v47  ;;  %v7034_v40 = vpack.c.bf16 %v1241_v18, %v1238_v4  ;;  %v1411_v10 = vand.u32 4294901760, %v1410_v43  ;;  %v1418_v41 = vand.u32 4294901760, %v1417_v44  ;;  %v9335_v43 = vld [vmem:[#allocation12_spill] sm:$0xff] }
  0x7a   :  { %9331 = vst [vmem:[#allocation25_spill] sm:$0xff] %v7023_v42  ;;  %5551 = vmatprep.subr.bf16.mxu1 %v9288_v50  ;;  %1063 = vmatmul.mubr.f32.gmra.mrb[18].mxu0 %v6538_v33  ;;  %v9333_v50 = vand.u32 4294901760, %v6944_v56  ;;  %v9334_v25 = vand.u32 4294901760, %v6962_v45  ;;  %v1244_v7 = vand.u32 4294901760, %v91_v61  ;;  %v1247_v62 = vand.u32 4294901760, %v7031_v39 }
  0x7b   :  { %9332 = vst [vmem:[#allocation26_spill] sm:$0xff] %v7034_v40  ;;  %5561 = vmatpush3.bf16.msra.mxu0 %v6830_v12  ;;  %1068 = vmatprep.mubr.f32.mxu0 %v6543_v23  ;;  %v7051_v44 = vsub.f32 %v89_v55, %v1238_v4  ;;  %v7053_v1 = vsub.f32 %v90_v51, %v1241_v18  ;;  %v109_v12 = vld [vmem:[%s8884_s0 + $0x1f0] sm:$0xff]  ;;  %v9337_v51 = vand.u32 4294901760, %v6988_v14  ;;  %v110_v18 = vld [vmem:[%s8884_s0 + $0x1f8] sm:$0xff] }
  0x7c   :  { %v1536_v47 = vsub.f32 %v6944_v56, %v9333_v50  ;;  %v1543_v29 = vsub.f32 %v6962_v45, %v9334_v25  ;;  %5563 = vmatprep.subr.bf16.mxu0 %v6849_v27  ;;  %v7061_v25 = vpack.c.bf16 %v1530_v17, %v1523_v20  ;;  %v7063_v45 = vsub.f32 %v107_v49, %v1292_v54  ;;  %v9338_v50 = vld [vmem:[#allocation19_spill] sm:$0xff]  ;;  %v93_v49 = vld [vmem:[%s8884_s0 + $0x170] sm:$0xff] }
  0x7d   :  { %5553 = vmatpush3.bf16.msra.mxu1 %v9335_v43  ;;  %v9336_v43 = vand.u32 4294901760, %v6982_v3  ;;  %v1431_v4 = vsub.f32 %v6988_v14, %v9337_v51  ;;  %v7075_v56 = vpack.c.bf16 %v1418_v41, %v1411_v10  ;;  %v7077_v20 = vpack.c.bf16 %v1295_v21, %v1292_v54  ;;  %v17_v41 = vld [vmem:[%s8885_s2 + $0x10] sm:$0xff]  ;;  %v26_v14 = vld [vmem:[%s8885_s2 + $0x58] sm:$0xff] }
  0x7e   :  { %5587 = vmatprep.subr.bf16.mxu1 %v6891_v30  ;;  %1070 = vmatmul.mubr.f32.gmra.mrb[20].mxu0 %v9338_v50  ;;  %v7079_v30 = vsub.f32 %v108_v9, %v1295_v21  ;;  %v9340_v17 = vand.u32 4294901760, %v7006_v11  ;;  %v1537_v51 = vand.u32 4294901760, %v1536_v47  ;;  %v1544_v27 = vand.u32 4294901760, %v1543_v29  ;;  %v94_v9 = vld [vmem:[%s8884_s0 + $0x178] sm:$0xff]  ;;  %v9342_v21 = vld [vmem:[#allocation20_spill] sm:$0xff] }
  0x7f   :  { %v1424_v55 = vsub.f32 %v6982_v3, %v9336_v43  ;;  %9339 = vst [vmem:[#allocation12_spill] sm:$0xff] %v7077_v20  ;;  %5565 = vmatpush3.bf16.msra.mxu0 %v6879_v60  ;;  %v7089_v10 = vpack.c.bf16 %v1247_v62, %v1244_v7  ;;  %v1298_v54 = vand.u32 4294901760, %v109_v12  ;;  %1075 = vmatprep.mubr.f32.mxu0 %v9342_v21  ;;  %v9344_v47 = vand.u32 4294901760, %v7023_v42 }
  0x80   :  { %v1306_v43 = vsub.f32 %v7006_v11, %v9340_v17  ;;  %1181 = vmatmul.mubr.f32.vlgmr.msra.gmra.mrb[16].mxu1 %v9325_v26  ;;  %v1301_v26 = vand.u32 4294901760, %v110_v18  ;;  %v9343_v17 = vand.u32 4294901760, %v7012_v38  ;;  %5567 = vmatprep.subr.bf16.mxu0 %v6900_v31  ;;  %v1432_v58 = vand.u32 4294901760, %v1431_v4 }
  0x81   :  { %9341 = vst [vmem:[#allocation19_spill] sm:$0xff] %v7089_v10  ;;  %5589 = vmatpush3.bf16.msra.mxu1 %v6922_v16  ;;  %v1557_v60 = vsub.f32 %v7023_v42, %v9344_v47  ;;  %1186 = vmatprep.mubr.f32.mxu1 %v6523_v36  ;;  %v7111_v16 = vsub.f32 %v91_v61, %v1244_v7  ;;  %v1425_v3 = vand.u32 4294901760, %v1424_v55  ;;  %v1250_v53 = vand.u32 4294901760, %v93_v49 }
  0x82   :  { %v1550_v29 = vsub.f32 %v7012_v38, %v9343_v17  ;;  %v9345_v17 = vld [vmem:[#allocation21_spill] sm:$0xff]  ;;  %5591 = vmatprep.subr.bf16.mxu1 %v6929_v63  ;;  %v1253_v47 = vand.u32 4294901760, %v94_v9  ;;  %v9013_v11 = vand.u32 4294901760, %v7053_v1  ;;  %v1307_v42 = vand.u32 4294901760, %v1306_v43 }
  0x83   :  { %1077 = vmatmul.mubr.f32.gmra.mrb[22].mxu0 %v9345_v17  ;;  %v7116_v38 = vand.u32 4294901760, %v17_v41  ;;  %v5602_v36 = vpack.c.bf16 %v1544_v27, %v1537_v51  ;;  %v7121_v61 = vsub.f32 %v7031_v39, %v1247_v62  ;;  %v7123_v7 = vsub.f32 %v109_v12, %v1298_v54  ;;  %v25_v63 = vld [vmem:[%s8885_s2 + $0x50] sm:$0xff]  ;;  %v34_v12 = vld [vmem:[%s8885_s2 + $0x98] sm:$0xff] }
  0x84   :  { %1188 = vmatmul.mubr.f32.gmra.mrb[18].mxu1 %v6538_v33  ;;  %5569 = vmatpush3.bf16.msra.mxu0 %v6924_v8  ;;  %v7125_v55 = vand.u32 4294901760, %v26_v14  ;;  %v7132_v4 = vpack.c.bf16 %v1301_v26, %v1298_v54  ;;  %v1551_v33 = vand.u32 4294901760, %v1550_v29  ;;  %v1558_v43 = vand.u32 4294901760, %v1557_v60 }
  0x85   :  { %9346 = vst [vmem:[#allocation20_spill] sm:$0xff] %v7116_v38  ;;  %5593 = vmatpush3.bf16.msra.mxu1 %v6976_v34  ;;  %1193 = vmatprep.mubr.f32.mxu1 %v6543_v23  ;;  %v9349_v27 = vand.u32 4294901760, %v7051_v44  ;;  %v5604_v39 = vpack.c.bf16 %v1432_v58, %v1425_v3  ;;  %v7142_v34 = vsub.f32 %v110_v18, %v1301_v26  ;;  %v9012_v23 = vand.u32 4294901760, %v7063_v45  ;;  %v42_v26 = vld [vmem:[%s8885_s2 + $0xd8] sm:$0xff] }
  0x86   :  { %9347 = vst [vmem:[#allocation21_spill] sm:$0xff] %v7125_v55  ;;  %9348 = vst [vmem:[#allocation27_spill] sm:$0xff] %v7132_v4  ;;  %5571 = vmatprep.subr.bf16.mxu0 %v6960_v37  ;;  %5595 = vmatprep.subr.bf16.mxu1 %v6997_v52  ;;  %v9011_v51 = vand.u32 4294901760, %v7079_v30  ;;  %v7146_v60 = vpack.c.bf16 %v1253_v47, %v1250_v53  ;;  %v1445_v54 = vsub.f32 %v7053_v1, %v9013_v11 }
  0x87   :  { %v1438_v62 = vsub.f32 %v7051_v44, %v9349_v27  ;;  %1308 = vmatprep.mubr.f32.mxu0 %v1307_v42  ;;  %v7152_v29 = vsub.f32 %v17_v41, %v7116_v38  ;;  %v7154_v27 = vand.u32 4294901760, %v25_v63  ;;  %v7158_v58 = vsub.f32 %v93_v49, %v1250_v53  ;;  %v33_v42 = vld [vmem:[%s8885_s2 + $0x90] sm:$0xff] }
  0x88   :  { %9350 = vst [vmem:[#allocation28_spill] sm:$0xff] %v7146_v60  ;;  %1195 = vmatmul.mubr.f32.gmra.mrb[20].mxu1 %v9338_v50  ;;  %5573 = vmatpush3.bf16.msra.mxu0 %v6978_v15  ;;  %v9014_v3 = vand.u32 4294901760, %v7111_v16  ;;  %v7162_v52 = vsub.f32 %v26_v14, %v7125_v55  ;;  %v7164_v18 = vand.u32 4294901760, %v34_v12  ;;  %v5606_v50 = vpack.c.bf16 %v1558_v43, %v1551_v33 }
  0x89   :  { %9351 = vst [vmem:[#allocation29_spill] sm:$0xff] %v7152_v29  ;;  %9352 = vst [vmem:[#allocation30_spill] sm:$0xff] %v7154_v27  ;;  %5597 = vmatpush3.bf16.msra.mxu1 %v7021_v59  ;;  %1200 = vmatprep.mubr.f32.mxu1 %v9342_v21  ;;  %v7171_v41 = vsub.f32 %v94_v9, %v1253_v47  ;;  %v1439_v53 = vand.u32 4294901760, %v1438_v62  ;;  %v9017_v49 = vand.u32 4294901760, %v7121_v61  ;;  %v9018_v21 = vand.u32 4294901760, %v7123_v7 }
  0x8a   :  { %9353 = vst [vmem:[#allocation31_spill] sm:$0xff] %v7164_v18  ;;  %5575 = vmatprep.subr.bf16.mxu0 %v7010_v19  ;;  %5599 = vmatprep.subr.bf16.mxu1 %v7061_v25  ;;  %v1564_v14 = vsub.f32 %v7063_v45, %v9012_v23  ;;  %v1571_v59 = vsub.f32 %v7079_v30, %v9011_v51  ;;  %v1446_v47 = vand.u32 4294901760, %v1445_v54  ;;  %v7191_v43 = vand.u32 4294901760, %v33_v42 }
  0x8b   :  { %v7189_v25 = vsub.f32 %v25_v63, %v7154_v27  ;;  %v5618_v62 = vpack.c.bf16 %v6732_v5, %v6730_v32  ;;  %v1452_v51 = vsub.f32 %v7111_v16, %v9014_v3  ;;  %v7202_v23 = vsub.f32 %v34_v12, %v7164_v18  ;;  %v41_v63 = vld [vmem:[%s8885_s2 + $0xd0] sm:$0xff] }
  0x8c   :  { %9355 = vst [vmem:[#allocation33_spill] sm:$0xff] %v7191_v43  ;;  %1202 = vmatmul.mubr.f32.gmra.mrb[22].mxu1 %v9345_v17  ;;  %5577 = vmatpush3.bf16.msra.mxu0 %v7034_v40  ;;  %v1459_v17 = vsub.f32 %v7121_v61, %v9017_v49  ;;  %v7214_v54 = vand.u32 4294901760, %v42_v26  ;;  %v1565_v12 = vand.u32 4294901760, %v1564_v14  ;;  %v1572_v33 = vand.u32 4294901760, %v1571_v59 }
  0x8d   :  { %9354 = vst [vmem:[#allocation32_spill] sm:$0xff] %v7189_v25  ;;  %5601 = vmatpush3.bf16.msra.mxu1 %v7075_v56  ;;  %5579 = vmatprep.subr.bf16.mxu0 %v7077_v20  ;;  %v1578_v9 = vsub.f32 %v7123_v7, %v9018_v21  ;;  %v9357_v56 = vand.u32 4294901760, %v7142_v34  ;;  %v9358_v49 = vand.u32 4294901760, %v7152_v29  ;;  %v7230_v14 = vand.u32 4294901760, %v41_v63 }
  0x8e   :  { %9356 = vst [vmem:[#allocation34_spill] sm:$0xff] %v7214_v54  ;;  %5603 = vmatprep.subr.bf16.mxu1 %v5602_v36  ;;  %1589 = vmatprep.mubr.f32.mxu1 %v6973_v6  ;;  %v7228_v36 = vsub.f32 %v33_v42, %v7191_v43  ;;  %v5608_v59 = vpack.c.bf16 %v1446_v47, %v1439_v53  ;;  %v1453_v21 = vand.u32 4294901760, %v1452_v51  ;;  %v9360_v40 = vand.u32 4294901760, %v7162_v52 }
  0x8f   :  { %v1585_v20 = vsub.f32 %v7142_v34, %v9357_v56  ;;  %v1312_v11 = vsub.f32 %v7152_v29, %v9358_v49  ;;  %9359 = vst [vmem:[#allocation35_spill] sm:$0xff] %v7230_v14  ;;  %v1460_v49 = vand.u32 4294901760, %v1459_v17  ;;  %v9361_v3 = vand.u32 4294901760, %v7158_v58 }
  0x90   :  { %5581 = vmatpush3.bf16.msra.mxu0 %v7089_v10  ;;  %v1321_v56 = vsub.f32 %v7162_v52, %v9360_v40  ;;  %v9362_v29 = vand.u32 4294901760, %v7171_v41  ;;  %v7245_v51 = vsub.f32 %v42_v26, %v7214_v54  ;;  %v5610_v53 = vpack.c.bf16 %v1572_v33, %v1565_v12 }
  0x91   :  { %5605 = vmatpush3.bf16.msra.mxu1 %v5604_v39  ;;  %5583 = vmatprep.subr.bf16.mxu0 %v7132_v4  ;;  %v1466_v42 = vsub.f32 %v7158_v58, %v9361_v3  ;;  %v1579_v40 = vand.u32 4294901760, %v1578_v9  ;;  %v1586_v47 = vand.u32 4294901760, %v1585_v20  ;;  %v1313_v6 = vand.u32 4294901760, %v1312_v11 }
  0x92   :  { %v1473_v10 = vsub.f32 %v7171_v41, %v9362_v29  ;;  %5607 = vmatprep.subr.bf16.mxu1 %v5606_v50  ;;  %v9363_v39 = vand.u32 4294901760, %v7189_v25  ;;  %v7252_v3 = vsub.f32 %v41_v63, %v7230_v14  ;;  %v5620_v29 = vpack.c.bf16 %v6759_v2, %v6738_v57 }
  0x93   :  { %v1322_v26 = vand.u32 4294901760, %v1321_v56  ;;  %v5622_v50 = vpack.c.bf16 %v6767_v0, %v6765_v13  ;;  %v9364_v11 = vand.u32 4294901760, %v7202_v23  ;;  %v5612_v9 = vpack.c.bf16 %v1460_v49, %v1453_v21 }
  0x94   :  { %v1327_v17 = vsub.f32 %v7189_v25, %v9363_v39  ;;  %5585 = vmatpush3.bf16.msra.mxu0 %v7146_v60  ;;  %v1467_v33 = vand.u32 4294901760, %v1466_v42  ;;  %v1474_v12 = vand.u32 4294901760, %v1473_v10  ;;  %v9034_v63 = vand.u32 4294901760, %v7245_v51 }
  0x95   :  { %v1336_v20 = vsub.f32 %v7202_v23, %v9364_v11  ;;  %5609 = vmatpush3.bf16.msra.mxu1 %v5608_v59  ;;  %5619 = vmatprep.subr.bf16.mxu0 %v5618_v62  ;;  %v5614_v39 = vpack.c.bf16 %v1586_v47, %v1579_v40  ;;  %v9365_v56 = vand.u32 4294901760, %v7228_v36  ;;  %v9033_v25 = vand.u32 4294901760, %v7252_v3  ;;  %v9366_v47 = vld [vmem:[#allocation11_spill] sm:$0xff] }
  0x96   :  { %5611 = vmatprep.subr.bf16.mxu1 %v5610_v53  ;;  %v1328_v4 = vand.u32 4294901760, %v1327_v17  ;;  %v5624_v62 = vpack.c.bf16 %v6834_v28, %v6832_v22  ;;  %v5616_v10 = vpack.c.bf16 %v1474_v12, %v1467_v33  ;;  %v5626_v59 = vpack.c.bf16 %v6851_v48, %v6839_v24  ;;  %v9367_v17 = vld [vmem:[#allocation7_spill] sm:$0xff]  ;;  %v9373_v33 = vld [vmem:[#allocation10_spill] sm:$0xff] }
  0x97   :  { %1314 = vmatmul.mubr.f32.vlgmr.msra.gmra.mrb[24].mxu0 %v1313_v6  ;;  %v1342_v60 = vsub.f32 %v7228_v36, %v9365_v56  ;;  %v1337_v21 = vand.u32 4294901760, %v1336_v20  ;;  %v1351_v6 = vsub.f32 %v7245_v51, %v9034_v63  ;;  %v1357_v42 = vsub.f32 %v7252_v3, %v9033_v25  ;;  %v9371_v20 = vld [vmem:[#allocation4_spill] sm:$0xff]  ;;  %v9375_v56 = vld [vmem:[#allocation14_spill] sm:$0xff] }
  0x98   :  { %5621 = vmatpush3.bf16.msra.mxu0 %v5620_v29  ;;  %1323 = vmatprep.mubr.f32.mxu0 %v1322_v26  ;;  %v5628_v53 = vpack.c.bf16 %v6881_v46, %v6872_v35  ;;  %v9368_v29 = vld [vmem:[#allocation8_spill] sm:$0xff]  ;;  %v9385_v25 = vand.u32 4294901760, %v6732_v5  ;;  %v9386_v63 = vand.u32 4294901760, %v6738_v57  ;;  %v9389_v5 = vand.u32 4294901760, %v6765_v13 }
  0x99   :  { %5613 = vmatpush3.bf16.msra.mxu1 %v5612_v9  ;;  %5623 = vmatprep.subr.bf16.mxu0 %v5622_v50  ;;  %v1343_v49 = vand.u32 4294901760, %v1342_v60  ;;  %v1352_v40 = vand.u32 4294901760, %v1351_v6  ;;  %v5630_v26 = vpack.c.bf16 %v9368_v29, %v9367_v17  ;;  %v9369_v60 = vld [vmem:[#allocation16_spill] sm:$0xff]  ;;  %v9370_v50 = vld [vmem:[#allocation18_spill] sm:$0xff]  ;;  %v9372_v9 = vld [vmem:[#allocation9_spill] sm:$0xff]  ;;  %v9393_v13 = vand.u32 4294901760, %v6832_v22 }
  0x9a   :  { %5615 = vmatprep.subr.bf16.mxu1 %v5614_v39  ;;  %v5632_v11 = vpack.c.bf16 %v9370_v50, %v9369_v60  ;;  %v5634_v12 = vpack.c.bf16 %v9373_v33, %v9372_v9  ;;  %v9374_v39 = vld [vmem:[#allocation13_spill] sm:$0xff]  ;;  %v9379_v6 = vld [vmem:[#allocation24_spill] sm:$0xff] }
  0x9b   :  { %1329 = vmatmul.mubr.f32.gmra.mrb[26].mxu0 %v1328_v4  ;;  %v1358_v4 = vand.u32 4294901760, %v1357_v42  ;;  %v9391_v57 = vld [vmem:[#allocation12_spill] sm:$0xff] }
  0x9c   :  { %5625 = vmatpush3.bf16.msra.mxu0 %v5624_v62  ;;  %1338 = vmatprep.mubr.f32.mxu0 %v1337_v21  ;;  %v9376_v62 = vld [vmem:[#allocation22_spill] sm:$0xff] }
  0x9d   :  { %5617 = vmatpush3.bf16.msra.mxu1 %v5616_v10  ;;  %5627 = vmatprep.subr.bf16.mxu0 %v5626_v59  ;;  %v5636_v21 = vpack.c.bf16 %v9376_v62, %v9375_v56  ;;  %v9377_v10 = vld [vmem:[#allocation17_spill] sm:$0xff] }
  0x9e   :  { %5651 = vmatprep.subr.bf16.mxu1 %v9366_v47  ;;  %v9378_v59 = vld [vmem:[#allocation5_spill] sm:$0xff] }
  0x9f   :  { %1344 = vmatmul.mubr.f32.gmra.mrb[28].mxu0 %v1343_v49  ;;  %v9380_v49 = vld [vmem:[#allocation25_spill] sm:$0xff] }
  0xa0   :  { %1591 = vmatmul.mubr.f32.vlgmr.msra.gmra.mrb[24].mxu1 %v7116_v38  ;;  %5629 = vmatpush3.bf16.msra.mxu0 %v5628_v53  ;;  %v5638_v42 = vpack.c.bf16 %v9380_v49, %v9379_v6  ;;  %v9381_v53 = vld [vmem:[#allocation15_spill] sm:$0xff] }
  0xa1   :  { %5653 = vmatpush3.bf16.msra.mxu1 %v9371_v20  ;;  %1353 = vmatprep.mubr.f32.mxu0 %v1352_v40  ;;  %v5640_v40 = vpack.c.bf16 %v7053_v1, %v7051_v44 }
  0xa2   :  { %1596 = vmatprep.mubr.f32.mxu1 %v7125_v55  ;;  %5631 = vmatprep.subr.bf16.mxu0 %v5630_v26  ;;  %v9382_v26 = vld [vmem:[#allocation6_spill] sm:$0xff] }
  0xa3   :  { %1359 = vmatmul.mubr.f32.gmra.mrb[30].mxu0 %v1358_v4  ;;  %5655 = vmatprep.subr.bf16.mxu1 %v9374_v39  ;;  %v5642_v4 = vpack.c.bf16 %v7079_v30, %v7063_v45 }
  0xa4   :  { %1598 = vmatmul.mubr.f32.gmra.mrb[26].mxu1 %v7154_v27  ;;  %5633 = vmatpush3.bf16.msra.mxu0 %v5632_v11  ;;  %v5644_v11 = vpack.c.bf16 %v7121_v61, %v7111_v16  ;;  %v9398_v27 = vld [vmem:[#allocation27_spill] sm:$0xff] }
  0xa5   :  { %5657 = vmatpush3.bf16.msra.mxu1 %v9377_v10  ;;  %1603 = vmatprep.mubr.f32.mxu1 %v7164_v18 }
  0xa6   :  { %5635 = vmatprep.subr.bf16.mxu0 %v5634_v12  ;;  %5659 = vmatprep.subr.bf16.mxu1 %v9378_v59  ;;  %v5646_v12 = vpack.c.bf16 %v7142_v34, %v7123_v7 }
  0xa7   :  { %1747 = vmatprep.mubr.f32.mxu0 %v9381_v53 }
  0xa8   :  { %1605 = vmatmul.mubr.f32.gmra.mrb[28].mxu1 %v7191_v43  ;;  %5637 = vmatpush3.bf16.msra.mxu0 %v5636_v21  ;;  %v9383_v21 = vand.u32 4294901760, %v9381_v53  ;;  %v9387_v53 = vand.u32 4294901760, %v6759_v2  ;;  %v111_v2 = vld [vmem:[%s8884_s0 + $0x200] sm:$0xff]  ;;  %v9397_v43 = vand.u32 4294901760, %v6851_v48  ;;  %v9401_v48 = vand.u32 4294901760, %v6881_v46 }
  0xa9   :  { %5661 = vmatpush3.bf16.msra.mxu1 %v9382_v26  ;;  %1610 = vmatprep.mubr.f32.mxu1 %v7214_v54  ;;  %v9395_v54 = vld [vmem:[#allocation19_spill] sm:$0xff]  ;;  %v2238_v22 = vand.u32 4294901760, %v111_v2  ;;  %v9409_v46 = vand.u32 4294901760, %v9375_v56  ;;  %v9413_v56 = vand.u32 4294901760, %v7051_v44 }
  0xaa   :  { %5639 = vmatprep.subr.bf16.mxu0 %v5638_v42  ;;  %5663 = vmatprep.subr.bf16.mxu1 %v6900_v31  ;;  %v5648_v42 = vpack.c.bf16 %v7171_v41, %v7158_v58 }
  0xac   :  { %1612 = vmatmul.mubr.f32.gmra.mrb[30].mxu1 %v7230_v14  ;;  %5641 = vmatpush3.bf16.msra.mxu0 %v5640_v40  ;;  %v9384_v40 = vand.u32 4294901760, %v6730_v32  ;;  %v9388_v32 = vld [vmem:[#allocation26_spill] sm:$0xff]  ;;  %v112_v14 = vld [vmem:[%s8884_s0 + $0x208] sm:$0xff] }
  0xad   :  { %5665 = vmatpush3.bf16.msra.mxu1 %v6924_v8  ;;  %5643 = vmatprep.subr.bf16.mxu0 %v5642_v4 }
  0xae   :  { %5667 = vmatprep.subr.bf16.mxu1 %v6960_v37  ;;  %1881 = vmatprep.mubr.f32.mxu1 %v9383_v21  ;;  %v5682_v4 = vpack.c.bf16 %v9385_v25, %v9384_v40  ;;  %v5684_v21 = vpack.c.bf16 %v9387_v53, %v9386_v63  ;;  %v9390_v25 = vand.u32 4294901760, %v6767_v0  ;;  %v9392_v63 = vld [vmem:[#allocation29_spill] sm:$0xff]  ;;  %v9394_v0 = vand.u32 4294901760, %v6834_v28 }
  0xaf   :  { %v2241_v28 = vand.u32 4294901760, %v112_v14 }
  0xb0   :  { %5645 = vmatpush3.bf16.msra.mxu0 %v5644_v11  ;;  %v127_v11 = vld [vmem:[%s8884_s0 + $0x280] sm:$0xff] }
  0xb1   :  { %5669 = vmatpush3.bf16.msra.mxu1 %v6978_v15  ;;  %5647 = vmatprep.subr.bf16.mxu0 %v5646_v12  ;;  %v128_v12 = vld [vmem:[%s8884_s0 + $0x288] sm:$0xff]  ;;  %v2286_v40 = vand.u32 4294901760, %v127_v11 }
  0xb2   :  { %5671 = vmatprep.subr.bf16.mxu1 %v7010_v19  ;;  %v2289_v53 = vand.u32 4294901760, %v128_v12 }
  0xb4   :  { %5649 = vmatpush3.bf16.msra.mxu0 %v5648_v42  ;;  %v5686_v42 = vpack.c.bf16 %v9390_v25, %v9389_v5  ;;  %v129_v5 = vld [vmem:[%s8884_s0 + $0x290] sm:$0xff]  ;;  %v130_v25 = vld [vmem:[%s8884_s0 + $0x298] sm:$0xff]  ;;  %v7367_v55 = vsub.f32 %v128_v12, %v2289_v53  ;;  %v9405_v12 = vand.u32 4294901760, %v9370_v50  ;;  %v9411_v50 = vand.u32 4294901760, %v9379_v6 }
  0xb5   :  { %5673 = vmatpush3.bf16.msra.mxu1 %v9388_v32  ;;  %5683 = vmatprep.subr.bf16.mxu0 %v5682_v4  ;;  %v5688_v4 = vpack.c.bf16 %v9394_v0, %v9393_v13  ;;  %v9399_v13 = vld [vmem:[#allocation32_spill] sm:$0xff]  ;;  %v7365_v0 = vsub.f32 %v127_v11, %v2286_v40  ;;  %v2292_v38 = vand.u32 4294901760, %v129_v5  ;;  %v9404_v11 = vand.u32 4294901760, %v9369_v60  ;;  %v113_v60 = vld [vmem:[%s8884_s0 + $0x210] sm:$0xff] }
  0xb6   :  { %5675 = vmatprep.subr.bf16.mxu1 %v9391_v57  ;;  %v2295_v57 = vand.u32 4294901760, %v130_v25  ;;  %v9406_v32 = vld [vmem:[#allocation28_spill] sm:$0xff] }
  0xb7   :  { %1750 = vmatmul.mubr.f32.vlgmr.msra.gmra.mrb[32].mxu0 %v9392_v63  ;;  %v7426_v6 = vsub.f32 %v129_v5, %v2292_v38 }
  0xb8   :  { %5685 = vmatpush3.bf16.msra.mxu0 %v5684_v21  ;;  %1756 = vmatprep.mubr.f32.mxu0 %v7162_v52  ;;  %v9396_v21 = vand.u32 4294901760, %v6839_v24  ;;  %v9400_v24 = vand.u32 4294901760, %v6872_v35  ;;  %v9408_v35 = vand.u32 4294901760, %v9373_v33  ;;  %v7428_v44 = vsub.f32 %v130_v25, %v2295_v57 }
  0xb9   :  { %5677 = vmatpush3.bf16.msra.mxu1 %v9395_v54  ;;  %5687 = vmatprep.subr.bf16.mxu0 %v5686_v42  ;;  %v9402_v42 = vand.u32 4294901760, %v9367_v17  ;;  %v5696_v54 = vpack.c.bf16 %v9405_v12, %v9404_v11  ;;  %v9410_v17 = vand.u32 4294901760, %v9376_v62  ;;  %v9414_v62 = vand.u32 4294901760, %v7053_v1 }
  0xba   :  { %v5690_v18 = vpack.c.bf16 %v9397_v43, %v9396_v21  ;;  %5679 = vmatprep.subr.bf16.mxu1 %v9398_v27  ;;  %v5692_v43 = vpack.c.bf16 %v9401_v48, %v9400_v24  ;;  %v9403_v21 = vand.u32 4294901760, %v9368_v29  ;;  %v7393_v29 = vsub.f32 %v111_v2, %v2238_v22 }
  0xbb   :  { %1759 = vmatmul.mubr.f32.gmra.mrb[34].mxu0 %v9399_v13  ;;  %v7391_v24 = vpack.c.bf16 %v9410_v17, %v9409_v46  ;;  %v7412_v2 = vpack.c.bf16 %v9414_v62, %v9413_v56  ;;  %v9415_v48 = vand.u32 4294901760, %v7063_v45  ;;  %v7420_v11 = vsub.f32 %v112_v14, %v2241_v28  ;;  %v132_v45 = vld [vmem:[%s8884_s0 + $0x2a8] sm:$0xff]  ;;  %v133_v56 = vld [vmem:[%s8884_s0 + $0x2b0] sm:$0xff] }
  0xbc   :  { %5689 = vmatpush3.bf16.msra.mxu0 %v5688_v4  ;;  %1765 = vmatprep.mubr.f32.mxu0 %v7202_v23  ;;  %v5694_v27 = vpack.c.bf16 %v9403_v21, %v9402_v42  ;;  %v9407_v4 = vand.u32 4294901760, %v9372_v9  ;;  %v9412_v9 = vand.u32 4294901760, %v9380_v49  ;;  %v9416_v42 = vand.u32 4294901760, %v7079_v30 }
  0xbd   :  { %5681 = vmatpush3.bf16.msra.mxu1 %v9406_v32  ;;  %5691 = vmatprep.subr.bf16.mxu0 %v5690_v18  ;;  %v114_v18 = vld [vmem:[%s8884_s0 + $0x218] sm:$0xff]  ;;  %v9065_v1 = vand.u32 4294901760, %v7365_v0  ;;  %v9064_v30 = vand.u32 4294901760, %v7367_v55  ;;  %v9417_v14 = vand.u32 4294901760, %v9392_v63  ;;  %v9418_v49 = vand.u32 4294901760, %v7111_v16 }
  0xbe   :  { %v5698_v19 = vpack.c.bf16 %v9408_v35, %v9407_v4  ;;  %5715 = vmatprep.subr.bf16.mxu1 %v9366_v47  ;;  %v7406_v33 = vpack.c.bf16 %v9412_v9, %v9411_v50  ;;  %v7418_v21 = vpack.c.bf16 %v9416_v42, %v9415_v48  ;;  %v131_v47 = vld [vmem:[%s8884_s0 + $0x2a0] sm:$0xff]  ;;  %v9419_v12 = vand.u32 4294901760, %v7121_v61 }
  0xbf   :  { %1768 = vmatmul.mubr.f32.gmra.mrb[36].mxu0 %v7228_v36  ;;  %v9420_v25 = vand.u32 4294901760, %v7123_v7  ;;  %v9421_v4 = vand.u32 4294901760, %v7142_v34  ;;  %v2244_v46 = vand.u32 4294901760, %v113_v60  ;;  %v2247_v17 = vand.u32 4294901760, %v114_v18  ;;  %v115_v7 = vld [vmem:[%s8884_s0 + $0x220] sm:$0xff] }
  0xc0   :  { %1885 = vmatmul.mubr.f32.vlgmr.msra.gmra.mrb[32].mxu1 %v9417_v14  ;;  %5693 = vmatpush3.bf16.msra.mxu0 %v5692_v43  ;;  %v7441_v5 = vpack.c.bf16 %v9419_v12, %v9418_v49  ;;  %v9422_v63 = vand.u32 4294901760, %v7158_v58  ;;  %v9423_v16 = vand.u32 4294901760, %v7171_v41  ;;  %v7457_v61 = vpack.c.bf16 %v2289_v53, %v2286_v40  ;;  %v116_v40 = vld [vmem:[%s8884_s0 + $0x228] sm:$0xff] }
  0xc1   :  { %v7447_v35 = vpack.c.bf16 %v9421_v4, %v9420_v25  ;;  %5717 = vmatpush3.bf16.msra.mxu1 %v9371_v20  ;;  %1774 = vmatprep.mubr.f32.mxu0 %v7245_v51  ;;  %v2298_v50 = vand.u32 4294901760, %v131_v47  ;;  %v9059_v34 = vand.u32 4294901760, %v7393_v29  ;;  %v9425_v9 = vand.u32 4294901760, %v7162_v52 }
  0xc2   :  { %v7455_v43 = vpack.c.bf16 %v9423_v16, %v9422_v63  ;;  %9424 = vst [vmem:[#allocation11_spill] sm:$0xff] %v7457_v61  ;;  %5695 = vmatprep.subr.bf16.mxu0 %v5694_v27  ;;  %v7465_v20 = vpack.c.bf16 %v2241_v28, %v2238_v22  ;;  %v7467_v58 = vpack.c.bf16 %v2295_v57, %v2292_v38  ;;  %v2301_v41 = vand.u32 4294901760, %v132_v45 }
  0xc3   :  { %1892 = vmatprep.mubr.f32.mxu1 %v9425_v9  ;;  %v9058_v53 = vand.u32 4294901760, %v7420_v11  ;;  %1777 = vmatmul.mubr.f32.gmra.mrb[38].mxu0 %v7252_v3  ;;  %v2510_v38 = vsub.f32 %v7365_v0, %v9065_v1  ;;  %v2517_v27 = vsub.f32 %v7367_v55, %v9064_v30  ;;  %v9057_v52 = vand.u32 4294901760, %v7426_v6 }
  0xc4   :  { %9426 = vst [vmem:[#allocation7_spill] sm:$0xff] %v7465_v20  ;;  %9427 = vst [vmem:[#allocation8_spill] sm:$0xff] %v7467_v58  ;;  %5719 = vmatprep.subr.bf16.mxu1 %v9374_v39  ;;  %v9056_v57 = vand.u32 4294901760, %v7428_v44  ;;  %v9428_v22 = vand.u32 4294901760, %v9399_v13  ;;  %5697 = vmatpush3.bf16.msra.mxu0 %v5696_v54  ;;  %v7488_v28 = vpack.c.bf16 %v2247_v17, %v2244_v46  ;;  %v2250_v48 = vand.u32 4294901760, %v115_v7  ;;  %v134_v54 = vld [vmem:[%s8884_s0 + $0x2b8] sm:$0xff] }
  0xc5   :  { %v7490_v62 = vsub.f32 %v113_v60, %v2244_v46  ;;  %v7492_v39 = vsub.f32 %v114_v18, %v2247_v17  ;;  %5721 = vmatpush3.bf16.msra.mxu1 %v9377_v10  ;;  %v9430_v42 = vand.u32 4294901760, %v7202_v23  ;;  %v7497_v14 = vsub.f32 %v131_v47, %v2298_v50  ;;  %5699 = vmatprep.subr.bf16.mxu0 %v5698_v19  ;;  %v9432_v47 = vld [vmem:[#allocation3_spill] sm:$0xff] }
  0xc6   :  { %1896 = vmatmul.mubr.f32.gmra.mrb[34].mxu1 %v9428_v22  ;;  %9429 = vst [vmem:[#allocation16_spill] sm:$0xff] %v7488_v28  ;;  %v2253_v49 = vand.u32 4294901760, %v116_v40  ;;  %v2398_v13 = vsub.f32 %v7393_v29, %v9059_v34  ;;  %v2304_v60 = vand.u32 4294901760, %v133_v56  ;;  %5723 = vmatprep.subr.bf16.mxu1 %v9378_v59  ;;  %v7506_v18 = vpack.c.bf16 %v2301_v41, %v2298_v50  ;;  %v117_v59 = vld [vmem:[%s8884_s0 + $0x230] sm:$0xff]  ;;  %v9449_v34 = vld [vmem:[#allocation12_spill] sm:$0xff] }
  0xc7   :  { %1903 = vmatprep.mubr.f32.mxu1 %v9430_v42  ;;  %v7508_v10 = vsub.f32 %v132_v45, %v2301_v41  ;;  %v2405_v23 = vsub.f32 %v7420_v11, %v9058_v53  ;;  %2084 = vmatprep.mubr.f32.mxu0 %v9432_v47  ;;  %v2511_v12 = vand.u32 4294901760, %v2510_v38  ;;  %v2518_v25 = vand.u32 4294901760, %v2517_v27  ;;  %v118_v45 = vld [vmem:[%s8884_s0 + $0x238] sm:$0xff] }
  0xc8   :  { %9431 = vst [vmem:[#allocation18_spill] sm:$0xff] %v7506_v18  ;;  %v2524_v4 = vsub.f32 %v7426_v6, %v9057_v52  ;;  %v2531_v19 = vsub.f32 %v7428_v44, %v9056_v57  ;;  %v9433_v46 = vand.u32 4294901760, %v7228_v36  ;;  %5701 = vmatpush3.bf16.msra.mxu0 %v7391_v24  ;;  %v7529_v17 = vsub.f32 %v115_v7, %v2250_v48 }
  0xc9   :  { %v2307_v63 = vand.u32 4294901760, %v134_v54  ;;  %v9055_v16 = vand.u32 4294901760, %v7490_v62  ;;  %v9054_v50 = vand.u32 4294901760, %v7492_v39  ;;  %5725 = vmatpush3.bf16.msra.mxu1 %v9382_v26  ;;  %v9434_v9 = vand.u32 4294901760, %v7245_v51  ;;  %5703 = vmatprep.subr.bf16.mxu0 %v7406_v33  ;;  %v135_v26 = vld [vmem:[%s8884_s0 + $0x2c0] sm:$0xff] }
  0xca   :  { %1907 = vmatmul.mubr.f32.gmra.mrb[36].mxu1 %v9433_v46  ;;  %v7536_v41 = vpack.c.bf16 %v2253_v49, %v2250_v48  ;;  %v7538_v38 = vsub.f32 %v116_v40, %v2253_v49  ;;  %v2399_v36 = vand.u32 4294901760, %v2398_v13  ;;  %v7540_v27 = vsub.f32 %v133_v56, %v2304_v60  ;;  %5727 = vmatprep.subr.bf16.mxu1 %v6900_v31  ;;  %v136_v56 = vld [vmem:[%s8884_s0 + $0x2c8] sm:$0xff] }
  0xcb   :  { %1914 = vmatprep.mubr.f32.mxu1 %v9434_v9  ;;  %v2406_v24 = vand.u32 4294901760, %v2405_v23  ;;  %v2256_v7 = vand.u32 4294901760, %v117_v59  ;;  %v2259_v22 = vand.u32 4294901760, %v118_v45  ;;  %v9050_v51 = vand.u32 4294901760, %v7497_v14 }
  0xcc   :  { %9435 = vst [vmem:[#allocation4_spill] sm:$0xff] %v7536_v41  ;;  %9436 = vst [vmem:[#allocation9_spill] sm:$0xff] %v7540_v27  ;;  %v7548_v48 = vpack.c.bf16 %v2518_v25, %v2511_v12  ;;  %v2525_v40 = vand.u32 4294901760, %v2524_v4  ;;  %v2532_v42 = vand.u32 4294901760, %v2531_v19  ;;  %v9053_v33 = vand.u32 4294901760, %v7508_v10  ;;  %5705 = vmatpush3.bf16.msra.mxu0 %v7412_v2  ;;  %v119_v2 = vld [vmem:[%s8884_s0 + $0x240] sm:$0xff] }
  0xcd   :  { %v9437_v31 = vand.u32 4294901760, %v7252_v3  ;;  %v7557_v49 = vpack.c.bf16 %v2307_v63, %v2304_v60  ;;  %v2412_v13 = vsub.f32 %v7490_v62, %v9055_v16  ;;  %v2419_v23 = vsub.f32 %v7492_v39, %v9054_v50  ;;  %5729 = vmatpush3.bf16.msra.mxu1 %v6924_v8  ;;  %5707 = vmatprep.subr.bf16.mxu0 %v7418_v21  ;;  %v120_v60 = vld [vmem:[%s8884_s0 + $0x248] sm:$0xff]  ;;  %v9447_v50 = vld [vmem:[#allocation26_spill] sm:$0xff] }
  0xce   :  { %v7567_v12 = vsub.f32 %v134_v54, %v2307_v63  ;;  %v2310_v3 = vand.u32 4294901760, %v135_v26  ;;  %v9052_v25 = vand.u32 4294901760, %v7529_v17  ;;  %v9051_v4 = vand.u32 4294901760, %v7538_v38  ;;  %5731 = vmatprep.subr.bf16.mxu1 %v6960_v37 }
  0xcf   :  { %1918 = vmatmul.mubr.f32.gmra.mrb[38].mxu1 %v9437_v31  ;;  %v7579_v8 = vpack.c.bf16 %v2406_v24, %v2399_v36  ;;  %v7581_v21 = vpack.c.bf16 %v2259_v22, %v2256_v7  ;;  %v2313_v54 = vand.u32 4294901760, %v136_v56  ;;  %v2538_v19 = vsub.f32 %v7497_v14, %v9050_v51  ;;  %v20_v51 = vld [vmem:[%s8885_s2 + $0x28] sm:$0xff] }
  0xd0   :  { %9438 = vst [vmem:[#allocation10_spill] sm:$0xff] %v7567_v12  ;;  %2209 = vmatprep.mubr.f32.mxu1 %v9432_v47  ;;  %v7586_v46 = vpack.c.bf16 %v2532_v42, %v2525_v40  ;;  %v7588_v63 = vsub.f32 %v117_v59, %v2256_v7  ;;  %v7590_v9 = vsub.f32 %v118_v45, %v2259_v22  ;;  %v2413_v47 = vand.u32 4294901760, %v2412_v13  ;;  %v137_v7 = vld [vmem:[%s8884_s0 + $0x2d0] sm:$0xff]  ;;  %v9443_v22 = vld [vmem:[#allocation23_spill] sm:$0xff] }
  0xd1   :  { %9439 = vst [vmem:[#allocation13_spill] sm:$0xff] %v7581_v21  ;;  %v2545_v37 = vsub.f32 %v7508_v10, %v9053_v33  ;;  %5709 = vmatpush3.bf16.msra.mxu0 %v7441_v5  ;;  %v2420_v36 = vand.u32 4294901760, %v2419_v23  ;;  %v2262_v24 = vand.u32 4294901760, %v119_v2  ;;  %v2265_v31 = vand.u32 4294901760, %v120_v60  ;;  %5733 = vmatpush3.bf16.msra.mxu1 %v6978_v15  ;;  %v138_v15 = vld [vmem:[%s8884_s0 + $0x2d8] sm:$0xff] }
  0xd2   :  { %9440 = vst [vmem:[#allocation14_spill] sm:$0xff] %v7588_v63  ;;  %9441 = vst [vmem:[#allocation22_spill] sm:$0xff] %v7590_v9  ;;  %5711 = vmatprep.subr.bf16.mxu0 %v7447_v35  ;;  %v7601_v59 = vsub.f32 %v135_v26, %v2310_v3  ;;  %v2426_v45 = vsub.f32 %v7529_v17, %v9052_v25  ;;  %v2433_v5 = vsub.f32 %v7538_v38, %v9051_v4  ;;  %v121_v4 = vld [vmem:[%s8884_s0 + $0x250] sm:$0xff]  ;;  %v122_v25 = vld [vmem:[%s8884_s0 + $0x258] sm:$0xff] }
  0xd3   :  { %v9061_v35 = vand.u32 4294901760, %v7540_v27  ;;  %5735 = vmatprep.subr.bf16.mxu1 %v9443_v22  ;;  %v7617_v26 = vpack.c.bf16 %v2313_v54, %v2310_v3  ;;  %v7619_v40 = vsub.f32 %v136_v56, %v2313_v54  ;;  %v2539_v42 = vand.u32 4294901760, %v2538_v19 }
  0xd4   :  { %9442 = vst [vmem:[#allocation17_spill] sm:$0xff] %v7601_v59  ;;  %v9060_v13 = vand.u32 4294901760, %v7567_v12  ;;  %v2546_v23 = vand.u32 4294901760, %v2545_v37  ;;  %v9062_v33 = vand.u32 4294901760, %v7588_v63  ;;  %v9063_v22 = vand.u32 4294901760, %v7590_v9 }
  0xd5   :  { %9444 = vst [vmem:[#allocation5_spill] sm:$0xff] %v7617_v26  ;;  %9445 = vst [vmem:[#allocation24_spill] sm:$0xff] %v7619_v40  ;;  %v7630_v3 = vand.u32 4294901760, %v20_v51  ;;  %5713 = vmatpush3.bf16.msra.mxu0 %v7455_v43  ;;  %v7633_v56 = vpack.c.bf16 %v2420_v36, %v2413_v47  ;;  %v7635_v54 = vpack.c.bf16 %v2265_v31, %v2262_v24  ;;  %v2316_v19 = vand.u32 4294901760, %v137_v7 }
  0xd6   :  { %v2319_v37 = vand.u32 4294901760, %v138_v15  ;;  %5737 = vmatpush3.bf16.msra.mxu1 %v9447_v50  ;;  %5747 = vmatprep.subr.bf16.mxu0 %v7457_v61  ;;  %v7639_v16 = vsub.f32 %v119_v2, %v2262_v24  ;;  %v2427_v57 = vand.u32 4294901760, %v2426_v45  ;;  %v2434_v52 = vand.u32 4294901760, %v2433_v5  ;;  %v139_v2 = vld [vmem:[%s8884_s0 + $0x2e0] sm:$0xff]  ;;  %v9451_v24 = vld [vmem:[#allocation20_spill] sm:$0xff]  ;;  %v9453_v5 = vld [vmem:[#allocation21_spill] sm:$0xff] }
  0xd7   :  { %9446 = vst [vmem:[#allocation25_spill] sm:$0xff] %v7630_v3  ;;  %v2552_v53 = vsub.f32 %v7540_v27, %v9061_v35  ;;  %5739 = vmatprep.subr.bf16.mxu1 %v9449_v34  ;;  %v7645_v43 = vsub.f32 %v120_v60, %v2265_v31  ;;  %v2559_v47 = vsub.f32 %v7567_v12, %v9060_v13  ;;  %v2268_v36 = vand.u32 4294901760, %v121_v4 }
  0xd8   :  { %9448 = vst [vmem:[#allocation15_spill] sm:$0xff] %v7639_v16  ;;  %v2271_v50 = vand.u32 4294901760, %v122_v25  ;;  %2086 = vmatmul.mubr.f32.vlgmr.msra.gmra.mrb[40].mxu0 %v9451_v24  ;;  %v7654_v45 = vpack.c.bf16 %v2546_v23, %v2539_v42  ;;  %v2440_v34 = vsub.f32 %v7588_v63, %v9062_v33  ;;  %v2447_v60 = vsub.f32 %v7590_v9, %v9063_v22  ;;  %v140_v42 = vld [vmem:[%s8884_s0 + $0x2e8] sm:$0xff]  ;;  %v9455_v22 = vld [vmem:[#allocation19_spill] sm:$0xff]  ;;  %v141_v9 = vld [vmem:[%s8884_s0 + $0x2f0] sm:$0xff] }
  0xd9   :  { %9450 = vst [vmem:[#allocation6_spill] sm:$0xff] %v7645_v43  ;;  %v7663_v31 = vsub.f32 %v20_v51, %v7630_v3  ;;  %5749 = vmatpush3.bf16.msra.mxu0 %v7465_v20  ;;  %2091 = vmatprep.mubr.f32.mxu0 %v9453_v5  ;;  %v7667_v13 = vpack.c.bf16 %v2319_v37, %v2316_v19  ;;  %v2553_v1 = vand.u32 4294901760, %v2552_v53  ;;  %v2322_v20 = vand.u32 4294901760, %v139_v2  ;;  %v9457_v33 = vld [vmem:[#allocation27_spill] sm:$0xff]  ;;  %v9459_v53 = vld [vmem:[#allocation30_spill] sm:$0xff] }
  0xda   :  { %v7669_v35 = vsub.f32 %v137_v7, %v2316_v19  ;;  %5741 = vmatpush3.bf16.msra.mxu1 %v9455_v22  ;;  %5751 = vmatprep.subr.bf16.mxu0 %v7467_v58  ;;  %v7678_v51 = vpack.c.bf16 %v2434_v52, %v2427_v57  ;;  %v7680_v30 = vsub.f32 %v138_v15, %v2319_v37  ;;  %v123_v7 = vld [vmem:[%s8884_s0 + $0x260] sm:$0xff]  ;;  %v7688_v19 = vld [vmem:[%s8884_s0 + $0x268] sm:$0xff]  ;;  %v2560_v22 = vand.u32 4294901760, %v2559_v47 }
  0xdb   :  { %9452 = vst [vmem:[#allocation29_spill] sm:$0xff] %v7663_v31  ;;  %5743 = vmatprep.subr.bf16.mxu1 %v9457_v33  ;;  %v7691_v23 = vpack.c.bf16 %v2271_v50, %v2268_v36  ;;  %v2441_v15 = vand.u32 4294901760, %v2440_v34  ;;  %v2448_v37 = vand.u32 4294901760, %v2447_v60  ;;  %v2325_v58 = vand.u32 4294901760, %v140_v42  ;;  %v9460_v63 = vld [vmem:[#allocation31_spill] sm:$0xff] }
  0xdc   :  { %9454 = vst [vmem:[#allocation32_spill] sm:$0xff] %v7669_v35  ;;  %9456 = vst [vmem:[#allocation28_spill] sm:$0xff] %v7680_v30  ;;  %2093 = vmatmul.mubr.f32.gmra.mrb[42].mxu0 %v9459_v53  ;;  %v9461_v33 = vand.u32 4294901760, %v7601_v59  ;;  %v9462_v12 = vand.u32 4294901760, %v7619_v40  ;;  %v2274_v57 = vand.u32 4294901760, %v123_v7  ;;  %v2277_v27 = vand.u32 4294901760, %v7688_v19 }
  0xdd   :  { %9458 = vst [vmem:[#allocation3_spill] sm:$0xff] %v7691_v23  ;;  %5753 = vmatpush3.bf16.msra.mxu0 %v7488_v28  ;;  %2098 = vmatprep.mubr.f32.mxu0 %v9460_v63  ;;  %v7708_v34 = vsub.f32 %v121_v4, %v2268_v36  ;;  %v7710_v60 = vsub.f32 %v122_v25, %v2271_v50  ;;  %v9464_v25 = vand.u32 4294901760, %v7645_v43  ;;  %v142_v50 = vld [vmem:[%s8884_s0 + $0x2f8] sm:$0xff] }
  0xde   :  { %v2566_v47 = vsub.f32 %v7601_v59, %v9461_v33  ;;  %v2573_v52 = vsub.f32 %v7619_v40, %v9462_v12  ;;  %5745 = vmatpush3.bf16.msra.mxu1 %v9406_v32  ;;  %5755 = vmatprep.subr.bf16.mxu0 %v7506_v18  ;;  %v7718_v12 = vpack.c.bf16 %v2560_v22, %v2553_v1  ;;  %v9463_v32 = vand.u32 4294901760, %v7639_v16  ;;  %v9465_v33 = vld [vmem:[#allocation33_spill] sm:$0xff] }
  0xdf   :  { %5779 = vmatprep.subr.bf16.mxu1 %v7548_v48  ;;  %v7720_v40 = vsub.f32 %v139_v2, %v2322_v20  ;;  %v2461_v36 = vsub.f32 %v7645_v43, %v9464_v25  ;;  %v7732_v28 = vpack.c.bf16 %v2448_v37, %v2441_v15  ;;  %v7734_v1 = vpack.c.bf16 %v2325_v58, %v2322_v20  ;;  %v125_v2 = vld [vmem:[%s8884_s0 + $0x270] sm:$0xff]  ;;  %v9469_v37 = vld [vmem:[#allocation34_spill] sm:$0xff]  ;;  %v28_v43 = vld [vmem:[%s8885_s2 + $0x68] sm:$0xff] }
  0xe0   :  { %v2454_v4 = vsub.f32 %v7639_v16, %v9463_v32  ;;  %2100 = vmatmul.mubr.f32.gmra.mrb[44].mxu0 %v9465_v33  ;;  %v7736_v48 = vsub.f32 %v140_v42, %v2325_v58  ;;  %v9467_v22 = vand.u32 4294901760, %v7663_v31  ;;  %v2567_v25 = vand.u32 4294901760, %v2566_v47  ;;  %v126_v58 = vld [vmem:[%s8884_s0 + $0x278] sm:$0xff]  ;;  %v19_v42 = vld [vmem:[%s8885_s2 + $0x20] sm:$0xff] }
  0xe1   :  { %9466 = vst [vmem:[#allocation23_spill] sm:$0xff] %v7734_v1  ;;  %2211 = vmatmul.mubr.f32.vlgmr.msra.gmra.mrb[40].mxu1 %v9451_v24  ;;  %5757 = vmatpush3.bf16.msra.mxu0 %v7536_v41  ;;  %v2574_v18 = vand.u32 4294901760, %v2573_v52  ;;  %v7746_v15 = vpack.c.bf16 %v2277_v27, %v2274_v57  ;;  %v2328_v20 = vand.u32 4294901760, %v141_v9  ;;  %v2331_v24 = vand.u32 4294901760, %v142_v50 }
  0xe2   :  { %v2336_v32 = vsub.f32 %v7663_v31, %v9467_v22  ;;  %5781 = vmatpush3.bf16.msra.mxu1 %v7579_v8  ;;  %2105 = vmatprep.mubr.f32.mxu0 %v9469_v37  ;;  %v9470_v22 = vand.u32 4294901760, %v7669_v35  ;;  %v9471_v47 = vand.u32 4294901760, %v7680_v30  ;;  %v7768_v8 = vsub.f32 %v123_v7, %v2274_v57 }
  0xe3   :  { %9468 = vst [vmem:[#allocation26_spill] sm:$0xff] %v7746_v15  ;;  %2216 = vmatprep.mubr.f32.mxu1 %v9453_v5  ;;  %5759 = vmatprep.subr.bf16.mxu0 %v7557_v49  ;;  %v2455_v16 = vand.u32 4294901760, %v2454_v4  ;;  %v2462_v59 = vand.u32 4294901760, %v2461_v36  ;;  %v2280_v61 = vand.u32 4294901760, %v125_v2  ;;  %v9102_v31 = vand.u32 4294901760, %v7710_v60 }
  0xe4   :  { %v2580_v52 = vsub.f32 %v7669_v35, %v9470_v22  ;;  %v2587_v41 = vsub.f32 %v7680_v30, %v9471_v47  ;;  %v9472_v22 = vld [vmem:[#allocation35_spill] sm:$0xff]  ;;  %5783 = vmatprep.subr.bf16.mxu1 %v7586_v46  ;;  %v2283_v47 = vand.u32 4294901760, %v126_v58  ;;  %v2337_v30 = vand.u32 4294901760, %v2336_v32 }
  0xe5   :  { %2107 = vmatmul.mubr.f32.gmra.mrb[46].mxu0 %v9472_v22  ;;  %v7773_v35 = vand.u32 4294901760, %v19_v42  ;;  %2218 = vmatmul.mubr.f32.gmra.mrb[42].mxu1 %v9459_v53  ;;  %v5794_v5 = vpack.c.bf16 %v2574_v18, %v2567_v25  ;;  %v7778_v7 = vsub.f32 %v7688_v19, %v2277_v27  ;;  %v7780_v57 = vsub.f32 %v141_v9, %v2328_v20  ;;  %v27_v46 = vld [vmem:[%s8885_s2 + $0x60] sm:$0xff]  ;;  %v36_v9 = vld [vmem:[%s8885_s2 + $0xa8] sm:$0xff] }
  0xe6   :  { %5761 = vmatpush3.bf16.msra.mxu0 %v7581_v21  ;;  %v7782_v4 = vand.u32 4294901760, %v28_v43  ;;  %5785 = vmatpush3.bf16.msra.mxu1 %v7633_v56  ;;  %v7789_v36 = vpack.c.bf16 %v2331_v24, %v2328_v20  ;;  %v2581_v53 = vand.u32 4294901760, %v2580_v52  ;;  %v2588_v32 = vand.u32 4294901760, %v2587_v41 }
  0xe7   :  { %9473 = vst [vmem:[#allocation12_spill] sm:$0xff] %v7773_v35  ;;  %2223 = vmatprep.mubr.f32.mxu1 %v9460_v63  ;;  %v9476_v18 = vand.u32 4294901760, %v7708_v34  ;;  %5763 = vmatprep.subr.bf16.mxu0 %v7617_v26  ;;  %v5796_v19 = vpack.c.bf16 %v2462_v59, %v2455_v16  ;;  %v7799_v56 = vsub.f32 %v142_v50, %v2331_v24  ;;  %v9101_v63 = vand.u32 4294901760, %v7720_v40  ;;  %v44_v24 = vld [vmem:[%s8885_s2 + $0xe8] sm:$0xff] }
  0xe8   :  { %9474 = vst [vmem:[#allocation20_spill] sm:$0xff] %v7782_v4  ;;  %9475 = vst [vmem:[#allocation21_spill] sm:$0xff] %v7789_v36  ;;  %5787 = vmatprep.subr.bf16.mxu1 %v7654_v45  ;;  %v9100_v25 = vand.u32 4294901760, %v7736_v48  ;;  %v7803_v41 = vpack.c.bf16 %v2283_v47, %v2280_v61  ;;  %v2475_v20 = vsub.f32 %v7710_v60, %v9102_v31  ;;  %2338 = vmatprep.mubr.f32.mxu0 %v2337_v30  ;;  %v35_v30 = vld [vmem:[%s8885_s2 + $0xa0] sm:$0xff] }
  0xe9   :  { %v2468_v27 = vsub.f32 %v7708_v34, %v9476_v18  ;;  %v7809_v52 = vsub.f32 %v19_v42, %v7773_v35  ;;  %v7811_v18 = vand.u32 4294901760, %v27_v46  ;;  %2225 = vmatmul.mubr.f32.gmra.mrb[44].mxu1 %v9465_v33  ;;  %v7815_v16 = vsub.f32 %v125_v2, %v2280_v61 }
  0xea   :  { %9477 = vst [vmem:[#allocation19_spill] sm:$0xff] %v7803_v41  ;;  %5765 = vmatpush3.bf16.msra.mxu0 %v7635_v54  ;;  %v9103_v59 = vand.u32 4294901760, %v7768_v8  ;;  %v7819_v45 = vsub.f32 %v28_v43, %v7782_v4  ;;  %v7821_v50 = vand.u32 4294901760, %v36_v9  ;;  %5789 = vmatpush3.bf16.msra.mxu1 %v7678_v51  ;;  %v5798_v33 = vpack.c.bf16 %v2588_v32, %v2581_v53 }
  0xeb   :  { %9478 = vst [vmem:[#allocation27_spill] sm:$0xff] %v7809_v52  ;;  %9479 = vst [vmem:[#allocation30_spill] sm:$0xff] %v7811_v18  ;;  %2230 = vmatprep.mubr.f32.mxu1 %v9469_v37  ;;  %v7828_v42 = vsub.f32 %v126_v58, %v2283_v47  ;;  %v2469_v61 = vand.u32 4294901760, %v2468_v27  ;;  %v9106_v2 = vand.u32 4294901760, %v7778_v7  ;;  %5767 = vmatprep.subr.bf16.mxu0 %v7667_v13  ;;  %v9107_v37 = vand.u32 4294901760, %v7780_v57 }
  0xec   :  { %9480 = vst [vmem:[#allocation31_spill] sm:$0xff] %v7821_v50  ;;  %5791 = vmatprep.subr.bf16.mxu1 %v7718_v12  ;;  %v2594_v43 = vsub.f32 %v7720_v40, %v9101_v63  ;;  %v2601_v51 = vsub.f32 %v7736_v48, %v9100_v25  ;;  %v2476_v47 = vand.u32 4294901760, %v2475_v20  ;;  %v7846_v12 = vsub.f32 %v27_v46, %v7811_v18  ;;  %v43_v46 = vld [vmem:[%s8885_s2 + $0xe0] sm:$0xff] }
  0xed   :  { %v7848_v32 = vand.u32 4294901760, %v35_v30  ;;  %2232 = vmatmul.mubr.f32.gmra.mrb[46].mxu1 %v9472_v22  ;;  %v5810_v27 = vpack.c.bf16 %v7367_v55, %v7365_v0  ;;  %v2482_v25 = vsub.f32 %v7768_v8, %v9103_v59  ;;  %v7859_v63 = vsub.f32 %v36_v9, %v7821_v50 }
  0xee   :  { %9481 = vst [vmem:[#allocation33_spill] sm:$0xff] %v7846_v12  ;;  %5769 = vmatpush3.bf16.msra.mxu0 %v7691_v23  ;;  %5793 = vmatpush3.bf16.msra.mxu1 %v7732_v28  ;;  %v2489_v22 = vsub.f32 %v7778_v7, %v9106_v2  ;;  %v7871_v20 = vand.u32 4294901760, %v44_v24  ;;  %v2595_v9 = vand.u32 4294901760, %v2594_v43  ;;  %v2602_v53 = vand.u32 4294901760, %v2601_v51 }
  0xef   :  { %9482 = vst [vmem:[#allocation34_spill] sm:$0xff] %v7848_v32  ;;  %5771 = vmatprep.subr.bf16.mxu0 %v7734_v1  ;;  %5795 = vmatprep.subr.bf16.mxu1 %v5794_v5  ;;  %v2608_v58 = vsub.f32 %v7780_v57, %v9107_v37  ;;  %v9484_v28 = vand.u32 4294901760, %v7799_v56  ;;  %v9485_v2 = vand.u32 4294901760, %v7809_v52  ;;  %v7885_v5 = vsub.f32 %v35_v30, %v7848_v32 }
  0xf0   :  { %9483 = vst [vmem:[#allocation35_spill] sm:$0xff] %v7871_v20  ;;  %2619 = vmatprep.mubr.f32.mxu1 %v7630_v3  ;;  %v7887_v43 = vand.u32 4294901760, %v43_v46  ;;  %v5800_v51 = vpack.c.bf16 %v2476_v47, %v2469_v61  ;;  %v2483_v37 = vand.u32 4294901760, %v2482_v25  ;;  %v9487_v23 = vand.u32 4294901760, %v7819_v45 }
  0xf1   :  { %v2615_v1 = vsub.f32 %v7799_v56, %v9484_v28  ;;  %v2342_v31 = vsub.f32 %v7809_v52, %v9485_v2  ;;  %v2490_v2 = vand.u32 4294901760, %v2489_v22  ;;  %v9488_v59 = vand.u32 4294901760, %v7815_v16 }
  0xf2   :  { %9486 = vst [vmem:[#allocation36_spill] sm:$0xff] %v7887_v43  ;;  %5773 = vmatpush3.bf16.msra.mxu0 %v7746_v15  ;;  %v2351_v28 = vsub.f32 %v7819_v45, %v9487_v23  ;;  %5797 = vmatpush3.bf16.msra.mxu1 %v5796_v19  ;;  %v9489_v52 = vand.u32 4294901760, %v7828_v42  ;;  %v7902_v25 = vsub.f32 %v44_v24, %v7871_v20  ;;  %v2609_v23 = vand.u32 4294901760, %v2608_v58 }
  0xf3   :  { %5775 = vmatprep.subr.bf16.mxu0 %v7789_v36  ;;  %v2496_v30 = vsub.f32 %v7815_v16, %v9488_v59  ;;  %5799 = vmatprep.subr.bf16.mxu1 %v5798_v33  ;;  %v5802_v61 = vpack.c.bf16 %v2602_v53, %v2595_v9  ;;  %v2616_v47 = vand.u32 4294901760, %v2615_v1  ;;  %v2343_v3 = vand.u32 4294901760, %v2342_v31 }
  0xf4   :  { %v2503_v15 = vsub.f32 %v7828_v42, %v9489_v52  ;;  %v9490_v19 = vand.u32 4294901760, %v7846_v12  ;;  %v7909_v59 = vsub.f32 %v43_v46, %v7887_v43  ;;  %v5812_v52 = vpack.c.bf16 %v7420_v11, %v7393_v29 }
  0xf5   :  { %v2352_v24 = vand.u32 4294901760, %v2351_v28  ;;  %v5814_v33 = vpack.c.bf16 %v7428_v44, %v7426_v6  ;;  %v9491_v31 = vand.u32 4294901760, %v7859_v63  ;;  %v5804_v58 = vpack.c.bf16 %v2490_v2, %v2483_v37 }
  0xf6   :  { %v2357_v22 = vsub.f32 %v7846_v12, %v9490_v19  ;;  %5777 = vmatpush3.bf16.msra.mxu0 %v7803_v41  ;;  %5801 = vmatpush3.bf16.msra.mxu1 %v5800_v51  ;;  %v2497_v53 = vand.u32 4294901760, %v2496_v30  ;;  %v2504_v9 = vand.u32 4294901760, %v2503_v15  ;;  %v9123_v46 = vand.u32 4294901760, %v7902_v25 }
  0xf7   :  { %v2366_v1 = vsub.f32 %v7859_v63, %v9491_v31  ;;  %5811 = vmatprep.subr.bf16.mxu0 %v5810_v27  ;;  %5803 = vmatprep.subr.bf16.mxu1 %v5802_v61  ;;  %v5806_v19 = vpack.c.bf16 %v2616_v47, %v2609_v23  ;;  %v9492_v28 = vand.u32 4294901760, %v7885_v5  ;;  %v9122_v12 = vand.u32 4294901760, %v7909_v59  ;;  %v9493_v47 = vld [vmem:[#allocation11_spill] sm:$0xff] }
  0xf8   :  { %v2358_v36 = vand.u32 4294901760, %v2357_v22  ;;  %v5816_v27 = vpack.c.bf16 %v7492_v39, %v7490_v62  ;;  %v5808_v15 = vpack.c.bf16 %v2504_v9, %v2497_v53  ;;  %v5818_v51 = vpack.c.bf16 %v7508_v10, %v7497_v14  ;;  %v9494_v22 = vld [vmem:[#allocation9_spill] sm:$0xff]  ;;  %v9500_v53 = vld [vmem:[#allocation24_spill] sm:$0xff] }
  0xf9   :  { %2344 = vmatmul.mubr.f32.vlgmr.msra.gmra.mrb[48].mxu0 %v2343_v3  ;;  %v2372_v41 = vsub.f32 %v7885_v5, %v9492_v28  ;;  %v2367_v37 = vand.u32 4294901760, %v2366_v1  ;;  %v2381_v3 = vsub.f32 %v7902_v25, %v9123_v46  ;;  %v2387_v30 = vsub.f32 %v7909_v59, %v9122_v12  ;;  %v9498_v1 = vld [vmem:[#allocation7_spill] sm:$0xff] }
  0xfa   :  { %5813 = vmatpush3.bf16.msra.mxu0 %v5812_v52  ;;  %2353 = vmatprep.mubr.f32.mxu0 %v2352_v24  ;;  %v5820_v61 = vpack.c.bf16 %v7538_v38, %v7529_v17  ;;  %v9495_v52 = vld [vmem:[#allocation10_spill] sm:$0xff]  ;;  %v9502_v28 = vld [vmem:[#allocation15_spill] sm:$0xff]  ;;  %v5838_v46 = vpack.c.bf16 %v7799_v56, %v7780_v57 }
  0xfb   :  { %5805 = vmatpush3.bf16.msra.mxu1 %v5804_v58  ;;  %5815 = vmatprep.subr.bf16.mxu0 %v5814_v33  ;;  %v2373_v2 = vand.u32 4294901760, %v2372_v41  ;;  %v2382_v23 = vand.u32 4294901760, %v2381_v3  ;;  %v5822_v24 = vpack.c.bf16 %v9495_v52, %v9494_v22  ;;  %v9496_v41 = vld [vmem:[#allocation14_spill] sm:$0xff]  ;;  %v9499_v58 = vld [vmem:[#allocation17_spill] sm:$0xff]  ;;  %v9506_v3 = vld [vmem:[#allocation32_spill] sm:$0xff] }
  0xfc   :  { %5807 = vmatprep.subr.bf16.mxu1 %v5806_v19  ;;  %v9497_v33 = vld [vmem:[#allocation22_spill] sm:$0xff]  ;;  %v5826_v9 = vpack.c.bf16 %v9500_v53, %v9499_v58  ;;  %v9501_v19 = vld [vmem:[#allocation8_spill] sm:$0xff] }
  0xfd   :  { %2359 = vmatmul.mubr.f32.gmra.mrb[50].mxu0 %v2358_v36  ;;  %v2388_v36 = vand.u32 4294901760, %v2387_v30  ;;  %v5824_v31 = vpack.c.bf16 %v9497_v33, %v9496_v41 }
  0xfe   :  { %5817 = vmatpush3.bf16.msra.mxu0 %v5816_v27  ;;  %2368 = vmatprep.mubr.f32.mxu0 %v2367_v37  ;;  %v9503_v27 = vld [vmem:[#allocation6_spill] sm:$0xff] }
  0xff   :  { %5809 = vmatpush3.bf16.msra.mxu1 %v5808_v15  ;;  %5819 = vmatprep.subr.bf16.mxu0 %v5818_v51  ;;  %v5828_v37 = vpack.c.bf16 %v9503_v27, %v9502_v28  ;;  %v9504_v15 = vld [vmem:[#allocation16_spill] sm:$0xff]  ;;  %v9505_v51 = vld [vmem:[#allocation18_spill] sm:$0xff] }
 0x100   :  { %5843 = vmatprep.subr.bf16.mxu1 %v9493_v47 }
 0x101   :  { %2374 = vmatmul.mubr.f32.gmra.mrb[52].mxu0 %v2373_v2  ;;  %v9507_v2 = vld [vmem:[#allocation28_spill] sm:$0xff] }
 0x102   :  { %2621 = vmatmul.mubr.f32.vlgmr.msra.gmra.mrb[48].mxu1 %v7773_v35  ;;  %5821 = vmatpush3.bf16.msra.mxu0 %v5820_v61  ;;  %v5830_v30 = vpack.c.bf16 %v9507_v2, %v9506_v3  ;;  %v9508_v61 = vld [vmem:[#allocation29_spill] sm:$0xff] }
 0x103   :  { %5845 = vmatpush3.bf16.msra.mxu1 %v9498_v1  ;;  %2383 = vmatprep.mubr.f32.mxu0 %v2382_v23  ;;  %v5832_v23 = vpack.c.bf16 %v7710_v60, %v7708_v34 }
 0x104   :  { %2626 = vmatprep.mubr.f32.mxu1 %v7782_v4  ;;  %5823 = vmatprep.subr.bf16.mxu0 %v5822_v24  ;;  %v9509_v24 = vld [vmem:[#allocation4_spill] sm:$0xff]  ;;  %v9516_v4 = vand.u32 4294901760, %v7428_v44  ;;  %v9521_v44 = vand.u32 4294901760, %v7529_v17  ;;  %v9527_v17 = vand.u32 4294901760, %v9499_v58 }
 0x105   :  { %2389 = vmatmul.mubr.f32.gmra.mrb[54].mxu0 %v2388_v36  ;;  %5847 = vmatprep.subr.bf16.mxu1 %v9501_v19  ;;  %v5834_v36 = vpack.c.bf16 %v7736_v48, %v7720_v40 }
 0x106   :  { %2628 = vmatmul.mubr.f32.gmra.mrb[50].mxu1 %v7811_v18  ;;  %5825 = vmatpush3.bf16.msra.mxu0 %v5824_v31  ;;  %v9515_v18 = vand.u32 4294901760, %v7426_v6 }
 0x107   :  { %5849 = vmatpush3.bf16.msra.mxu1 %v9504_v15  ;;  %2633 = vmatprep.mubr.f32.mxu1 %v7821_v50 }
 0x108   :  { %5827 = vmatprep.subr.bf16.mxu0 %v5826_v9  ;;  %5851 = vmatprep.subr.bf16.mxu1 %v9505_v51  ;;  %v4338_v31 = vpop.f32.mrb[0].mxu0  ;;  %v5878_v35 = vpack.c.bf16 %v9516_v4, %v9515_v18 }
 0x109   :  { %2777 = vmatprep.mubr.f32.mxu0 %v9508_v61  ;;  %v4339_v9 = vpop.f32.mrb[1].mxu0 }
 0x10a   :  { %2635 = vmatmul.mubr.f32.gmra.mrb[52].mxu1 %v7848_v32  ;;  %5829 = vmatpush3.bf16.msra.mxu0 %v5828_v37  ;;  %v5836_v37 = vpack.c.bf16 %v7778_v7, %v7768_v8  ;;  %v4340_v12 = vadd.f32 %v4339_v9, %v4338_v31  ;;  %v160_v31 = vld [vmem:[%s8884_s0 + $0x388] sm:$0xff]  ;;  %v9512_v9 = vand.u32 4294901760, %v7367_v55  ;;  %v9514_v32 = vand.u32 4294901760, %v7420_v11  ;;  %v143_v55 = vld [vmem:[%s8884_s0 + $0x300] sm:$0xff] }
 0x10b   :  { %5853 = vmatpush3.bf16.msra.mxu1 %v9509_v24  ;;  %2640 = vmatprep.mubr.f32.mxu1 %v7871_v20  ;;  %v9513_v20 = vand.u32 4294901760, %v7393_v29  ;;  %v9519_v29 = vand.u32 4294901760, %v7497_v14  ;;  %v9520_v11 = vand.u32 4294901760, %v7508_v10  ;;  %v9525_v14 = vand.u32 4294901760, %v9496_v41  ;;  %v161_v41 = vld [vmem:[%s8884_s0 + $0x390] sm:$0xff] }
 0x10c   :  { %5831 = vmatprep.subr.bf16.mxu0 %v5830_v30  ;;  %5855 = vmatprep.subr.bf16.mxu1 %v7557_v49  ;;  %v9510_v30 = vand.u32 4294901760, %v9508_v61  ;;  %v9511_v61 = vand.u32 4294901760, %v7365_v0  ;;  %v144_v0 = vld [vmem:[%s8884_s0 + $0x308] sm:$0xff]  ;;  %v9526_v10 = vand.u32 4294901760, %v9497_v33  ;;  %v162_v33 = vld [vmem:[%s8884_s0 + $0x398] sm:$0xff] }
 0x10d   :  { %v5876_v50 = vpack.c.bf16 %v9514_v32, %v9513_v20  ;;  %v8015_v6 = vpack.c.bf16 %v9520_v11, %v9519_v29  ;;  %v3271_v11 = vand.u32 4294901760, %v144_v0 }
 0x10e   :  { %2642 = vmatmul.mubr.f32.gmra.mrb[54].mxu1 %v7887_v43  ;;  %5833 = vmatpush3.bf16.msra.mxu0 %v5832_v23  ;;  %v159_v43 = vld [vmem:[%s8884_s0 + $0x380] sm:$0xff]  ;;  %v7979_v23 = vstv %s8886_s1  ;;  %v8034_v32 = vpack.c.bf16 %v9526_v10, %v9525_v14  ;;  %v9536_v14 = vand.u32 4294901760, %v7736_v48  ;;  %v3322_v48 = vand.u32 4294901760, %v161_v41 }
 0x10f   :  { %5857 = vmatpush3.bf16.msra.mxu1 %v7581_v21  ;;  %5835 = vmatprep.subr.bf16.mxu0 %v5834_v36  ;;  %v5840_v36 = vpack.c.bf16 %v7828_v42, %v7815_v16  ;;  %v9518_v21 = vand.u32 4294901760, %v7492_v39  ;;  %v3316_v18 = vand.u32 4294901760, %v159_v43  ;;  %v286_v58 = vadd.f32 %v4340_v12, %v7979_v23 }
 0x110   :  { %5859 = vmatprep.subr.bf16.mxu1 %v7617_v26  ;;  %2911 = vmatprep.mubr.f32.mxu1 %v9510_v30  ;;  %v5874_v30 = vpack.c.bf16 %v9512_v9, %v9511_v61  ;;  %v9517_v26 = vand.u32 4294901760, %v7490_v62  ;;  %v9522_v62 = vand.u32 4294901760, %v7538_v38  ;;  %v9528_v38 = vand.u32 4294901760, %v9500_v53 }
 0x111   :  { %v3319_v61 = vand.u32 4294901760, %v160_v31  ;;  %v4382_v53 = vpop.f32.mrb[0].mxu1  ;;  %v9531_v9 = vand.u32 4294901760, %v9506_v3  ;;  %v9533_v12 = vand.u32 4294901760, %v7708_v34  ;;  %v9534_v3 = vand.u32 4294901760, %v7710_v60 }
 0x112   :  { %5837 = vmatpush3.bf16.msra.mxu0 %v5836_v37  ;;  %v8002_v37 = vpack.c.bf16 %v9518_v21, %v9517_v26  ;;  %v8021_v39 = vpack.c.bf16 %v9522_v62, %v9521_v44  ;;  %v9523_v21 = vand.u32 4294901760, %v9494_v22  ;;  %v9524_v26 = vand.u32 4294901760, %v9495_v52  ;;  %v145_v44 = vld [vmem:[%s8884_s0 + $0x310] sm:$0xff]  ;;  %v146_v62 = vld [vmem:[%s8884_s0 + $0x318] sm:$0xff] }
 0x113   :  { %5861 = vmatpush3.bf16.msra.mxu1 %v7635_v54  ;;  %5839 = vmatprep.subr.bf16.mxu0 %v5838_v46  ;;  %v8040_v20 = vpack.c.bf16 %v9528_v38, %v9527_v17  ;;  %v9529_v46 = vand.u32 4294901760, %v9502_v28  ;;  %v9530_v22 = vand.u32 4294901760, %v9503_v27  ;;  %v9532_v28 = vand.u32 4294901760, %v9507_v2 }
 0x114   :  { %v8027_v4 = vpack.c.bf16 %v9524_v26, %v9523_v21  ;;  %5863 = vmatprep.subr.bf16.mxu1 %v7667_v13  ;;  %v3268_v27 = vand.u32 4294901760, %v143_v55  ;;  %v4383_v21 = vpop.f32.mrb[1].mxu1  ;;  %v8071_v26 = vpack.c.bf16 %v9534_v3, %v9533_v12  ;;  %v9535_v2 = vand.u32 4294901760, %v7720_v40 }
 0x115   :  { %v8046_v52 = vpack.c.bf16 %v9530_v22, %v9529_v46  ;;  %v8059_v29 = vpack.c.bf16 %v9532_v28, %v9531_v9  ;;  %v9537_v17 = vand.u32 4294901760, %v7768_v8  ;;  %v9538_v38 = vand.u32 4294901760, %v7778_v7  ;;  %v9541_v9 = vld [vmem:[#allocation3_spill] sm:$0xff]  ;;  %v164_v7 = vld [vmem:[%s8884_s0 + $0x3a8] sm:$0xff] }
 0x116   :  { %5841 = vmatpush3.bf16.msra.mxu0 %v5840_v36  ;;  %v8077_v10 = vpack.c.bf16 %v9536_v14, %v9535_v2  ;;  %v9539_v36 = vand.u32 4294901760, %v7780_v57  ;;  %v9540_v34 = vand.u32 4294901760, %v7799_v56  ;;  %v4384_v60 = vadd.f32 %v4383_v21, %v4382_v53  ;;  %v163_v8 = vld [vmem:[%s8884_s0 + $0x3a0] sm:$0xff]  ;;  %v4341_v56 = vpop.f32.mrb[2].mxu0 }
 0x117   :  { %v8083_v46 = vpack.c.bf16 %v9538_v38, %v9537_v17  ;;  %5865 = vmatpush3.bf16.msra.mxu1 %v9541_v9  ;;  %5875 = vmatprep.subr.bf16.mxu0 %v5874_v30  ;;  %v8092_v40 = vsub.f32 %v159_v43, %v3316_v18  ;;  %v3325_v28 = vand.u32 4294901760, %v162_v33  ;;  %v9543_v57 = vld [vmem:[#allocation23_spill] sm:$0xff]  ;;  %v9544_v53 = vand.u32 4294901760, %v7815_v16  ;;  %v4342_v17 = vpop.f32.mrb[3].mxu0 }
 0x118   :  { %v8089_v22 = vpack.c.bf16 %v9540_v34, %v9539_v36  ;;  %5867 = vmatprep.subr.bf16.mxu1 %v9543_v57  ;;  %v9545_v21 = vand.u32 4294901760, %v7828_v42  ;;  %v8107_v43 = vpack.c.bf16 %v3319_v61, %v3316_v18  ;;  %v3274_v12 = vand.u32 4294901760, %v145_v44  ;;  %v9547_v14 = vld [vmem:[#allocation27_spill] sm:$0xff] }
 0x119   :  { %9542 = vst [vmem:[#allocation11_spill] sm:$0xff] %v8092_v40  ;;  %v3277_v3 = vand.u32 4294901760, %v146_v62  ;;  %v8109_v2 = vadd.f32 %v4384_v60, %v286_v58  ;;  %2780 = vmatmul.mubr.f32.vlgmr.msra.gmra.mrb[56].mxu0 %v9547_v14  ;;  %v8112_v38 = vsub.f32 %v160_v31, %v3319_v61  ;;  %v8114_v36 = vsub.f32 %v143_v55, %v3268_v27  ;;  %v4385_v58 = vpop.f32.mrb[2].mxu1  ;;  %v8135_v61 = vld [vmem:[%s8884_s0 + $0x328] sm:$0xff] }
 0x11a   :  { %v8105_v30 = vpack.c.bf16 %v9545_v21, %v9544_v53  ;;  %9546 = vst [vmem:[#allocation9_spill] sm:$0xff] %v8107_v43  ;;  %v8116_v34 = vsub.f32 %v144_v0, %v3271_v11  ;;  %5877 = vmatpush3.bf16.msra.mxu0 %v5876_v50  ;;  %2786 = vmatprep.mubr.f32.mxu0 %v7819_v45  ;;  %v3328_v18 = vand.u32 4294901760, %v163_v8  ;;  %v3331_v53 = vand.u32 4294901760, %v164_v7  ;;  %v9550_v21 = vld [vmem:[#allocation26_spill] sm:$0xff]  ;;  %v147_v50 = vld [vmem:[%s8884_s0 + $0x320] sm:$0xff] }
 0x11b   :  { %v4343_v16 = vadd.f32 %v4342_v17, %v4341_v56  ;;  %v8119_v42 = vpack.c.bf16 %v3271_v11, %v3268_v27  ;;  %5869 = vmatpush3.bf16.msra.mxu1 %v9550_v21  ;;  %5879 = vmatprep.subr.bf16.mxu0 %v5878_v35  ;;  %v8122_v60 = vpack.c.bf16 %v3325_v28, %v3322_v48  ;;  %v9553_v27 = vld [vmem:[#allocation21_spill] sm:$0xff]  ;;  %v4344_v11 = vpop.f32.mrb[4].mxu0 }
 0x11c   :  { %9548 = vst [vmem:[#allocation10_spill] sm:$0xff] %v8116_v34  ;;  %v8124_v31 = vsub.f32 %v161_v41, %v3322_v48  ;;  %v8126_v55 = vsub.f32 %v162_v33, %v3325_v28  ;;  %5871 = vmatprep.subr.bf16.mxu1 %v9553_v27  ;;  %v4386_v41 = vpop.f32.mrb[3].mxu1  ;;  %v8139_v48 = vpack.c.bf16 %v3277_v3, %v3274_v12  ;;  %v9555_v56 = vld [vmem:[#allocation33_spill] sm:$0xff]  ;;  %v4345_v17 = vpop.f32.mrb[5].mxu0  ;;  %v9558_v27 = vand.u32 4294901760, %v8092_v40 }
 0x11d   :  { %9549 = vst [vmem:[#allocation14_spill] sm:$0xff] %v8119_v42  ;;  %9551 = vst [vmem:[#allocation22_spill] sm:$0xff] %v8122_v60  ;;  %v301_v35 = vadd.f32 %v4343_v16, %v7979_v23  ;;  %v8141_v33 = vsub.f32 %v145_v44, %v3274_v12  ;;  %v8143_v28 = vsub.f32 %v146_v62, %v3277_v3  ;;  %2789 = vmatmul.mubr.f32.gmra.mrb[58].mxu0 %v9555_v56  ;;  %v9557_v12 = vld [vmem:[#allocation19_spill] sm:$0xff] }
 0x11e   :  { %9552 = vst [vmem:[#allocation7_spill] sm:$0xff] %v8126_v55  ;;  %9554 = vst [vmem:[#allocation17_spill] sm:$0xff] %v8139_v48  ;;  %v4387_v0 = vadd.f32 %v4386_v41, %v4385_v58  ;;  %5881 = vmatpush3.bf16.msra.mxu0 %v8002_v37  ;;  %2795 = vmatprep.mubr.f32.mxu0 %v7859_v63  ;;  %v4346_v16 = vadd.f32 %v4345_v17, %v4344_v11  ;;  %v3280_v44 = vand.u32 4294901760, %v147_v50  ;;  %v4388_v58 = vpop.f32.mrb[4].mxu1  ;;  %v8168_v11 = vld [vmem:[%s8884_s0 + $0x3b0] sm:$0xff]  ;;  %v8173_v17 = vld [vmem:[%s8884_s0 + $0x3b8] sm:$0xff] }
 0x11f   :  { %v8151_v48 = vpack.c.bf16 %v3331_v53, %v3328_v18  ;;  %v3283_v62 = vand.u32 4294901760, %v8135_v61  ;;  %5873 = vmatpush3.bf16.msra.mxu1 %v9557_v12  ;;  %5883 = vmatprep.subr.bf16.mxu0 %v8015_v6  ;;  %v8158_v41 = vsub.f32 %v163_v8, %v3328_v18  ;;  %v8163_v37 = vsub.f32 %v8092_v40, %v9558_v27  ;;  %v4347_v8 = vpop.f32.mrb[6].mxu0  ;;  %v4389_v18 = vpop.f32.mrb[5].mxu1 }
 0x120   :  { %v8156_v3 = vadd.f32 %v4387_v0, %v301_v35  ;;  %5907 = vmatprep.subr.bf16.mxu1 %v9493_v47  ;;  %v316_v6 = vadd.f32 %v4346_v16, %v7979_v23  ;;  %v8177_v0 = vsub.f32 %v164_v7, %v3331_v53  ;;  %v4348_v21 = vpop.f32.mrb[7].mxu0  ;;  %v4390_v60 = vadd.f32 %v4389_v18, %v4388_v58 }
 0x121   :  { %9556 = vst [vmem:[#allocation24_spill] sm:$0xff] %v8151_v48  ;;  %2798 = vmatmul.mubr.f32.gmra.mrb[60].mxu0 %v7885_v5  ;;  %v9559_v40 = vand.u32 4294901760, %v8112_v38  ;;  %v9560_v47 = vand.u32 4294901760, %v8114_v36  ;;  %v9561_v12 = vand.u32 4294901760, %v8116_v34  ;;  %v9562_v53 = vand.u32 4294901760, %v9547_v14 }
 0x122   :  { %5885 = vmatpush3.bf16.msra.mxu0 %v8021_v39  ;;  %v4349_v35 = vadd.f32 %v4348_v21, %v4347_v8  ;;  %v8194_v27 = vpack.c.bf16 %v3283_v62, %v3280_v44  ;;  %v3334_v58 = vand.u32 4294901760, %v8168_v11  ;;  %2804 = vmatprep.mubr.f32.mxu0 %v7902_v25  ;;  %v8200_v18 = vadd.f32 %v4390_v60, %v316_v6  ;;  %v149_v39 = vld [vmem:[%s8884_s0 + $0x330] sm:$0xff]  ;;  %v150_v21 = vld [vmem:[%s8884_s0 + $0x338] sm:$0xff] }
 0x123   :  { %v3547_v48 = vsub.f32 %v8112_v38, %v9559_v40  ;;  %v3428_v16 = vsub.f32 %v8114_v36, %v9560_v47  ;;  %v3435_v7 = vsub.f32 %v8116_v34, %v9561_v12  ;;  %2915 = vmatmul.mubr.f32.vlgmr.msra.gmra.mrb[56].mxu1 %v9562_v53  ;;  %v3337_v40 = vand.u32 4294901760, %v8173_v17  ;;  %v4391_v47 = vpop.f32.mrb[6].mxu1  ;;  %5887 = vmatprep.subr.bf16.mxu0 %v8027_v4 }
 0x124   :  { %9563 = vst [vmem:[#allocation8_spill] sm:$0xff] %v8194_v27  ;;  %5909 = vmatpush3.bf16.msra.mxu1 %v9498_v1  ;;  %v3541_v12 = vand.u32 4294901760, %v8163_v37  ;;  %v8203_v14 = vsub.f32 %v147_v50, %v3280_v44  ;;  %v9564_v1 = vand.u32 4294901760, %v7819_v45  ;;  %v331_v60 = vadd.f32 %v4349_v35, %v7979_v23  ;;  %v4392_v37 = vpop.f32.mrb[7].mxu1  ;;  %v8226_v45 = vld [vmem:[%s8884_s0 + $0x3c0] sm:$0xff] }
 0x125   :  { %v9565_v50 = vand.u32 4294901760, %v8124_v31  ;;  %v9566_v6 = vand.u32 4294901760, %v8126_v55  ;;  %2807 = vmatmul.mubr.f32.gmra.mrb[62].mxu0 %v7909_v59  ;;  %5911 = vmatprep.subr.bf16.mxu1 %v9501_v19  ;;  %v4393_v23 = vadd.f32 %v4392_v37, %v4391_v47  ;;  %v3548_v4 = vand.u32 4294901760, %v3547_v48  ;;  %v9573_v37 = vld [vmem:[#allocation25_spill] sm:$0xff] }
 0x126   :  { %2922 = vmatprep.mubr.f32.mxu1 %v9564_v1  ;;  %v3429_v35 = vand.u32 4294901760, %v3428_v16  ;;  %v3436_v1 = vand.u32 4294901760, %v3435_v7  ;;  %5889 = vmatpush3.bf16.msra.mxu0 %v8034_v32  ;;  %v8236_v34 = vpack.c.bf16 %v3337_v40, %v3334_v58  ;;  %v3286_v8 = vand.u32 4294901760, %v149_v39 }
 0x127   :  { %v3554_v44 = vsub.f32 %v8124_v31, %v9565_v50  ;;  %v3561_v53 = vsub.f32 %v8126_v55, %v9566_v6  ;;  %v9567_v50 = vand.u32 4294901760, %v9555_v56  ;;  %v8234_v6 = vsub.f32 %v8135_v61, %v3283_v62  ;;  %v168_v56 = vld [vmem:[%s8884_s0 + $0x3c8] sm:$0xff]  ;;  %5891 = vmatprep.subr.bf16.mxu0 %v8040_v20  ;;  %3114 = vmatprep.mubr.f32.mxu0 %v9573_v37 }
 0x128   :  { %9569 = vst [vmem:[#allocation6_spill] sm:$0xff] %v8236_v34  ;;  %v3289_v55 = vand.u32 4294901760, %v150_v21  ;;  %5913 = vmatpush3.bf16.msra.mxu1 %v9504_v15  ;;  %v9570_v19 = vand.u32 4294901760, %v7859_v63  ;;  %v8241_v48 = vadd.f32 %v4393_v23, %v331_v60  ;;  %v3340_v32 = vand.u32 4294901760, %v8226_v45 }
 0x129   :  { %2926 = vmatmul.mubr.f32.gmra.mrb[58].mxu1 %v9567_v50  ;;  %9568 = vst [vmem:[#allocation15_spill] sm:$0xff] %v8234_v6  ;;  %v9150_v61 = vand.u32 4294901760, %v8158_v41  ;;  %v9149_v62 = vand.u32 4294901760, %v8177_v0  ;;  %5915 = vmatprep.subr.bf16.mxu1 %v9505_v51  ;;  %v3555_v15 = vand.u32 4294901760, %v3554_v44  ;;  %v3562_v16 = vand.u32 4294901760, %v3561_v53 }
 0x12a   :  { %2933 = vmatprep.mubr.f32.mxu1 %v9570_v19  ;;  %v9571_v63 = vand.u32 4294901760, %v8141_v33  ;;  %v9572_v47 = vand.u32 4294901760, %v8143_v28  ;;  %v8258_v23 = vpack.c.bf16 %v3548_v4, %v3541_v12  ;;  %v8260_v50 = vpack.c.bf16 %v3436_v1, %v3429_v35  ;;  %5893 = vmatpush3.bf16.msra.mxu0 %v8046_v52  ;;  %v169_v4 = vld [vmem:[%s8884_s0 + $0x3d0] sm:$0xff] }
 0x12b   :  { %v8263_v20 = vsub.f32 %v8168_v11, %v3334_v58  ;;  %v8266_v51 = vsub.f32 %v8173_v17, %v3337_v40  ;;  %v9576_v44 = vand.u32 4294901760, %v7885_v5  ;;  %v8271_v53 = vpack.c.bf16 %v3289_v55, %v3286_v8  ;;  %v151_v11 = vld [vmem:[%s8884_s0 + $0x340] sm:$0xff]  ;;  %v152_v17 = vld [vmem:[%s8884_s0 + $0x348] sm:$0xff]  ;;  %5895 = vmatprep.subr.bf16.mxu0 %v8059_v29  ;;  %v170_v29 = vld [vmem:[%s8884_s0 + $0x3d8] sm:$0xff] }
 0x12c   :  { %v3442_v7 = vsub.f32 %v8141_v33, %v9571_v63  ;;  %v3449_v60 = vsub.f32 %v8143_v28, %v9572_v47  ;;  %v8273_v19 = vsub.f32 %v149_v39, %v3286_v8  ;;  %v8275_v63 = vsub.f32 %v150_v21, %v3289_v55  ;;  %5917 = vmatpush3.bf16.msra.mxu1 %v9509_v24  ;;  %v4426_v39 = vpop.f32.mrb[8].mxu0 }
 0x12d   :  { %9574 = vst [vmem:[#allocation16_spill] sm:$0xff] %v8263_v20  ;;  %9575 = vst [vmem:[#allocation18_spill] sm:$0xff] %v8266_v51  ;;  %2937 = vmatmul.mubr.f32.gmra.mrb[60].mxu1 %v9576_v44  ;;  %v3343_v12 = vand.u32 4294901760, %v168_v56  ;;  %v9579_v5 = vand.u32 4294901760, %v7902_v25  ;;  %v3568_v52 = vsub.f32 %v8158_v41, %v9150_v61  ;;  %v3575_v55 = vsub.f32 %v8177_v0, %v9149_v62  ;;  %v4427_v35 = vpop.f32.mrb[9].mxu0  ;;  %v9584_v44 = vld [vmem:[#allocation13_spill] sm:$0xff] }
 0x12e   :  { %9577 = vst [vmem:[#allocation32_spill] sm:$0xff] %v8273_v19  ;;  %9578 = vst [vmem:[#allocation28_spill] sm:$0xff] %v8275_v63  ;;  %v9154_v58 = vand.u32 4294901760, %v8203_v14  ;;  %v9153_v40 = vand.u32 4294901760, %v8234_v6  ;;  %5919 = vmatprep.subr.bf16.mxu1 %v7557_v49  ;;  %v8296_v24 = vpack.c.bf16 %v3562_v16, %v3555_v15  ;;  %v3443_v25 = vand.u32 4294901760, %v3442_v7  ;;  %5897 = vmatpush3.bf16.msra.mxu0 %v8071_v26  ;;  %v153_v26 = vld [vmem:[%s8884_s0 + $0x350] sm:$0xff] }
 0x12f   :  { %2944 = vmatprep.mubr.f32.mxu1 %v9579_v5  ;;  %v3450_v21 = vand.u32 4294901760, %v3449_v60  ;;  %v8299_v8 = vsub.f32 %v8226_v45, %v3340_v32  ;;  %v3292_v1 = vand.u32 4294901760, %v151_v11  ;;  %v3295_v47 = vand.u32 4294901760, %v152_v17  ;;  %5899 = vmatprep.subr.bf16.mxu0 %v8077_v10 }
 0x130   :  { %v9152_v49 = vand.u32 4294901760, %v8263_v20  ;;  %v9151_v15 = vand.u32 4294901760, %v8266_v51  ;;  %v4428_v16 = vadd.f32 %v4427_v35, %v4426_v39  ;;  %v9581_v7 = vand.u32 4294901760, %v7909_v59  ;;  %5921 = vmatpush3.bf16.msra.mxu1 %v9584_v44 }
 0x131   :  { %9580 = vst [vmem:[#allocation29_spill] sm:$0xff] %v8299_v8  ;;  %v8312_v45 = vpack.c.bf16 %v3343_v12, %v3340_v32  ;;  %v8314_v60 = vsub.f32 %v168_v56, %v3343_v12  ;;  %v3569_v5 = vand.u32 4294901760, %v3568_v52  ;;  %v3576_v62 = vand.u32 4294901760, %v3575_v55  ;;  %v4429_v32 = vpop.f32.mrb[10].mxu0  ;;  %v9585_v12 = vld [vmem:[#allocation5_spill] sm:$0xff] }
 0x132   :  { %2948 = vmatmul.mubr.f32.gmra.mrb[62].mxu1 %v9581_v7  ;;  %v3456_v61 = vsub.f32 %v8203_v14, %v9154_v58  ;;  %v3463_v59 = vsub.f32 %v8234_v6, %v9153_v40  ;;  %v722_v56 = vadd.f32 %v4428_v16, %v8109_v2  ;;  %5923 = vmatprep.subr.bf16.mxu1 %v9585_v12  ;;  %v3346_v52 = vand.u32 4294901760, %v169_v4  ;;  %v4430_v39 = vpop.f32.mrb[11].mxu0 }
 0x133   :  { %9582 = vst [vmem:[#allocation4_spill] sm:$0xff] %v8312_v45  ;;  %9583 = vst [vmem:[#allocation3_spill] sm:$0xff] %v8314_v60  ;;  %3239 = vmatprep.mubr.f32.mxu1 %v9573_v37  ;;  %v8330_v10 = vpack.c.bf16 %v3450_v21, %v3443_v25  ;;  %v3349_v55 = vand.u32 4294901760, %v170_v29  ;;  %v8332_v35 = vpack.c.bf16 %v3295_v47, %v3292_v1  ;;  %v154_v37 = vld [vmem:[%s8884_s0 + $0x358] sm:$0xff]  ;;  %5901 = vmatpush3.bf16.msra.mxu0 %v8083_v46 }
 0x134   :  { %v8334_v7 = vsub.f32 %v151_v11, %v3292_v1  ;;  %v3582_v44 = vsub.f32 %v8263_v20, %v9152_v49  ;;  %v3589_v2 = vsub.f32 %v8266_v51, %v9151_v15  ;;  %v4431_v25 = vadd.f32 %v4430_v39, %v4429_v32  ;;  %v22_v1 = vld [vmem:[%s8885_s2 + $0x38] sm:$0xff]  ;;  %5925 = vmatpush3.bf16.msra.mxu1 %v7635_v54  ;;  %v4432_v49 = vpop.f32.mrb[12].mxu0  ;;  %v171_v54 = vld [vmem:[%s8884_s0 + $0x3e0] sm:$0xff]  ;;  %v9610_v51 = vld [vmem:[#allocation24_spill] sm:$0xff] }
 0x135   :  { %9586 = vst [vmem:[#allocation23_spill] sm:$0xff] %v8332_v35  ;;  %v3298_v21 = vand.u32 4294901760, %v153_v26  ;;  %v9155_v16 = vand.u32 4294901760, %v8273_v19  ;;  %5903 = vmatprep.subr.bf16.mxu0 %v8089_v22  ;;  %v8353_v12 = vpack.c.bf16 %v3576_v62, %v3569_v5  ;;  %v8355_v15 = vsub.f32 %v152_v17, %v3295_v47  ;;  %5927 = vmatprep.subr.bf16.mxu1 %v7667_v13  ;;  %v4470_v22 = vpop.f32.mrb[8].mxu1  ;;  %v4433_v62 = vpop.f32.mrb[13].mxu0 }
 0x136   :  { %9587 = vst [vmem:[#allocation27_spill] sm:$0xff] %v8334_v7  ;;  %v3457_v32 = vand.u32 4294901760, %v3456_v61  ;;  %v3464_v39 = vand.u32 4294901760, %v3463_v59  ;;  %v731_v46 = vadd.f32 %v4431_v25, %v8156_v3  ;;  %v8359_v40 = vpack.c.bf16 %v3349_v55, %v3346_v52  ;;  %v172_v3 = vld [vmem:[%s8884_s0 + $0x3e8] sm:$0xff]  ;;  %v4435_v25 = vpop.f32.mrb[14].mxu0 }
 0x137   :  { %9588 = vst [vmem:[#allocation33_spill] sm:$0xff] %v8355_v15  ;;  %v8361_v58 = vsub.f32 %v169_v4, %v3346_v52  ;;  %v3301_v11 = vand.u32 4294901760, %v154_v37  ;;  %v8366_v17 = vsub.f32 %v170_v29, %v3349_v55  ;;  %v3583_v61 = vand.u32 4294901760, %v3582_v44  ;;  %v4471_v4 = vpop.f32.mrb[9].mxu1  ;;  %5905 = vmatpush3.bf16.msra.mxu0 %v8105_v30  ;;  %v9600_v30 = vld [vmem:[#allocation22_spill] sm:$0xff] }
 0x138   :  { %9589 = vst [vmem:[#allocation25_spill] sm:$0xff] %v8359_v40  ;;  %v3590_v47 = vand.u32 4294901760, %v3589_v2  ;;  %v8371_v13 = vand.u32 4294901760, %v22_v1  ;;  %v4434_v5 = vadd.f32 %v4433_v62, %v4432_v49  ;;  %v8374_v59 = vsub.f32 %v153_v26, %v3298_v21  ;;  %5929 = vmatpush3.bf16.msra.mxu1 %v9541_v9  ;;  %5939 = vmatprep.subr.bf16.mxu0 %v8107_v43  ;;  %v4473_v9 = vpop.f32.mrb[10].mxu1 }
 0x139   :  { %9590 = vst [vmem:[#allocation13_spill] sm:$0xff] %v8361_v58  ;;  %9591 = vst [vmem:[#allocation5_spill] sm:$0xff] %v8366_v17  ;;  %v3470_v52 = vsub.f32 %v8273_v19, %v9155_v16  ;;  %v9594_v29 = vand.u32 4294901760, %v8275_v63  ;;  %v4472_v44 = vadd.f32 %v4471_v4, %v4470_v22  ;;  %v8384_v2 = vpack.c.bf16 %v3464_v39, %v3457_v32  ;;  %v4436_v4 = vpop.f32.mrb[15].mxu0  ;;  %v9599_v39 = vld [vmem:[#allocation26_spill] sm:$0xff] }
 0x13a   :  { %9592 = vst [vmem:[#allocation37_spill] sm:$0xff] %v8371_v13  ;;  %9593 = vst [vmem:[#allocation38_spill] sm:$0xff] %v8374_v59  ;;  %v3352_v49 = vand.u32 4294901760, %v171_v54  ;;  %v740_v26 = vadd.f32 %v4434_v5, %v8200_v18  ;;  %5931 = vmatprep.subr.bf16.mxu1 %v9543_v57  ;;  %v8389_v62 = vpack.c.bf16 %v3301_v11, %v3298_v21  ;;  %v155_v18 = vld [vmem:[%s8884_s0 + $0x360] sm:$0xff]  ;;  %v156_v57 = vld [vmem:[%s8884_s0 + $0x368] sm:$0xff]  ;;  %v4474_v21 = vpop.f32.mrb[11].mxu1 }
 0x13b   :  { %v3477_v55 = vsub.f32 %v8275_v63, %v9594_v29  ;;  %v8391_v16 = vsub.f32 %v154_v37, %v3301_v11  ;;  %v3355_v29 = vand.u32 4294901760, %v172_v3  ;;  %v8393_v22 = vadd.f32 %v4472_v44, %v722_v56  ;;  %v9596_v63 = vld [vmem:[#allocation12_spill] sm:$0xff]  ;;  %v4476_v5 = vpop.f32.mrb[12].mxu1 }
 0x13c   :  { %9595 = vst [vmem:[#allocation39_spill] sm:$0xff] %v8389_v62  ;;  %3116 = vmatmul.mubr.f32.vlgmr.msra.gmra.mrb[64].mxu0 %v9596_v63  ;;  %v8396_v32 = vpack.c.bf16 %v3590_v47, %v3583_v61  ;;  %v8406_v37 = vsub.f32 %v22_v1, %v8371_v13  ;;  %v4437_v56 = vadd.f32 %v4436_v4, %v4435_v25  ;;  %v9598_v11 = vld [vmem:[#allocation20_spill] sm:$0xff]  ;;  %v3471_v61 = vand.u32 4294901760, %v3470_v52  ;;  %v8423_v4 = vld [vmem:[%s8884_s0 + $0x3f0] sm:$0xff] }
 0x13d   :  { %5941 = vmatpush3.bf16.msra.mxu0 %v8119_v42  ;;  %3121 = vmatprep.mubr.f32.mxu0 %v9598_v11  ;;  %v3478_v47 = vand.u32 4294901760, %v3477_v55  ;;  %v4475_v44 = vadd.f32 %v4474_v21, %v4473_v9  ;;  %v8413_v19 = vsub.f32 %v171_v54, %v3352_v49  ;;  %v9601_v1 = vand.u32 4294901760, %v8299_v8  ;;  %v9602_v55 = vld [vmem:[#allocation21_spill] sm:$0xff] }
 0x13e   :  { %9597 = vst [vmem:[#allocation12_spill] sm:$0xff] %v8406_v37  ;;  %5933 = vmatpush3.bf16.msra.mxu1 %v9599_v39  ;;  %5943 = vmatprep.subr.bf16.mxu0 %v9600_v30  ;;  %v749_v52 = vadd.f32 %v4437_v56, %v8241_v48  ;;  %v3304_v9 = vand.u32 4294901760, %v155_v18  ;;  %v3307_v39 = vand.u32 4294901760, %v156_v57  ;;  %v9603_v30 = vld [vmem:[#allocation30_spill] sm:$0xff]  ;;  %v4477_v48 = vpop.f32.mrb[13].mxu1  ;;  %v9606_v56 = vld [vmem:[#allocation17_spill] sm:$0xff] }
 0x13f   :  { %v8418_v25 = vsub.f32 %v8299_v8, %v9601_v1  ;;  %5935 = vmatprep.subr.bf16.mxu1 %v9602_v55  ;;  %v8428_v54 = vadd.f32 %v4475_v44, %v731_v46  ;;  %v8431_v1 = vpack.c.bf16 %v3355_v29, %v3352_v49  ;;  %v9605_v8 = vand.u32 4294901760, %v8314_v60  ;;  %v9607_v55 = vld [vmem:[#allocation31_spill] sm:$0xff] }
 0x140   :  { %3123 = vmatmul.mubr.f32.gmra.mrb[66].mxu0 %v9603_v30  ;;  %v8439_v20 = vpack.c.bf16 %v3478_v47, %v3471_v61  ;;  %v8441_v46 = vsub.f32 %v172_v3, %v3355_v29  ;;  %v9608_v44 = vand.u32 4294901760, %v8334_v7  ;;  %v3358_v21 = vand.u32 4294901760, %v8423_v4  ;;  %v174_v61 = vld [vmem:[%s8884_s0 + $0x3f8] sm:$0xff]  ;;  %v4479_v3 = vpop.f32.mrb[14].mxu1 }
 0x141   :  { %9604 = vst [vmem:[#allocation20_spill] sm:$0xff] %v8431_v1  ;;  %v3603_v42 = vsub.f32 %v8314_v60, %v9605_v8  ;;  %5945 = vmatpush3.bf16.msra.mxu0 %v9606_v56  ;;  %3128 = vmatprep.mubr.f32.mxu0 %v9607_v55  ;;  %v4478_v43 = vadd.f32 %v4477_v48, %v4476_v5  ;;  %v9609_v8 = vld [vmem:[#allocation19_spill] sm:$0xff]  ;;  %v3597_v56 = vand.u32 4294901760, %v8418_v25  ;;  %v9612_v5 = vand.u32 4294901760, %v8355_v15  ;;  %v9613_v29 = vld [vmem:[#allocation34_spill] sm:$0xff] }
 0x142   :  { %v8446_v49 = vsub.f32 %v8334_v7, %v9608_v44  ;;  %5937 = vmatpush3.bf16.msra.mxu1 %v9609_v8  ;;  %5947 = vmatprep.subr.bf16.mxu0 %v9610_v51  ;;  %v8458_v47 = vpack.c.bf16 %v3307_v39, %v3304_v9  ;;  %v21_v8 = vld [vmem:[%s8885_s2 + $0x30] sm:$0xff]  ;;  %v8471_v7 = vsub.f32 %v155_v18, %v3304_v9  ;;  %v9614_v44 = vand.u32 4294901760, %v8406_v37  ;;  %v158_v9 = vld [vmem:[%s8884_s0 + $0x378] sm:$0xff] }
 0x143   :  { %5971 = vmatprep.subr.bf16.mxu1 %v8258_v23  ;;  %v3491_v48 = vsub.f32 %v8355_v15, %v9612_v5  ;;  %v8468_v51 = vadd.f32 %v4478_v43, %v740_v26  ;;  %v3604_v23 = vand.u32 4294901760, %v3603_v42  ;;  %v157_v5 = vld [vmem:[%s8884_s0 + $0x370] sm:$0xff]  ;;  %v4480_v15 = vpop.f32.mrb[15].mxu1  ;;  %v8481_v43 = vsub.f32 %v156_v57, %v3307_v39 }
 0x144   :  { %9611 = vst [vmem:[#allocation26_spill] sm:$0xff] %v8458_v47  ;;  %3130 = vmatmul.mubr.f32.gmra.mrb[68].mxu0 %v9613_v29  ;;  %v3366_v25 = vsub.f32 %v8406_v37, %v9614_v44  ;;  %v3485_v26 = vand.u32 4294901760, %v8446_v49  ;;  %v3361_v42 = vand.u32 4294901760, %v174_v61  ;;  %v8485_v18 = vsub.f32 %v8423_v4, %v3358_v21  ;;  %v9615_v44 = vld [vmem:[#allocation35_spill] sm:$0xff]  ;;  %v30_v4 = vld [vmem:[%s8885_s2 + $0x78] sm:$0xff] }
 0x145   :  { %3241 = vmatmul.mubr.f32.vlgmr.msra.gmra.mrb[64].mxu1 %v9596_v63  ;;  %5949 = vmatpush3.bf16.msra.mxu0 %v8194_v27  ;;  %v4481_v60 = vadd.f32 %v4480_v15, %v4479_v3  ;;  %v9616_v63 = vand.u32 4294901760, %v8361_v58  ;;  %v9617_v39 = vand.u32 4294901760, %v8366_v17  ;;  %v8498_v27 = vand.u32 4294901760, %v21_v8 }
 0x146   :  { %5973 = vmatpush3.bf16.msra.mxu1 %v8260_v50  ;;  %3135 = vmatprep.mubr.f32.mxu0 %v9615_v44  ;;  %v3492_v50 = vand.u32 4294901760, %v3491_v48  ;;  %v3310_v15 = vand.u32 4294901760, %v157_v5  ;;  %v9619_v3 = vand.u32 4294901760, %v8374_v59  ;;  %v9620_v37 = vand.u32 4294901760, %v8391_v16 }
 0x147   :  { %v3610_v57 = vsub.f32 %v8361_v58, %v9616_v63  ;;  %v3617_v49 = vsub.f32 %v8366_v17, %v9617_v39  ;;  %9618 = vst [vmem:[#allocation21_spill] sm:$0xff] %v8498_v27  ;;  %3246 = vmatprep.mubr.f32.mxu1 %v9598_v11  ;;  %5951 = vmatprep.subr.bf16.mxu0 %v8236_v34  ;;  %v9621_v58 = vld [vmem:[#allocation36_spill] sm:$0xff]  ;;  %v3313_v6 = vand.u32 4294901760, %v158_v9  ;;  %v3367_v11 = vand.u32 4294901760, %v3366_v25 }
 0x148   :  { %v3498_v63 = vsub.f32 %v8374_v59, %v9619_v3  ;;  %v3505_v39 = vsub.f32 %v8391_v16, %v9620_v37  ;;  %v8511_v17 = vadd.f32 %v4481_v60, %v749_v52  ;;  %3137 = vmatmul.mubr.f32.gmra.mrb[70].mxu0 %v9621_v58  ;;  %5975 = vmatprep.subr.bf16.mxu1 %v8296_v24  ;;  %v9191_v34 = vand.u32 4294901760, %v8413_v19  ;;  %v29_v24 = vld [vmem:[%s8885_s2 + $0x70] sm:$0xff] }
 0x149   :  { %3248 = vmatmul.mubr.f32.gmra.mrb[66].mxu1 %v9603_v30  ;;  %5953 = vmatpush3.bf16.msra.mxu0 %v8271_v53  ;;  %v8518_v48 = vpack.c.bf16 %v3604_v23, %v3597_v56  ;;  %v8520_v3 = vpack.c.bf16 %v3361_v42, %v3358_v21  ;;  %v8522_v59 = vsub.f32 %v174_v61, %v3361_v42  ;;  %v8524_v60 = vand.u32 4294901760, %v30_v4  ;;  %v38_v56 = vld [vmem:[%s8885_s2 + $0xb8] sm:$0xff] }
 0x14a   :  { %5977 = vmatpush3.bf16.msra.mxu1 %v8330_v10  ;;  %3253 = vmatprep.mubr.f32.mxu1 %v9607_v55  ;;  %v3611_v37 = vand.u32 4294901760, %v3610_v57  ;;  %v3618_v30 = vand.u32 4294901760, %v3617_v49  ;;  %v8532_v52 = vsub.f32 %v21_v8, %v8498_v27  ;;  %v9190_v21 = vand.u32 4294901760, %v8441_v46 }
 0x14b   :  { %9622 = vst [vmem:[#allocation30_spill] sm:$0xff] %v8520_v3  ;;  %9623 = vst [vmem:[#allocation31_spill] sm:$0xff] %v8524_v60  ;;  %5955 = vmatprep.subr.bf16.mxu0 %v8312_v45  ;;  %5979 = vmatprep.subr.bf16.mxu1 %v8353_v12  ;;  %v8540_v61 = vpack.c.bf16 %v3492_v50, %v3485_v26  ;;  %v8542_v10 = vsub.f32 %v157_v5, %v3310_v15  ;;  %v3499_v55 = vand.u32 4294901760, %v3498_v63  ;;  %v37_v50 = vld [vmem:[%s8885_s2 + $0xb0] sm:$0xff]  ;;  %v4514_v63 = vpop.f32.mrb[16].mxu0 }
 0x14c   :  { %9624 = vst [vmem:[#allocation19_spill] sm:$0xff] %v8532_v52  ;;  %v3506_v25 = vand.u32 4294901760, %v3505_v39  ;;  %v8544_v23 = vpack.c.bf16 %v3313_v6, %v3310_v15  ;;  %3368 = vmatprep.mubr.f32.mxu0 %v3367_v11  ;;  %v8549_v8 = vsub.f32 %v8413_v19, %v9191_v34  ;;  %v9193_v42 = vand.u32 4294901760, %v8471_v7 }
 0x14d   :  { %v8552_v57 = vand.u32 4294901760, %v29_v24  ;;  %3255 = vmatmul.mubr.f32.gmra.mrb[68].mxu1 %v9613_v29  ;;  %5957 = vmatpush3.bf16.msra.mxu0 %v8332_v35  ;;  %v8556_v12 = vsub.f32 %v158_v9, %v3313_v6  ;;  %v9192_v5 = vand.u32 4294901760, %v8481_v43  ;;  %v8560_v26 = vsub.f32 %v30_v4, %v8524_v60  ;;  %v9630_v9 = vld [vmem:[#allocation11_spill] sm:$0xff] }
 0x14e   :  { %9625 = vst [vmem:[#allocation34_spill] sm:$0xff] %v8544_v23  ;;  %v8562_v49 = vand.u32 4294901760, %v38_v56  ;;  %5981 = vmatpush3.bf16.msra.mxu1 %v8384_v2  ;;  %3260 = vmatprep.mubr.f32.mxu1 %v9615_v44  ;;  %v5990_v29 = vpack.c.bf16 %v3618_v30, %v3611_v37  ;;  %v9196_v15 = vand.u32 4294901760, %v8532_v52  ;;  %v3631_v6 = vsub.f32 %v8441_v46, %v9190_v21  ;;  %v9631_v2 = vld [vmem:[#allocation10_spill] sm:$0xff]  ;;  %v4515_v21 = vpop.f32.mrb[17].mxu0 }
 0x14f   :  { %9626 = vst [vmem:[#allocation35_spill] sm:$0xff] %v8552_v57  ;;  %9627 = vst [vmem:[#allocation36_spill] sm:$0xff] %v8556_v12  ;;  %5959 = vmatprep.subr.bf16.mxu0 %v8359_v40  ;;  %5983 = vmatprep.subr.bf16.mxu1 %v8396_v32  ;;  %v8577_v39 = vpack.c.bf16 %v3506_v25, %v3499_v55  ;;  %v9199_v11 = vand.u32 4294901760, %v8485_v18  ;;  %v46_v30 = vld [vmem:[%s8885_s2 + $0xf8] sm:$0xff]  ;;  %v3625_v34 = vand.u32 4294901760, %v8549_v8  ;;  %v8593_v25 = vand.u32 4294901760, %v37_v50 }
 0x150   :  { %9628 = vst [vmem:[#allocation40_spill] sm:$0xff] %v8560_v26  ;;  %9629 = vst [vmem:[#allocation41_spill] sm:$0xff] %v8562_v49  ;;  %v3512_v32 = vsub.f32 %v8471_v7, %v9193_v42  ;;  %v8591_v55 = vsub.f32 %v29_v24, %v8552_v57  ;;  %v4516_v44 = vadd.f32 %v4515_v21, %v4514_v63  ;;  %v45_v24 = vld [vmem:[%s8885_s2 + $0xf0] sm:$0xff]  ;;  %v4517_v42 = vpop.f32.mrb[18].mxu0  ;;  %v3632_v8 = vand.u32 4294901760, %v3631_v6  ;;  %v9640_v40 = vld [vmem:[#allocation7_spill] sm:$0xff] }
 0x151   :  { %9632 = vst [vmem:[#allocation11_spill] sm:$0xff] %v8593_v25  ;;  %3262 = vmatmul.mubr.f32.gmra.mrb[70].mxu1 %v9621_v58  ;;  %5961 = vmatpush3.bf16.msra.mxu0 %v8389_v62  ;;  %v3519_v4 = vsub.f32 %v8481_v43, %v9192_v5  ;;  %v8602_v37 = vsub.f32 %v38_v56, %v8562_v49  ;;  %v8614_v5 = vand.u32 4294901760, %v46_v30  ;;  %v4518_v21 = vpop.f32.mrb[19].mxu0 }
 0x152   :  { %5985 = vmatpush3.bf16.msra.mxu1 %v8439_v20  ;;  %5963 = vmatprep.subr.bf16.mxu0 %v8431_v1  ;;  %v3372_v58 = vsub.f32 %v8532_v52, %v9196_v15  ;;  %v1058_v56 = vadd.f32 %v4516_v44, %v8393_v22  ;;  %v3638_v20 = vsub.f32 %v8485_v18, %v9199_v11  ;;  %v9634_v1 = vand.u32 4294901760, %v8522_v59 }
 0x153   :  { %9633 = vst [vmem:[#allocation10_spill] sm:$0xff] %v8614_v5  ;;  %5987 = vmatprep.subr.bf16.mxu1 %v8518_v48  ;;  %3649 = vmatprep.mubr.f32.mxu1 %v8371_v13  ;;  %v3513_v63 = vand.u32 4294901760, %v3512_v32  ;;  %v8627_v22 = vsub.f32 %v37_v50, %v8593_v25  ;;  %v8629_v44 = vand.u32 4294901760, %v45_v24  ;;  %v4519_v48 = vadd.f32 %v4518_v21, %v4517_v42  ;;  %v4520_v13 = vpop.f32.mrb[20].mxu0 }
 0x154   :  { %v3645_v15 = vsub.f32 %v8522_v59, %v9634_v1  ;;  %v3520_v6 = vand.u32 4294901760, %v3519_v4  ;;  %v9636_v11 = vand.u32 4294901760, %v8560_v26  ;;  %v3373_v32 = vand.u32 4294901760, %v3372_v58  ;;  %v4521_v58 = vpop.f32.mrb[21].mxu0 }
 0x155   :  { %9635 = vst [vmem:[#allocation42_spill] sm:$0xff] %v8629_v44  ;;  %5965 = vmatpush3.bf16.msra.mxu0 %v8458_v47  ;;  %v9637_v50 = vand.u32 4294901760, %v8542_v10  ;;  %v9638_v42 = vand.u32 4294901760, %v8556_v12  ;;  %v8645_v4 = vsub.f32 %v46_v30, %v8614_v5  ;;  %v5994_v1 = vpack.c.bf16 %v3632_v8, %v3625_v34 }
 0x156   :  { %v3381_v62 = vsub.f32 %v8560_v26, %v9636_v11  ;;  %5989 = vmatpush3.bf16.msra.mxu1 %v8540_v61  ;;  %5967 = vmatprep.subr.bf16.mxu0 %v8520_v3  ;;  %v1065_v11 = vadd.f32 %v4519_v48, %v8428_v54  ;;  %v3639_v61 = vand.u32 4294901760, %v3638_v20  ;;  %v3646_v47 = vand.u32 4294901760, %v3645_v15  ;;  %v4558_v3 = vpop.f32.mrb[16].mxu1 }
 0x157   :  { %v3526_v52 = vsub.f32 %v8542_v10, %v9637_v50  ;;  %v3533_v21 = vsub.f32 %v8556_v12, %v9638_v42  ;;  %5991 = vmatprep.subr.bf16.mxu1 %v5990_v29  ;;  %v9639_v26 = vand.u32 4294901760, %v8591_v55  ;;  %v6006_v35 = vpack.c.bf16 %v9640_v40, %v8124_v31  ;;  %v4559_v48 = vpop.f32.mrb[17].mxu1 }
 0x158   :  { %v8655_v30 = vsub.f32 %v45_v24, %v8629_v44  ;;  %v4522_v54 = vadd.f32 %v4521_v58, %v4520_v13  ;;  %v5996_v34 = vpack.c.bf16 %v3520_v6, %v3513_v63  ;;  %v3382_v29 = vand.u32 4294901760, %v3381_v62  ;;  %v4561_v6 = vpop.f32.mrb[18].mxu1 }
 0x159   :  { %v3387_v50 = vsub.f32 %v8591_v55, %v9639_v26  ;;  %5969 = vmatpush3.bf16.msra.mxu0 %v8544_v23  ;;  %v9641_v15 = vand.u32 4294901760, %v8602_v37  ;;  %v4560_v20 = vadd.f32 %v4559_v48, %v4558_v3  ;;  %v9642_v26 = vpack.c.bf16 %v8112_v38, %v9630_v9  ;;  %v4523_v23 = vpop.f32.mrb[22].mxu0 }
 0x15a   :  { %5993 = vmatpush3.bf16.msra.mxu1 %v8577_v39  ;;  %v3527_v42 = vand.u32 4294901760, %v3526_v52  ;;  %v3534_v24 = vand.u32 4294901760, %v3533_v21  ;;  %v9217_v13 = vand.u32 4294901760, %v8645_v4  ;;  %v1072_v58 = vadd.f32 %v4522_v54, %v8468_v51 }
 0x15b   :  { %v3396_v8 = vsub.f32 %v8602_v37, %v9641_v15  ;;  %6003 = vmatprep.subr.bf16.mxu0 %v9642_v26  ;;  %5995 = vmatprep.subr.bf16.mxu1 %v5994_v1  ;;  %v5998_v62 = vpack.c.bf16 %v3646_v47, %v3639_v61  ;;  %v8667_v63 = vadd.f32 %v4560_v20, %v1058_v56  ;;  %v4524_v15 = vpop.f32.mrb[23].mxu0  ;;  %v3388_v3 = vand.u32 4294901760, %v3387_v50  ;;  %v4562_v26 = vpop.f32.mrb[19].mxu1 }
 0x15c   :  { %3374 = vmatmul.mubr.f32.vlgmr.msra.gmra.mrb[72].mxu0 %v3373_v32  ;;  %v9643_v39 = vand.u32 4294901760, %v8627_v22  ;;  %v9216_v52 = vand.u32 4294901760, %v8655_v30  ;;  %v4525_v21 = vadd.f32 %v4524_v15, %v4523_v23  ;;  %v9644_v51 = vpack.c.bf16 %v9631_v2, %v8114_v36 }
 0x15d   :  { %3383 = vmatprep.mubr.f32.mxu0 %v3382_v29  ;;  %v6008_v47 = vpack.c.bf16 %v8143_v28, %v8141_v33  ;;  %v3397_v56 = vand.u32 4294901760, %v3396_v8  ;;  %v6010_v1 = vpack.c.bf16 %v8177_v0, %v8158_v41  ;;  %v4563_v32 = vadd.f32 %v4562_v26, %v4561_v6  ;;  %v4564_v29 = vpop.f32.mrb[20].mxu1  ;;  %v9649_v26 = vld [vmem:[#allocation32_spill] sm:$0xff] }
 0x15e   :  { %v3402_v48 = vsub.f32 %v8627_v22, %v9643_v39  ;;  %6005 = vmatpush3.bf16.msra.mxu0 %v9644_v51  ;;  %5997 = vmatpush3.bf16.msra.mxu1 %v5996_v34  ;;  %v6000_v61 = vpack.c.bf16 %v3534_v24, %v3527_v42  ;;  %v3411_v23 = vsub.f32 %v8645_v4, %v9217_v13  ;;  %v4565_v6 = vpop.f32.mrb[21].mxu1  ;;  %v9646_v24 = vld [vmem:[#allocation9_spill] sm:$0xff]  ;;  %v9650_v51 = vld [vmem:[#allocation28_spill] sm:$0xff] }
 0x15f   :  { %6007 = vmatprep.subr.bf16.mxu0 %v6006_v35  ;;  %v1079_v50 = vadd.f32 %v4525_v21, %v8511_v17  ;;  %5999 = vmatprep.subr.bf16.mxu1 %v5998_v62  ;;  %v8684_v54 = vadd.f32 %v4563_v32, %v1065_v11  ;;  %v3417_v8 = vsub.f32 %v8655_v30, %v9216_v52  ;;  %v9645_v35 = vld [vmem:[#allocation15_spill] sm:$0xff]  ;;  %v9647_v11 = vld [vmem:[#allocation16_spill] sm:$0xff]  ;;  %v9648_v62 = vld [vmem:[#allocation18_spill] sm:$0xff]  ;;  %v4567_v39 = vpop.f32.mrb[22].mxu1 }
 0x160   :  { %3389 = vmatmul.mubr.f32.gmra.mrb[74].mxu0 %v3388_v3  ;;  %v3403_v20 = vand.u32 4294901760, %v3402_v48  ;;  %v6012_v42 = vpack.c.bf16 %v9645_v35, %v8203_v14  ;;  %v4566_v34 = vadd.f32 %v4565_v6, %v4564_v29  ;;  %v3412_v17 = vand.u32 4294901760, %v3411_v23  ;;  %v4568_v21 = vpop.f32.mrb[23].mxu1  ;;  %v9652_v32 = vld [vmem:[#allocation29_spill] sm:$0xff]  ;;  %v9654_v29 = vld [vmem:[#allocation22_spill] sm:$0xff] }
 0x161   :  { %3398 = vmatprep.mubr.f32.mxu0 %v3397_v56  ;;  %v6014_v15 = vpack.c.bf16 %v9648_v62, %v9647_v11  ;;  %v3418_v48 = vand.u32 4294901760, %v3417_v8  ;;  %v4569_v56 = vadd.f32 %v4568_v21, %v4567_v39  ;;  %v9656_v8 = vld [vmem:[#allocation33_spill] sm:$0xff]  ;;  %v9661_v39 = vld [vmem:[#allocation12_spill] sm:$0xff]  ;;  %v9664_v52 = vld [vmem:[#allocation6_spill] sm:$0xff] }
 0x162   :  { %6009 = vmatpush3.bf16.msra.mxu0 %v6008_v47  ;;  %6001 = vmatpush3.bf16.msra.mxu1 %v6000_v61  ;;  %v8694_v3 = vadd.f32 %v4566_v34, %v1072_v58  ;;  %v6016_v47 = vpack.c.bf16 %v9650_v51, %v9649_v26  ;;  %v9653_v58 = vld [vmem:[#allocation3_spill] sm:$0xff]  ;;  %v9658_v34 = vld [vmem:[#allocation24_spill] sm:$0xff] }
 0x163   :  { %6011 = vmatprep.subr.bf16.mxu0 %v6010_v1  ;;  %6035 = vmatprep.subr.bf16.mxu1 %v9646_v24  ;;  %v9651_v1 = vld [vmem:[#allocation14_spill] sm:$0xff]  ;;  %v6018_v61 = vpack.c.bf16 %v9653_v58, %v9652_v32  ;;  %v8703_v23 = vadd.f32 %v4569_v56, %v1079_v50  ;;  %v6026_v56 = vpack.c.bf16 %v8441_v46, %v8413_v19 }
 0x164   :  { %3404 = vmatmul.mubr.f32.gmra.mrb[76].mxu0 %v3403_v20  ;;  %v9655_v20 = vld [vmem:[#allocation27_spill] sm:$0xff] }
 0x165   :  { %3651 = vmatmul.mubr.f32.vlgmr.msra.gmra.mrb[72].mxu1 %v8498_v27  ;;  %3413 = vmatprep.mubr.f32.mxu0 %v3412_v17  ;;  %v6020_v6 = vpack.c.bf16 %v9656_v8, %v9655_v20  ;;  %v9659_v17 = vld [vmem:[#allocation13_spill] sm:$0xff] }
 0x166   :  { %6013 = vmatpush3.bf16.msra.mxu0 %v6012_v42  ;;  %6037 = vmatpush3.bf16.msra.mxu1 %v9651_v1  ;;  %v9657_v42 = vld [vmem:[#allocation17_spill] sm:$0xff] }
 0x167   :  { %3656 = vmatprep.mubr.f32.mxu1 %v8524_v60  ;;  %6015 = vmatprep.subr.bf16.mxu0 %v6014_v15  ;;  %v9660_v15 = vld [vmem:[#allocation5_spill] sm:$0xff]  ;;  %v9668_v60 = vand.u32 4294901760, %v8112_v38  ;;  %v9673_v38 = vand.u32 4294901760, %v8124_v31  ;;  %v9678_v31 = vand.u32 4294901760, %v8141_v33 }
 0x168   :  { %3419 = vmatmul.mubr.f32.gmra.mrb[78].mxu0 %v3418_v48  ;;  %6039 = vmatprep.subr.bf16.mxu1 %v9654_v29  ;;  %v6022_v50 = vpack.c.bf16 %v9660_v15, %v9659_v17  ;;  %v9662_v48 = vld [vmem:[#allocation38_spill] sm:$0xff] }
 0x169   :  { %3658 = vmatmul.mubr.f32.gmra.mrb[74].mxu1 %v8552_v57  ;;  %3807 = vmatprep.mubr.f32.mxu0 %v9661_v39  ;;  %v6024_v21 = vpack.c.bf16 %v8391_v16, %v9662_v48 }
 0x16a   :  { %6017 = vmatpush3.bf16.msra.mxu0 %v6016_v47  ;;  %6041 = vmatpush3.bf16.msra.mxu1 %v9657_v42  ;;  %v9663_v47 = vld [vmem:[#allocation8_spill] sm:$0xff] }
 0x16b   :  { %3663 = vmatprep.mubr.f32.mxu1 %v8562_v49  ;;  %6019 = vmatprep.subr.bf16.mxu0 %v6018_v61  ;;  %v4602_v61 = vpop.f32.mrb[24].mxu0 }
 0x16c   :  { %6043 = vmatprep.subr.bf16.mxu1 %v9658_v34  ;;  %v4603_v13 = vpop.f32.mrb[25].mxu0 }
 0x16d   :  { %3665 = vmatmul.mubr.f32.gmra.mrb[76].mxu1 %v8593_v25  ;;  %v4604_v49 = vadd.f32 %v4603_v13, %v4602_v61 }
 0x16e   :  { %6021 = vmatpush3.bf16.msra.mxu0 %v6020_v6  ;;  %6045 = vmatpush3.bf16.msra.mxu1 %v9663_v47  ;;  %v6028_v6 = vpack.c.bf16 %v8481_v43, %v8471_v7  ;;  %v4605_v57 = vpop.f32.mrb[26].mxu0 }
 0x16f   :  { %3670 = vmatprep.mubr.f32.mxu1 %v8614_v5  ;;  %6023 = vmatprep.subr.bf16.mxu0 %v6022_v50  ;;  %v6030_v5 = vpack.c.bf16 %v8522_v59, %v8485_v18  ;;  %v1316_v25 = vadd.f32 %v4604_v49, %v8667_v63  ;;  %v9665_v50 = vand.u32 4294901760, %v9661_v39  ;;  %v4606_v13 = vpop.f32.mrb[27].mxu0 }
 0x170   :  { %6047 = vmatprep.subr.bf16.mxu1 %v9664_v52  ;;  %v4607_v61 = vadd.f32 %v4606_v13, %v4605_v57  ;;  %v9670_v13 = vand.u32 4294901760, %v8114_v36 }
 0x171   :  { %3672 = vmatmul.mubr.f32.gmra.mrb[78].mxu1 %v8629_v44  ;;  %v9666_v44 = vld [vmem:[#allocation23_spill] sm:$0xff] }
 0x172   :  { %6025 = vmatpush3.bf16.msra.mxu0 %v6024_v21  ;;  %6049 = vmatpush3.bf16.msra.mxu1 %v8271_v53  ;;  %v6032_v21 = vpack.c.bf16 %v8556_v12, %v8542_v10  ;;  %v1331_v63 = vadd.f32 %v4607_v61, %v8684_v54  ;;  %v4608_v27 = vpop.f32.mrb[28].mxu0 }
 0x173   :  { %6027 = vmatprep.subr.bf16.mxu0 %v6026_v56  ;;  %6051 = vmatprep.subr.bf16.mxu1 %v8312_v45  ;;  %v9667_v56 = vand.u32 4294901760, %v9630_v9  ;;  %v9669_v45 = vld [vmem:[#allocation25_spill] sm:$0xff]  ;;  %v4646_v39 = vpop.f32.mrb[24].mxu1  ;;  %v9672_v9 = vld [vmem:[#allocation39_spill] sm:$0xff] }
 0x174   :  { %3941 = vmatprep.mubr.f32.mxu1 %v9665_v50  ;;  %v4609_v50 = vpop.f32.mrb[29].mxu0 }
 0x175   :  { %v6066_v49 = vpack.c.bf16 %v9668_v60, %v9667_v56  ;;  %v4610_v57 = vadd.f32 %v4609_v50, %v4608_v27  ;;  %v9674_v60 = vand.u32 4294901760, %v9640_v40  ;;  %v9675_v27 = vld [vmem:[#allocation20_spill] sm:$0xff]  ;;  %v9679_v40 = vand.u32 4294901760, %v8143_v28 }
 0x176   :  { %6029 = vmatpush3.bf16.msra.mxu0 %v6028_v6  ;;  %6053 = vmatpush3.bf16.msra.mxu1 %v9666_v44  ;;  %v4647_v6 = vpop.f32.mrb[25].mxu1  ;;  %v9671_v44 = vand.u32 4294901760, %v9631_v2  ;;  %v4611_v56 = vpop.f32.mrb[30].mxu0  ;;  %v9676_v2 = vld [vmem:[#allocation19_spill] sm:$0xff]  ;;  %v9684_v28 = vand.u32 4294901760, %v8203_v14 }
 0x177   :  { %6031 = vmatprep.subr.bf16.mxu0 %v6030_v5  ;;  %6055 = vmatprep.subr.bf16.mxu1 %v9669_v45  ;;  %v4648_v12 = vadd.f32 %v4647_v6, %v4646_v39  ;;  %v6070_v54 = vpack.c.bf16 %v9674_v60, %v9673_v38  ;;  %v1346_v61 = vadd.f32 %v4610_v57, %v8694_v3  ;;  %v4649_v36 = vpop.f32.mrb[26].mxu1  ;;  %v4612_v50 = vpop.f32.mrb[31].mxu0  ;;  %v9680_v57 = vld [vmem:[#allocation26_spill] sm:$0xff]  ;;  %v9689_v14 = vand.u32 4294901760, %v9676_v2 }
 0x178   :  { %v6068_v5 = vpack.c.bf16 %v9671_v44, %v9670_v13  ;;  %v4613_v44 = vadd.f32 %v4612_v50, %v4611_v56  ;;  %v4650_v39 = vpop.f32.mrb[27].mxu1  ;;  %v6072_v6 = vpack.c.bf16 %v9679_v40, %v9678_v31  ;;  %v9683_v60 = vld [vmem:[#allocation30_spill] sm:$0xff]  ;;  %v9691_v40 = vand.u32 4294901760, %v9650_v51 }
 0x179   :  { %v4651_v3 = vadd.f32 %v4650_v39, %v4649_v36  ;;  %v9686_v36 = vld [vmem:[#allocation34_spill] sm:$0xff]  ;;  %v9696_v51 = vand.u32 4294901760, %v9655_v20  ;;  %v9702_v20 = vand.u32 4294901760, %v8627_v22 }
 0x17a   :  { %6033 = vmatpush3.bf16.msra.mxu0 %v6032_v21  ;;  %6057 = vmatpush3.bf16.msra.mxu1 %v9672_v9  ;;  %v8753_v21 = vadd.f32 %v4648_v12, %v1316_v25  ;;  %v9681_v12 = vand.u32 4294901760, %v8158_v41  ;;  %v9682_v25 = vand.u32 4294901760, %v8177_v0  ;;  %v1361_v38 = vadd.f32 %v4613_v44, %v8703_v23 }
 0x17b   :  { %6067 = vmatprep.subr.bf16.mxu0 %v6066_v49  ;;  %6059 = vmatprep.subr.bf16.mxu1 %v9675_v27  ;;  %v9677_v49 = vld [vmem:[#allocation40_spill] sm:$0xff]  ;;  %v4652_v56 = vpop.f32.mrb[28].mxu1  ;;  %v9685_v41 = vand.u32 4294901760, %v9645_v35  ;;  %v9687_v23 = vand.u32 4294901760, %v9647_v11  ;;  %v9690_v35 = vand.u32 4294901760, %v9649_v26  ;;  %v9695_v26 = vand.u32 4294901760, %v8591_v55 }
 0x17c   :  { %v6074_v13 = vpack.c.bf16 %v9682_v25, %v9681_v12  ;;  %v4653_v33 = vpop.f32.mrb[29].mxu1  ;;  %v9692_v11 = vand.u32 4294901760, %v9677_v49  ;;  %v9701_v12 = vld [vmem:[#allocation37_spill] sm:$0xff] }
 0x17d   :  { %3810 = vmatmul.mubr.f32.vlgmr.msra.gmra.mrb[80].mxu0 %v9676_v2  ;;  %v4654_v0 = vadd.f32 %v4653_v33, %v4652_v56 }
 0x17e   :  { %6069 = vmatpush3.bf16.msra.mxu0 %v6068_v5  ;;  %3816 = vmatprep.mubr.f32.mxu0 %v9677_v49  ;;  %v8768_v5 = vadd.f32 %v4651_v3, %v1331_v63  ;;  %v9688_v63 = vand.u32 4294901760, %v9648_v62  ;;  %v9693_v62 = vand.u32 4294901760, %v9652_v32  ;;  %v9698_v32 = vand.u32 4294901760, %v8602_v37 }
 0x17f   :  { %6061 = vmatpush3.bf16.msra.mxu1 %v9680_v57  ;;  %6071 = vmatprep.subr.bf16.mxu0 %v6070_v54  ;;  %v6076_v54 = vpack.c.bf16 %v9685_v41, %v9684_v28  ;;  %v1607_v44 = vadd.f32 %v4654_v0, %v1346_v61  ;;  %v4655_v39 = vpop.f32.mrb[30].mxu1  ;;  %v9694_v61 = vand.u32 4294901760, %v9653_v58  ;;  %v9699_v58 = vand.u32 4294901760, %v9659_v17  ;;  %v9713_v28 = vld [vmem:[#allocation4_spill] sm:$0xff]  ;;  %v9717_v0 = vld [vmem:[#allocation23_spill] sm:$0xff] }
 0x180   :  { %6063 = vmatprep.subr.bf16.mxu1 %v9683_v60  ;;  %v6078_v50 = vpack.c.bf16 %v9688_v63, %v9687_v23  ;;  %v4656_v31 = vpop.f32.mrb[31].mxu1  ;;  %v9706_v17 = vand.u32 4294901760, %v8413_v19  ;;  %v9711_v19 = vand.u32 4294901760, %v8485_v18  ;;  %v9715_v41 = vld [vmem:[#allocation36_spill] sm:$0xff] }
 0x181   :  { %3819 = vmatmul.mubr.f32.gmra.mrb[82].mxu0 %v8591_v55  ;;  %v6082_v2 = vpack.c.bf16 %v9694_v61, %v9693_v62  ;;  %v9720_v61 = vld [vmem:[#allocation35_spill] sm:$0xff] }
 0x182   :  { %6073 = vmatpush3.bf16.msra.mxu0 %v6072_v6  ;;  %3825 = vmatprep.mubr.f32.mxu0 %v8602_v37  ;;  %v6080_v6 = vpack.c.bf16 %v9691_v40, %v9690_v35 }
 0x183   :  { %6065 = vmatpush3.bf16.msra.mxu1 %v9686_v36  ;;  %6075 = vmatprep.subr.bf16.mxu0 %v6074_v13 }
 0x184   :  { %6099 = vmatprep.subr.bf16.mxu1 %v9646_v24  ;;  %v4657_v24 = vadd.f32 %v4656_v31, %v4655_v39 }
 0x185   :  { %3828 = vmatmul.mubr.f32.gmra.mrb[84].mxu0 %v8627_v22 }
 0x186   :  { %3945 = vmatmul.mubr.f32.vlgmr.msra.gmra.mrb[80].mxu1 %v9689_v14  ;;  %6077 = vmatpush3.bf16.msra.mxu0 %v6076_v54  ;;  %v1614_v3 = vadd.f32 %v4657_v24, %v1361_v38 }
 0x187   :  { %6101 = vmatpush3.bf16.msra.mxu1 %v9651_v1  ;;  %3834 = vmatprep.mubr.f32.mxu0 %v8645_v4  ;;  %v9697_v1 = vand.u32 4294901760, %v9656_v8  ;;  %v9703_v8 = vand.u32 4294901760, %v9662_v48  ;;  %v9708_v48 = vand.u32 4294901760, %v8655_v30 }
 0x188   :  { %3952 = vmatprep.mubr.f32.mxu1 %v9692_v11  ;;  %6079 = vmatprep.subr.bf16.mxu0 %v6078_v50 }
 0x189   :  { %3837 = vmatmul.mubr.f32.gmra.mrb[86].mxu0 %v8655_v30  ;;  %6103 = vmatprep.subr.bf16.mxu1 %v9654_v29  ;;  %v6084_v49 = vpack.c.bf16 %v9697_v1, %v9696_v51  ;;  %v9700_v29 = vand.u32 4294901760, %v9660_v15  ;;  %v9707_v15 = vand.u32 4294901760, %v8441_v46  ;;  %v9712_v46 = vand.u32 4294901760, %v8522_v59 }
 0x18a   :  { %3956 = vmatmul.mubr.f32.gmra.mrb[82].mxu1 %v9695_v26  ;;  %6081 = vmatpush3.bf16.msra.mxu0 %v6080_v6  ;;  %v4690_v13 = vpop.f32.mrb[32].mxu0  ;;  %v9718_v6 = vld [vmem:[#allocation21_spill] sm:$0xff] }
 0x18b   :  { %6105 = vmatpush3.bf16.msra.mxu1 %v9657_v42  ;;  %3963 = vmatprep.mubr.f32.mxu1 %v9698_v32  ;;  %v6086_v55 = vpack.c.bf16 %v9700_v29, %v9699_v58  ;;  %v9704_v42 = vand.u32 4294901760, %v8391_v16  ;;  %v6090_v25 = vpack.c.bf16 %v9707_v15, %v9706_v17  ;;  %v4691_v22 = vpop.f32.mrb[33].mxu0  ;;  %v9709_v16 = vand.u32 4294901760, %v8471_v7  ;;  %v9724_v58 = vld [vmem:[#allocation42_spill] sm:$0xff] }
 0x18c   :  { %6083 = vmatprep.subr.bf16.mxu0 %v6082_v2  ;;  %6107 = vmatprep.subr.bf16.mxu1 %v9658_v34  ;;  %v9705_v34 = vand.u32 4294901760, %v8645_v4  ;;  %v4692_v38 = vadd.f32 %v4691_v22, %v4690_v13  ;;  %v9710_v4 = vand.u32 4294901760, %v8481_v43  ;;  %v6094_v56 = vpack.c.bf16 %v9712_v46, %v9711_v19  ;;  %v9721_v2 = vld [vmem:[#allocation41_spill] sm:$0xff] }
 0x18d   :  { %4144 = vmatprep.mubr.f32.mxu0 %v9701_v12  ;;  %v6088_v37 = vpack.c.bf16 %v9704_v42, %v9703_v8  ;;  %v9714_v43 = vand.u32 4294901760, %v8542_v10 }
 0x18e   :  { %3967 = vmatmul.mubr.f32.gmra.mrb[84].mxu1 %v9702_v20  ;;  %6085 = vmatpush3.bf16.msra.mxu0 %v6084_v49  ;;  %v4693_v33 = vpop.f32.mrb[34].mxu0  ;;  %v9722_v49 = vld [vmem:[#allocation11_spill] sm:$0xff] }
 0x18f   :  { %6109 = vmatpush3.bf16.msra.mxu1 %v9663_v47  ;;  %3974 = vmatprep.mubr.f32.mxu1 %v9705_v34  ;;  %v6092_v47 = vpack.c.bf16 %v9710_v4, %v9709_v16  ;;  %v4694_v30 = vpop.f32.mrb[35].mxu0 }
 0x190   :  { %6087 = vmatprep.subr.bf16.mxu0 %v6086_v55  ;;  %6111 = vmatprep.subr.bf16.mxu1 %v9664_v52  ;;  %v1752_v52 = vadd.f32 %v4692_v38, %v8753_v21  ;;  %v4695_v7 = vadd.f32 %v4694_v30, %v4693_v33 }
 0x192   :  { %3978 = vmatmul.mubr.f32.gmra.mrb[86].mxu1 %v9708_v48  ;;  %6089 = vmatpush3.bf16.msra.mxu0 %v6088_v37  ;;  %v1761_v59 = vadd.f32 %v4695_v7, %v8768_v5  ;;  %v4696_v18 = vpop.f32.mrb[36].mxu0 }
 0x193   :  { %6113 = vmatpush3.bf16.msra.mxu1 %v8271_v53  ;;  %6091 = vmatprep.subr.bf16.mxu0 %v6090_v25  ;;  %v9716_v53 = vand.u32 4294901760, %v9715_v41  ;;  %v4734_v21 = vpop.f32.mrb[32].mxu1  ;;  %v4697_v23 = vpop.f32.mrb[37].mxu0 }
 0x194   :  { %6115 = vmatprep.subr.bf16.mxu1 %v9713_v28  ;;  %4269 = vmatprep.mubr.f32.mxu1 %v9701_v12  ;;  %v4698_v63 = vadd.f32 %v4697_v23, %v4696_v18  ;;  %v4735_v50 = vpop.f32.mrb[33].mxu1 }
 0x195   :  { %v6096_v54 = vpack.c.bf16 %v9716_v53, %v9714_v43  ;;  %v4736_v39 = vadd.f32 %v4735_v50, %v4734_v21 }
 0x196   :  { %6093 = vmatpush3.bf16.msra.mxu0 %v6092_v47  ;;  %v1770_v10 = vadd.f32 %v4698_v63, %v1607_v44  ;;  %v4699_v31 = vpop.f32.mrb[38].mxu0 }
 0x197   :  { %6117 = vmatpush3.bf16.msra.mxu1 %v9717_v0  ;;  %6095 = vmatprep.subr.bf16.mxu0 %v6094_v56  ;;  %v1887_v14 = vadd.f32 %v4736_v39, %v1752_v52  ;;  %v4700_v40 = vpop.f32.mrb[39].mxu0 }
 0x198   :  { %6119 = vmatprep.subr.bf16.mxu1 %v9669_v45  ;;  %v4701_v5 = vadd.f32 %v4700_v40, %v4699_v31  ;;  %v9719_v45 = vld [vmem:[#allocation31_spill] sm:$0xff] }
 0x199   :  { %v4737_v35 = vpop.f32.mrb[34].mxu1 }
 0x19a   :  { %6097 = vmatpush3.bf16.msra.mxu0 %v6096_v54  ;;  %v4738_v24 = vpop.f32.mrb[35].mxu1  ;;  %v1779_v62 = vadd.f32 %v4701_v5, %v1614_v3 }
 0x19b   :  { %6121 = vmatpush3.bf16.msra.mxu1 %v9672_v9  ;;  %v4739_v11 = vadd.f32 %v4738_v24, %v4737_v35 }
 0x19c   :  { %6123 = vmatprep.subr.bf16.mxu1 %v9675_v27 }
 0x19d   :  { %4146 = vmatmul.mubr.f32.vlgmr.msra.gmra.mrb[88].mxu0 %v9718_v6  ;;  %v1898_v9 = vadd.f32 %v4739_v11, %v1761_v59  ;;  %v4740_v44 = vpop.f32.mrb[36].mxu1 }
 0x19e   :  { %4151 = vmatprep.mubr.f32.mxu0 %v9719_v45  ;;  %v4741_v27 = vpop.f32.mrb[37].mxu1 }
 0x19f   :  { %6125 = vmatpush3.bf16.msra.mxu1 %v9680_v57  ;;  %v4742_v26 = vadd.f32 %v4741_v27, %v4740_v44  ;;  %v9723_v57 = vld [vmem:[#allocation10_spill] sm:$0xff] }
 0x1a0   :  { %6127 = vmatprep.subr.bf16.mxu1 %v9683_v60 }
 0x1a1   :  { %4153 = vmatmul.mubr.f32.gmra.mrb[90].mxu0 %v9720_v61  ;;  %v1909_v51 = vadd.f32 %v4742_v26, %v1770_v10 }
 0x1a2   :  { %4158 = vmatprep.mubr.f32.mxu0 %v9721_v2  ;;  %v4743_v1 = vpop.f32.mrb[38].mxu1 }
 0x1a3   :  { %6129 = vmatpush3.bf16.msra.mxu1 %v9686_v36  ;;  %v4744_v32 = vpop.f32.mrb[39].mxu1 }
 0x1a4   :  { %v4745_v60 = vadd.f32 %v4744_v32, %v4743_v1 }
 0x1a5   :  { %4160 = vmatmul.mubr.f32.gmra.mrb[92].mxu0 %v9722_v49 }
 0x1a6   :  { %4271 = vmatmul.mubr.f32.vlgmr.msra.gmra.mrb[88].mxu1 %v9718_v6  ;;  %4165 = vmatprep.mubr.f32.mxu0 %v9723_v57  ;;  %v1920_v3 = vadd.f32 %v4745_v60, %v1779_v62 }
 0x1a7   :  { %4276 = vmatprep.mubr.f32.mxu1 %v9719_v45 }
 0x1a9   :  { %4167 = vmatmul.mubr.f32.gmra.mrb[94].mxu0 %v9724_v58 }
 0x1aa   :  { %4278 = vmatmul.mubr.f32.gmra.mrb[90].mxu1 %v9720_v61 }
 0x1ab   :  { %4283 = vmatprep.mubr.f32.mxu1 %v9721_v2  ;;  %v4778_v36 = vpop.f32.mrb[40].mxu0 }
 0x1ac   :  { %v4779_v29 = vpop.f32.mrb[41].mxu0 }
 0x1ad   :  { %v4780_v55 = vadd.f32 %v4779_v29, %v4778_v36 }
 0x1ae   :  { %4285 = vmatmul.mubr.f32.gmra.mrb[92].mxu1 %v9722_v49 }
 0x1af   :  { %4290 = vmatprep.mubr.f32.mxu1 %v9723_v57  ;;  %v2088_v12 = vadd.f32 %v4780_v55, %v1887_v14  ;;  %v4781_v20 = vpop.f32.mrb[42].mxu0 }
 0x1b0   :  { %v4782_v8 = vpop.f32.mrb[43].mxu0 }
 0x1b1   :  { %v4783_v42 = vadd.f32 %v4782_v8, %v4781_v20 }
 0x1b2   :  { %4292 = vmatmul.mubr.f32.gmra.mrb[94].mxu1 %v9724_v58 }
 0x1b3   :  { %v2095_v37 = vadd.f32 %v4783_v42, %v1898_v9  ;;  %v4784_v34 = vpop.f32.mrb[44].mxu0 }
 0x1b4   :  { %v4822_v17 = vpop.f32.mrb[40].mxu1  ;;  %v4785_v15 = vpop.f32.mrb[45].mxu0 }
 0x1b5   :  { %v4786_v25 = vadd.f32 %v4785_v15, %v4784_v34  ;;  %v4823_v13 = vpop.f32.mrb[41].mxu1 }
 0x1b6   :  { %v4824_v22 = vadd.f32 %v4823_v13, %v4822_v17 }
 0x1b7   :  { %v2102_v38 = vadd.f32 %v4786_v25, %v1909_v51 }
 0x1b8   :  { %v4787_v48 = vpop.f32.mrb[46].mxu0  ;;  %v2213_v16 = vadd.f32 %v4824_v22, %v2088_v12  ;;  %v4825_v4 = vpop.f32.mrb[42].mxu1 }
 0x1b9   :  { %v4788_v47 = vpop.f32.mrb[47].mxu0  ;;  %v4826_v46 = vpop.f32.mrb[43].mxu1 }
 0x1ba   :  { %v4789_v19 = vadd.f32 %v4788_v47, %v4787_v48  ;;  %v4827_v56 = vadd.f32 %v4826_v46, %v4825_v4 }
 0x1bc   :  { %v2109_v52 = vadd.f32 %v4789_v19, %v1920_v3  ;;  %v2220_v33 = vadd.f32 %v4827_v56, %v2095_v37  ;;  %v4828_v28 = vpop.f32.mrb[44].mxu1 }
 0x1bd   :  { %v4829_v30 = vpop.f32.mrb[45].mxu1 }
 0x1be   :  { %v4830_v7 = vadd.f32 %v4829_v30, %v4828_v28 }
 0x1c0   :  { %v2227_v43 = vadd.f32 %v4830_v7, %v2102_v38  ;;  %v4831_v41 = vpop.f32.mrb[46].mxu1 }
 0x1c1   :  { %v4832_v53 = vpop.f32.mrb[47].mxu1 }
 0x1c2   :  { %v4833_v54 = vadd.f32 %v4832_v53, %v4831_v41 }
 0x1c4   :  { %v2234_v0 = vadd.f32 %v4833_v54, %v2109_v52 }
 0x1cc   :  { %v4866_v59 = vpop.f32.mrb[48].mxu0 }
 0x1cd   :  { %v4867_v18 = vpop.f32.mrb[49].mxu0 }
 0x1ce   :  { %v4868_v21 = vadd.f32 %v4867_v18, %v4866_v59 }
 0x1d0   :  { %v2346_v23 = vadd.f32 %v4868_v21, %v2213_v16  ;;  %v4869_v63 = vpop.f32.mrb[50].mxu0 }
 0x1d1   :  { %v4870_v50 = vpop.f32.mrb[51].mxu0 }
 0x1d2   :  { %v4871_v39 = vadd.f32 %v4870_v50, %v4869_v63 }
 0x1d4   :  { %v2361_v10 = vadd.f32 %v4871_v39, %v2220_v33  ;;  %v4872_v31 = vpop.f32.mrb[52].mxu0 }
 0x1d5   :  { %v4910_v14 = vpop.f32.mrb[48].mxu1  ;;  %v4873_v35 = vpop.f32.mrb[53].mxu0 }
 0x1d6   :  { %v4874_v40 = vadd.f32 %v4873_v35, %v4872_v31  ;;  %v4911_v6 = vpop.f32.mrb[49].mxu1 }
 0x1d7   :  { %v4912_v5 = vadd.f32 %v4911_v6, %v4910_v14 }
 0x1d8   :  { %v2376_v24 = vadd.f32 %v4874_v40, %v2227_v43  ;;  %v4875_v45 = vpop.f32.mrb[54].mxu0 }
 0x1d9   :  { %v2623_v11 = vadd.f32 %v4912_v5, %v2346_v23  ;;  %v4913_v62 = vpop.f32.mrb[50].mxu1  ;;  %v4876_v9 = vpop.f32.mrb[55].mxu0 }
 0x1da   :  { %v4877_v44 = vadd.f32 %v4876_v9, %v4875_v45  ;;  %v4914_v61 = vpop.f32.mrb[51].mxu1 }
 0x1db   :  { %v4915_v27 = vadd.f32 %v4914_v61, %v4913_v62 }
 0x1dc   :  { %v2391_v2 = vadd.f32 %v4877_v44, %v2234_v0 }
 0x1dd   :  { %v2630_v26 = vadd.f32 %v4915_v27, %v2361_v10  ;;  %v4916_v51 = vpop.f32.mrb[52].mxu1 }
 0x1de   :  { %v4917_v1 = vpop.f32.mrb[53].mxu1 }
 0x1df   :  { %v4918_v49 = vadd.f32 %v4917_v1, %v4916_v51 }
 0x1e1   :  { %v2637_v32 = vadd.f32 %v4918_v49, %v2376_v24  ;;  %v4919_v57 = vpop.f32.mrb[54].mxu1 }
 0x1e2   :  { %v4920_v60 = vpop.f32.mrb[55].mxu1 }
 0x1e3   :  { %v4921_v3 = vadd.f32 %v4920_v60, %v4919_v57 }
 0x1e5   :  { %v2644_v58 = vadd.f32 %v4921_v3, %v2391_v2 }
 0x1ec   :  { %v4954_v36 = vpop.f32.mrb[56].mxu0 }
 0x1ed   :  { %v4955_v29 = vpop.f32.mrb[57].mxu0 }
 0x1ee   :  { %v4956_v55 = vadd.f32 %v4955_v29, %v4954_v36 }
 0x1f0   :  { %v2782_v12 = vadd.f32 %v4956_v55, %v2623_v11  ;;  %v4957_v20 = vpop.f32.mrb[58].mxu0 }
 0x1f1   :  { %v4958_v8 = vpop.f32.mrb[59].mxu0 }
 0x1f2   :  { %v4959_v42 = vadd.f32 %v4958_v8, %v4957_v20 }
 0x1f4   :  { %v2791_v37 = vadd.f32 %v4959_v42, %v2630_v26  ;;  %v4960_v34 = vpop.f32.mrb[60].mxu0 }
 0x1f5   :  { %v4961_v15 = vpop.f32.mrb[61].mxu0 }
 0x1f6   :  { %v4998_v17 = vpop.f32.mrb[56].mxu1  ;;  %v4962_v25 = vadd.f32 %v4961_v15, %v4960_v34 }
 0x1f7   :  { %v4999_v13 = vpop.f32.mrb[57].mxu1 }
 0x1f8   :  { %v5000_v22 = vadd.f32 %v4999_v13, %v4998_v17  ;;  %v2800_v38 = vadd.f32 %v4962_v25, %v2637_v32  ;;  %v4963_v48 = vpop.f32.mrb[62].mxu0 }
 0x1f9   :  { %v4964_v47 = vpop.f32.mrb[63].mxu0 }
 0x1fa   :  { %v2917_v16 = vadd.f32 %v5000_v22, %v2782_v12  ;;  %v4965_v19 = vadd.f32 %v4964_v47, %v4963_v48 }
 0x1fc   :  { %v5001_v4 = vpop.f32.mrb[58].mxu1  ;;  %v2809_v52 = vadd.f32 %v4965_v19, %v2644_v58 }
 0x1fd   :  { %v5002_v46 = vpop.f32.mrb[59].mxu1 }
 0x1fe   :  { %v5003_v56 = vadd.f32 %v5002_v46, %v5001_v4 }
 0x200   :  { %v2928_v33 = vadd.f32 %v5003_v56, %v2791_v37  ;;  %v5004_v28 = vpop.f32.mrb[60].mxu1 }
 0x201   :  { %v5005_v30 = vpop.f32.mrb[61].mxu1 }
 0x202   :  { %v5006_v7 = vadd.f32 %v5005_v30, %v5004_v28 }
 0x204   :  { %v2939_v43 = vadd.f32 %v5006_v7, %v2800_v38 }
 0x205   :  { %v5007_v41 = vpop.f32.mrb[62].mxu1 }
 0x206   :  { %v5008_v53 = vpop.f32.mrb[63].mxu1 }
 0x207   :  { %v5009_v54 = vadd.f32 %v5008_v53, %v5007_v41 }
 0x209   :  { %v2950_v0 = vadd.f32 %v5009_v54, %v2809_v52 }
 0x20f   :  { %v5042_v59 = vpop.f32.mrb[64].mxu0 }
 0x210   :  { %v5043_v18 = vpop.f32.mrb[65].mxu0 }
 0x211   :  { %v5044_v21 = vadd.f32 %v5043_v18, %v5042_v59 }
 0x213   :  { %v3118_v23 = vadd.f32 %v5044_v21, %v2917_v16  ;;  %v5045_v63 = vpop.f32.mrb[66].mxu0 }
 0x214   :  { %v5046_v50 = vpop.f32.mrb[67].mxu0 }
 0x215   :  { %v5047_v39 = vadd.f32 %v5046_v50, %v5045_v63 }
 0x217   :  { %v3125_v10 = vadd.f32 %v5047_v39, %v2928_v33  ;;  %v5048_v31 = vpop.f32.mrb[68].mxu0 }
 0x218   :  { %v5086_v14 = vpop.f32.mrb[64].mxu1  ;;  %v5049_v35 = vpop.f32.mrb[69].mxu0 }
 0x219   :  { %v5050_v40 = vadd.f32 %v5049_v35, %v5048_v31  ;;  %v5087_v6 = vpop.f32.mrb[65].mxu1 }
 0x21a   :  { %v5088_v5 = vadd.f32 %v5087_v6, %v5086_v14 }
 0x21b   :  { %v3132_v24 = vadd.f32 %v5050_v40, %v2939_v43  ;;  %v5051_v45 = vpop.f32.mrb[70].mxu0 }
 0x21c   :  { %v3243_v11 = vadd.f32 %v5088_v5, %v3118_v23  ;;  %v5089_v62 = vpop.f32.mrb[66].mxu1  ;;  %v5052_v9 = vpop.f32.mrb[71].mxu0 }
 0x21d   :  { %v5053_v44 = vadd.f32 %v5052_v9, %v5051_v45  ;;  %v5090_v61 = vpop.f32.mrb[67].mxu1 }
 0x21e   :  { %v5091_v27 = vadd.f32 %v5090_v61, %v5089_v62 }
 0x21f   :  { %v3139_v2 = vadd.f32 %v5053_v44, %v2950_v0 }
 0x220   :  { %v3250_v26 = vadd.f32 %v5091_v27, %v3125_v10  ;;  %v5092_v51 = vpop.f32.mrb[68].mxu1 }
 0x221   :  { %v5093_v1 = vpop.f32.mrb[69].mxu1 }
 0x222   :  { %v5094_v49 = vadd.f32 %v5093_v1, %v5092_v51 }
 0x224   :  { %v3257_v32 = vadd.f32 %v5094_v49, %v3132_v24  ;;  %v5095_v57 = vpop.f32.mrb[70].mxu1 }
 0x225   :  { %v5096_v60 = vpop.f32.mrb[71].mxu1 }
 0x226   :  { %v5097_v3 = vadd.f32 %v5096_v60, %v5095_v57 }
 0x228   :  { %v3264_v58 = vadd.f32 %v5097_v3, %v3139_v2 }
 0x22f   :  { %v5130_v36 = vpop.f32.mrb[72].mxu0 }
 0x230   :  { %v5131_v29 = vpop.f32.mrb[73].mxu0 }
 0x231   :  { %v5132_v55 = vadd.f32 %v5131_v29, %v5130_v36 }
 0x233   :  { %v3376_v12 = vadd.f32 %v5132_v55, %v3243_v11  ;;  %v5133_v20 = vpop.f32.mrb[74].mxu0 }
 0x234   :  { %v5134_v8 = vpop.f32.mrb[75].mxu0 }
 0x235   :  { %v5135_v42 = vadd.f32 %v5134_v8, %v5133_v20 }
 0x237   :  { %v3391_v37 = vadd.f32 %v5135_v42, %v3250_v26  ;;  %v5136_v34 = vpop.f32.mrb[76].mxu0 }
 0x238   :  { %v5174_v17 = vpop.f32.mrb[72].mxu1  ;;  %v5137_v15 = vpop.f32.mrb[77].mxu0 }
 0x239   :  { %v5138_v25 = vadd.f32 %v5137_v15, %v5136_v34  ;;  %v5175_v13 = vpop.f32.mrb[73].mxu1 }
 0x23a   :  { %v5176_v22 = vadd.f32 %v5175_v13, %v5174_v17 }
 0x23b   :  { %v3406_v38 = vadd.f32 %v5138_v25, %v3257_v32  ;;  %v5139_v48 = vpop.f32.mrb[78].mxu0 }
 0x23c   :  { %v3653_v16 = vadd.f32 %v5176_v22, %v3376_v12  ;;  %v5177_v4 = vpop.f32.mrb[74].mxu1  ;;  %v5140_v47 = vpop.f32.mrb[79].mxu0 }
 0x23d   :  { %v5141_v19 = vadd.f32 %v5140_v47, %v5139_v48  ;;  %v5178_v46 = vpop.f32.mrb[75].mxu1 }
 0x23e   :  { %v5179_v56 = vadd.f32 %v5178_v46, %v5177_v4 }
 0x23f   :  { %v3421_v52 = vadd.f32 %v5141_v19, %v3264_v58 }
 0x240   :  { %v3660_v33 = vadd.f32 %v5179_v56, %v3391_v37  ;;  %v5180_v28 = vpop.f32.mrb[76].mxu1 }
 0x241   :  { %v5181_v30 = vpop.f32.mrb[77].mxu1 }
 0x242   :  { %v5182_v7 = vadd.f32 %v5181_v30, %v5180_v28 }
 0x244   :  { %v3667_v43 = vadd.f32 %v5182_v7, %v3406_v38  ;;  %v5183_v41 = vpop.f32.mrb[78].mxu1 }
 0x245   :  { %v5184_v53 = vpop.f32.mrb[79].mxu1 }
 0x246   :  { %v5185_v54 = vadd.f32 %v5184_v53, %v5183_v41 }
 0x248   :  { %v3674_v0 = vadd.f32 %v5185_v54, %v3421_v52 }
 0x250   :  { %v5218_v59 = vpop.f32.mrb[80].mxu0 }
 0x251   :  { %v5219_v18 = vpop.f32.mrb[81].mxu0 }
 0x252   :  { %v5220_v21 = vadd.f32 %v5219_v18, %v5218_v59 }
 0x254   :  { %v3812_v23 = vadd.f32 %v5220_v21, %v3653_v16  ;;  %v5221_v63 = vpop.f32.mrb[82].mxu0 }
 0x255   :  { %v5222_v50 = vpop.f32.mrb[83].mxu0 }
 0x256   :  { %v5223_v39 = vadd.f32 %v5222_v50, %v5221_v63 }
 0x258   :  { %v3821_v10 = vadd.f32 %v5223_v39, %v3660_v33  ;;  %v5224_v31 = vpop.f32.mrb[84].mxu0 }
 0x259   :  { %v5262_v14 = vpop.f32.mrb[80].mxu1  ;;  %v5225_v35 = vpop.f32.mrb[85].mxu0 }
 0x25a   :  { %v5226_v40 = vadd.f32 %v5225_v35, %v5224_v31  ;;  %v5263_v6 = vpop.f32.mrb[81].mxu1 }
 0x25b   :  { %v5264_v5 = vadd.f32 %v5263_v6, %v5262_v14 }
 0x25c   :  { %v3830_v24 = vadd.f32 %v5226_v40, %v3667_v43  ;;  %v5227_v45 = vpop.f32.mrb[86].mxu0 }
 0x25d   :  { %v3947_v11 = vadd.f32 %v5264_v5, %v3812_v23  ;;  %v5265_v62 = vpop.f32.mrb[82].mxu1  ;;  %v5228_v9 = vpop.f32.mrb[87].mxu0 }
 0x25e   :  { %v5229_v44 = vadd.f32 %v5228_v9, %v5227_v45  ;;  %v5266_v61 = vpop.f32.mrb[83].mxu1 }
 0x25f   :  { %v5267_v27 = vadd.f32 %v5266_v61, %v5265_v62 }
 0x260   :  { %v3839_v2 = vadd.f32 %v5229_v44, %v3674_v0 }
 0x261   :  { %v3958_v26 = vadd.f32 %v5267_v27, %v3821_v10  ;;  %v5268_v51 = vpop.f32.mrb[84].mxu1 }
 0x262   :  { %v5269_v1 = vpop.f32.mrb[85].mxu1 }
 0x263   :  { %v5270_v49 = vadd.f32 %v5269_v1, %v5268_v51 }
 0x265   :  { %v3969_v32 = vadd.f32 %v5270_v49, %v3830_v24  ;;  %v5271_v57 = vpop.f32.mrb[86].mxu1 }
 0x266   :  { %v5272_v60 = vpop.f32.mrb[87].mxu1 }
 0x267   :  { %v5273_v3 = vadd.f32 %v5272_v60, %v5271_v57 }
 0x269   :  { %v3980_v58 = vadd.f32 %v5273_v3, %v3839_v2 }
 0x270   :  { %v5306_v36 = vpop.f32.mrb[88].mxu0 }
 0x271   :  { %v5307_v29 = vpop.f32.mrb[89].mxu0 }
 0x272   :  { %v5308_v55 = vadd.f32 %v5307_v29, %v5306_v36 }
 0x274   :  { %v4148_v12 = vadd.f32 %v5308_v55, %v3947_v11  ;;  %v5309_v20 = vpop.f32.mrb[90].mxu0 }
 0x275   :  { %v5310_v8 = vpop.f32.mrb[91].mxu0 }
 0x276   :  { %v5311_v42 = vadd.f32 %v5310_v8, %v5309_v20 }
 0x278   :  { %v4155_v37 = vadd.f32 %v5311_v42, %v3958_v26  ;;  %v5312_v34 = vpop.f32.mrb[92].mxu0 }
 0x279   :  { %v5350_v17 = vpop.f32.mrb[88].mxu1  ;;  %v5313_v15 = vpop.f32.mrb[93].mxu0 }
 0x27a   :  { %v5314_v25 = vadd.f32 %v5313_v15, %v5312_v34  ;;  %v5351_v13 = vpop.f32.mrb[89].mxu1 }
 0x27b   :  { %v5352_v22 = vadd.f32 %v5351_v13, %v5350_v17 }
 0x27c   :  { %v4162_v38 = vadd.f32 %v5314_v25, %v3969_v32  ;;  %v5315_v48 = vpop.f32.mrb[94].mxu0 }
 0x27d   :  { %v4273_v16 = vadd.f32 %v5352_v22, %v4148_v12  ;;  %v5353_v4 = vpop.f32.mrb[90].mxu1  ;;  %v5316_v47 = vpop.f32.mrb[95].mxu0 }
 0x27e   :  { %v5317_v19 = vadd.f32 %v5316_v47, %v5315_v48  ;;  %v5354_v46 = vpop.f32.mrb[91].mxu1 }
 0x27f   :  { %4298 = vst.msk [vmem:[%s8887_s3] sm:$0xff] %vm4297_vm0, %v4273_v16  ;;  %v5355_v56 = vadd.f32 %v5354_v46, %v5353_v4 }
 0x280   :  { %v4169_v52 = vadd.f32 %v5317_v19, %v3980_v58 }
 0x281   :  { %v4280_v33 = vadd.f32 %v5355_v56, %v4155_v37  ;;  %v5356_v28 = vpop.f32.mrb[92].mxu1 }
 0x282   :  { %v5357_v30 = vpop.f32.mrb[93].mxu1 }
 0x283   :  { %4299 = vst.msk [vmem:[%s8887_s3 + $0x8] sm:$0xff] %vm4297_vm0, %v4280_v33  ;;  %v5358_v7 = vadd.f32 %v5357_v30, %v5356_v28 }
 0x285   :  { %v4287_v43 = vadd.f32 %v5358_v7, %v4162_v38  ;;  %v5359_v41 = vpop.f32.mrb[94].mxu1 }
 0x286   :  { %v5360_v53 = vpop.f32.mrb[95].mxu1 }
 0x287   :  { %4300 = vst.msk [vmem:[%s8887_s3 + $0x10] sm:$0xff] %vm4297_vm0, %v4287_v43  ;;  %v5361_v54 = vadd.f32 %v5360_v53, %v5359_v41 }
 0x289   :  { %v4294_v0 = vadd.f32 %v5361_v54, %v4169_v52 }
 0x28b   :  { %4301 = vst.msk [vmem:[%s8887_s3 + $0x18] sm:$0xff] %vm4297_vm0, %v4294_v0 }

</bundles_post_ra>
